<compile_context>
chip_gen: v5e
topology: v5e:2x2
jax: 0.10.0
libtpu: 0.0.40
codegen_flags: <defaults>
</compile_context>

<pallas_src>
import functools
import math

import jax
import jax.numpy as jnp
from jax.experimental import pallas as pl
from jax.experimental.pallas import tpu as pltpu

LN_EPS = 1e-5
HOST_PREC = jax.lax.Precision.HIGHEST   # host-side fusion + pure-JAX reference only


# ----------------------------- in-kernel math --------------------------------
def _mm(a, b):
    """MXU matmul: bf16 operands, f32 accumulation."""
    return jnp.dot(a.astype(jnp.bfloat16), b.astype(jnp.bfloat16),
                   preferred_element_type=jnp.float32)


def _layernorm(x, g, b):
    mu = jnp.mean(x, axis=-1, keepdims=True)
    var = jnp.mean((x - mu) ** 2, axis=-1, keepdims=True)
    return (x - mu) * jax.lax.rsqrt(var + LN_EPS) * g + b


def _attention(xq, xkv, w_qkv, b_qkv, w_o, b_o, L, B, H, *, fused_qkv):
    """Multi-head attention over the *batch* axis (reference reshape semantics).

    xq, xkv : (L*B, E) f32 row-major flattened activations.
    w_qkv   : (E, 3E) bf16 fused [q|k|v] projection (1/sqrt(hd) folded into q).
    b_qkv   : (1, 3E) f32.   w_o: (E, E) bf16.   b_o: (1, E) f32.
    """
    E = xq.shape[-1]
    hd = E // H

    if fused_qkv:                       # self-attention: one (N,E)@(E,3E) matmul
        qkv = _mm(xq, w_qkv) + b_qkv
        q, k, v = qkv[:, :E], qkv[:, E:2 * E], qkv[:, 2 * E:]
    else:                               # cross-attention: q from xq, k/v from xkv
        q = _mm(xq, w_qkv[:, :E]) + b_qkv[:, :E]
        kv = _mm(xkv, w_qkv[:, E:]) + b_qkv[:, E:]
        k, v = kv[:, :E], kv[:, E:]

    q3 = q.reshape(L, B, E)
    k3 = k.reshape(L, B, E)
    v3 = v.reshape(L, B, E)

    # Per-head batched contractions (batch dim = sequence position l).
    # s[l,b,c] = sum_d q[l,b,d] k[l,c,d]; softmax over the key-*batch* axis c.
    heads = []
    for h in range(H):
        cols = slice(h * hd, (h + 1) * hd)
        qh = q3[:, :, cols].astype(jnp.bfloat16)
        kh = k3[:, :, cols].astype(jnp.bfloat16)
        vh = v3[:, :, cols].astype(jnp.bfloat16)
        s = jnp.einsum("lbd,lcd->lbc", qh, kh,
                       preferred_element_type=jnp.float32)          # (L, B, B)
        s = s - jnp.max(s, axis=-1, keepdims=True)
        p = jnp.exp(s)
        a = p * pl.reciprocal(jnp.sum(p, axis=-1, keepdims=True), approx=True)
        heads.append(jnp.einsum("lbc,lcd->lbd", a.astype(jnp.bfloat16), vh,
                                preferred_element_type=jnp.float32))  # (L, B, hd)

    ctx = jnp.concatenate(heads, axis=-1).reshape(L * B, E)
    return _mm(ctx, w_o) + b_o


def _decoder_kernel(H, B, tgt_ref, mem_ref, wqkv_ref, bqkv_ref, wo_ref,
                    vec_ref, w1_ref, b1_ref, w2_ref, out_ref):
    N, E = tgt_ref.shape
    L = N // B

    tgt = tgt_ref[...]          # (N, E) flat layout — no relayout reshape
    mem = mem_ref[...]
    bqkv = bqkv_ref[...]        # (2, 3E) f32
    vec = vec_ref[...]          # (9, E) f32: bo_self, bo_cross, b_ff2, ln1 g/b, ln2 g/b, ln3 g/b

    # self-attention -> residual -> LayerNorm1
    sa = _attention(tgt, tgt, wqkv_ref[0], bqkv[0:1], wo_ref[0], vec[0:1],
                    L, B, H, fused_qkv=True)
    x = _layernorm(tgt + sa, vec[3:4], vec[4:5])

    # cross-attention -> residual -> LayerNorm2
    ca = _attention(x, mem, wqkv_ref[1], bqkv[1:2], wo_ref[1], vec[1:2],
                    L, B, H, fused_qkv=False)
    x = _layernorm(x + ca, vec[5:6], vec[6:7])

    # FFN -> residual -> LayerNorm3
    hidden = jnp.maximum(_mm(x, w1_ref[...]) + b1_ref[...], 0.0)
    ff = _mm(hidden, w2_ref[...]) + vec[2:3]
    out_ref[...] = _layernorm(x + ff, vec[7:8], vec[8:9])


# ----------------------------- wrapper ---------------------------------------
def lowrank_decoder_layer(tgt, memory, packed, n_heads, *, tile_l=None,
                          vmem_limit_bytes=32 * 1024 * 1024):
    T, B, E = tgt.shape
    S = memory.shape[0]
    assert S == T, "reference-module semantics require tgt_len == memory_len"
    assert E % n_heads == 0
    if tile_l is None:
        tile_l = T                      # toy sizes: single grid step, no pipeline overhead
    assert T % tile_l == 0
    assert (tile_l * B) % 8 == 0 or tile_l == T
    num_tiles = T // tile_l

    wqkv, bqkv, wo, vec, w1, b1, w2 = packed

    # Flat (T*B, E) activation slabs: the (T,B,E) row-major flatten is contiguous,
    # so the HBM tiles are unchanged and the kernel sees layout-clean 2D blocks.
    tgt2 = tgt.reshape(T * B, E)
    mem2 = memory.reshape(T * B, E)

    act_spec = pl.BlockSpec((tile_l * B, E), lambda i: (i, 0))

    def const_spec(arr):
        zeros = (0,) * arr.ndim
        return pl.BlockSpec(arr.shape, lambda i: zeros)

    out2 = pl.pallas_call(
        functools.partial(_decoder_kernel, n_heads, B),
        out_shape=jax.ShapeDtypeStruct((T * B, E), jnp.float32),
        grid=(num_tiles,),
        in_specs=[act_spec, act_spec,
                  const_spec(wqkv), const_spec(bqkv), const_spec(wo),
                  const_spec(vec), const_spec(w1), const_spec(b1),
                  const_spec(w2)],
        out_specs=act_spec,
        compiler_params=pltpu.CompilerParams(
            dimension_semantics=("parallel",),
            vmem_limit_bytes=vmem_limit_bytes),
    )(tgt2, mem2, wqkv, bqkv, wo, vec, w1, b1, w2)
    return out2.reshape(T, B, E)


# ----------------------------- parameters ------------------------------------
def init_raw_params(key, d_model, rank, d_ff):
    """Raw (unfused) params in math layout: W is (d_in, d_out), b is (1, d_out)."""

    def linear_init(k, d_in, d_out):
        kw, kb = jax.random.split(k)
        bound = 1.0 / math.sqrt(d_in)          # torch nn.Linear default-style init
        w = jax.random.uniform(kw, (d_in, d_out), jnp.float32, -bound, bound)
        b = jax.random.uniform(kb, (1, d_out), jnp.float32, -bound, bound)
        return w, b

    keys = iter(jax.random.split(key, 18))

    def attn_block():
        blk = {}
        for name in ("q", "k", "v", "out"):
            blk[name + "_low"] = linear_init(next(keys), d_model, rank)
            blk[name + "_high"] = linear_init(next(keys), rank, d_model)
        return blk

    ones = jnp.ones((1, d_model), jnp.float32)
    zeros = jnp.zeros((1, d_model), jnp.float32)
    return {
        "self_attn": attn_block(),
        "cross_attn": attn_block(),
        "ffn1": linear_init(next(keys), d_model, d_ff),
        "ffn2": linear_init(next(keys), d_ff, d_model),
        "ln1": (ones, zeros),
        "ln2": (ones, zeros),
        "ln3": (ones, zeros),
    }


def fuse_and_pack_params(raw, n_heads, d_model):
    """Fold each low-rank pair into one dense linear and pack into bf16/f32 slabs."""
    hd = d_model // n_heads
    scale = 1.0 / math.sqrt(hd)

    def fuse(low, high, s=1.0):
        (wl, bl), (wh, bh) = low, high
        w = jnp.dot(wl, wh, precision=HOST_PREC) * s            # (E, E)
        b = (jnp.dot(bl, wh, precision=HOST_PREC) + bh) * s     # (1, E)
        return w, b[0]

    qkv_ws, qkv_bs, o_ws, o_bs = [], [], [], []
    for blk in ("self_attn", "cross_attn"):
        p = raw[blk]
        wq, bq = fuse(p["q_low"], p["q_high"], scale)           # 1/sqrt(hd) folded into q
        wk, bk = fuse(p["k_low"], p["k_high"])
        wv, bv = fuse(p["v_low"], p["v_high"])
        wo_, bo_ = fuse(p["out_low"], p["out_high"])
        qkv_ws.append(jnp.concatenate([wq, wk, wv], axis=1))    # (E, 3E)
        qkv_bs.append(jnp.concatenate([bq, bk, bv], axis=0))    # (3E,)
        o_ws.append(wo_)
        o_bs.append(bo_)

    w1, b1 = raw["ffn1"]                                        # (E, F), (1, F)
    w2, b2 = raw["ffn2"]                                        # (F, E), (1, E)
    (g1, be1), (g2, be2), (g3, be3) = raw["ln1"], raw["ln2"], raw["ln3"]

    wqkv = jnp.stack(qkv_ws, axis=0).astype(jnp.bfloat16)       # (2, E, 3E)
    bqkv = jnp.stack(qkv_bs, axis=0)                            # (2, 3E)   f32
    wo = jnp.stack(o_ws, axis=0).astype(jnp.bfloat16)           # (2, E, E)
    vec = jnp.stack([o_bs[0], o_bs[1], b2[0],
                     g1[0], be1[0], g2[0], be2[0], g3[0], be3[0]],
                    axis=0)                                     # (9, E)    f32
    return (wqkv, bqkv, wo, vec,
            w1.astype(jnp.bfloat16), b1, w2.astype(jnp.bfloat16))


# ----------------------------- pure-JAX reference -----------------------------
def reference_decoder_layer(tgt, memory, raw, n_heads):
    """Faithful pure-JAX f32 port of the PyTorch module (unfused low-rank chains)."""

    def linear(x, wb):
        w, b = wb
        return jnp.dot(x, w, precision=HOST_PREC) + b

    def layer_norm(x, gb):
        g, b = gb
        mu = jnp.mean(x, axis=-1, keepdims=True)
        var = jnp.mean((x - mu) ** 2, axis=-1, keepdims=True)
        return (x - mu) * jax.lax.rsqrt(var + LN_EPS) * g + b

    def lowrank_mha(query, key, value, p):
        L, B, E = query.shape
        H = n_heads
        hd = E // H
        q = linear(linear(query, p["q_low"]), p["q_high"])
        k = linear(linear(key, p["k_low"]), p["k_high"])
        v = linear(linear(value, p["v_low"]), p["v_high"])
        # faithful to the reference reshape: heads land over the *batch* axis
        q = q.reshape(L, B, H, hd).transpose(0, 2, 1, 3)
        k = k.reshape(k.shape[0], B, H, hd).transpose(0, 2, 1, 3)
        v = v.reshape(v.shape[0], B, H, hd).transpose(0, 2, 1, 3)
        s = jnp.einsum("lhbd,lhcd->lhbc", q, k, precision=HOST_PREC) / math.sqrt(hd)
        a = jax.nn.softmax(s, axis=-1)
        o = jnp.einsum("lhbc,lhcd->lhbd", a, v, precision=HOST_PREC)
        o = o.transpose(0, 2, 1, 3).reshape(L, B, E)
        return linear(linear(o, p["out_low"]), p["out_high"])

    x = layer_norm(tgt + lowrank_mha(tgt, tgt, tgt, raw["self_attn"]), raw["ln1"])
    x = layer_norm(x + lowrank_mha(x, memory, memory, raw["cross_attn"]), raw["ln2"])
    ff = linear(jnp.maximum(linear(x, raw["ffn1"]), 0.0), raw["ffn2"])
    return layer_norm(x + ff, raw["ln3"])


# ----------------------------- main -------------------------------------------
if __name__ == "__main__":
    d_model, n_heads, rank, d_ff = 32, 4, 8, 64
    T = S = 8           # reference-module semantics require tgt_len == memory_len
    B = 2

    key = jax.random.PRNGKey(0)
    k_tgt, k_mem, k_par = jax.random.split(key, 3)
    tgt = jax.random.normal(k_tgt, (T, B, d_model), jnp.float32)
    memory = jax.random.normal(k_mem, (S, B, d_model), jnp.float32)

    raw = init_raw_params(k_par, d_model, rank, d_ff)
    packed = fuse_and_pack_params(raw, n_heads, d_model)

    # f32 reference with the original unfused low-rank chains (faithful to PyTorch).
    ref = jax.block_until_ready(reference_decoder_layer(tgt, memory, raw, n_heads))

    # Toy config: single grid step (whole problem resident in VMEM).
    out = jax.block_until_ready(
        lowrank_decoder_layer(tgt, memory, packed, n_heads))
    assert out.shape == (T, B, d_model)
    # bf16 MXU operands + fused low-rank weights + approx reciprocal -> looser
    # tolerance than the pure-f32 check (per review correctness note).
    assert jnp.allclose(out, ref, atol=5e-2, rtol=5e-2), \
        float(jnp.max(jnp.abs(out - ref)))

    # Also exercise the gridded (pipelined, sequence-parallel) production path.
    out_tiled = jax.block_until_ready(
        lowrank_decoder_layer(tgt, memory, packed, n_heads, tile_l=4))
    assert jnp.allclose(out_tiled, ref, atol=5e-2, rtol=5e-2), \
        float(jnp.max(jnp.abs(out_tiled - ref)))

    print("KERNEL_OK")
</pallas_src>

<mosaic_0001>
module attributes {stable_mosaic.version = 11 : i64} {
  func.func @_decoder_kernel(%arg0: i32, %arg1: memref<16x32xf32, #tpu.memory_space<vmem>>, %arg2: memref<16x32xf32, #tpu.memory_space<vmem>>, %arg3: memref<2x32x96xbf16, #tpu.memory_space<vmem>>, %arg4: memref<2x96xf32, #tpu.memory_space<vmem>>, %arg5: memref<2x32x32xbf16, #tpu.memory_space<vmem>>, %arg6: memref<9x32xf32, #tpu.memory_space<vmem>>, %arg7: memref<32x64xbf16, #tpu.memory_space<vmem>>, %arg8: memref<1x64xf32, #tpu.memory_space<vmem>>, %arg9: memref<64x32xbf16, #tpu.memory_space<vmem>>, %arg10: memref<16x32xf32, #tpu.memory_space<vmem>>) attributes {dimension_semantics = [#tpu.dimension_semantics<parallel>], iteration_bounds = array<i64: 1>, scalar_prefetch = 0 : i64, scratch_operands = 0 : i64, tpu.core_type = #tpu.core_type<tc>, window_params = [{transform_indices = @transform_0, window_bounds = array<i64: 16, 32>}, {transform_indices = @transform_1, window_bounds = array<i64: 16, 32>}, {pipeline_mode = #tpu.pipeline_mode<synchronous>, transform_indices = @transform_2, window_bounds = array<i64: 2, 32, 96>}, {pipeline_mode = #tpu.pipeline_mode<synchronous>, transform_indices = @transform_3, window_bounds = array<i64: 2, 96>}, {pipeline_mode = #tpu.pipeline_mode<synchronous>, transform_indices = @transform_4, window_bounds = array<i64: 2, 32, 32>}, {pipeline_mode = #tpu.pipeline_mode<synchronous>, transform_indices = @transform_5, window_bounds = array<i64: 9, 32>}, {pipeline_mode = #tpu.pipeline_mode<synchronous>, transform_indices = @transform_6, window_bounds = array<i64: 32, 64>}, {pipeline_mode = #tpu.pipeline_mode<synchronous>, transform_indices = @transform_7, window_bounds = array<i64: 1, 64>}, {pipeline_mode = #tpu.pipeline_mode<synchronous>, transform_indices = @transform_8, window_bounds = array<i64: 64, 32>}, {transform_indices = @transform_9, window_bounds = array<i64: 16, 32>}]} {
    %c0 = arith.constant 0 : index
    %c0_0 = arith.constant 0 : index
    %0 = vector.load %arg1[%c0, %c0_0] : memref<16x32xf32, #tpu.memory_space<vmem>>, vector<16x32xf32>
    %c0_1 = arith.constant 0 : index
    %c0_2 = arith.constant 0 : index
    %1 = vector.load %arg2[%c0_1, %c0_2] : memref<16x32xf32, #tpu.memory_space<vmem>>, vector<16x32xf32>
    %c0_3 = arith.constant 0 : index
    %c0_4 = arith.constant 0 : index
    %2 = vector.load %arg4[%c0_3, %c0_4] : memref<2x96xf32, #tpu.memory_space<vmem>>, vector<2x96xf32>
    %c0_5 = arith.constant 0 : index
    %c0_6 = arith.constant 0 : index
    %3 = vector.load %arg6[%c0_5, %c0_6] : memref<9x32xf32, #tpu.memory_space<vmem>>, vector<9x32xf32>
    %c0_7 = arith.constant 0 : index
    %c0_8 = arith.constant 0 : index
    %c0_9 = arith.constant 0 : index
    %4 = vector.load %arg3[%c0_7, %c0_8, %c0_9] : memref<2x32x96xbf16, #tpu.memory_space<vmem>>, vector<1x32x96xbf16>
    %5 = vector.shape_cast %4 : vector<1x32x96xbf16> to vector<32x96xbf16>
    %6 = vector.extract_strided_slice %2 {offsets = [0, 0], sizes = [1, 96], strides = [1, 1]} : vector<2x96xf32> to vector<1x96xf32>
    %c0_10 = arith.constant 0 : index
    %c0_11 = arith.constant 0 : index
    %c0_12 = arith.constant 0 : index
    %7 = vector.load %arg5[%c0_10, %c0_11, %c0_12] : memref<2x32x32xbf16, #tpu.memory_space<vmem>>, vector<1x32x32xbf16>
    %8 = vector.shape_cast %7 : vector<1x32x32xbf16> to vector<32x32xbf16>
    %9 = vector.extract_strided_slice %3 {offsets = [0, 0], sizes = [1, 32], strides = [1, 1]} : vector<9x32xf32> to vector<1x32xf32>
    %10 = arith.truncf %0 : vector<16x32xf32> to vector<16x32xbf16>
    %cst = arith.constant dense<0.000000e+00> : vector<16x96xf32>
    %11 = tpu.matmul %10, %5, %cst {dimension_numbers = #tpu.dot_dimension_numbers<[1], [0], [0], [1], [0, 0, 1, 1], [], []>} : vector<16x32xbf16>, vector<32x96xbf16>, vector<16x96xf32> -> vector<16x96xf32>
    %12 = vector.broadcast %6 : vector<1x96xf32> to vector<16x96xf32>
    %13 = arith.addf %11, %12 : vector<16x96xf32>
    %14 = vector.extract_strided_slice %13 {offsets = [0, 0], sizes = [16, 32], strides = [1, 1]} : vector<16x96xf32> to vector<16x32xf32>
    %15 = vector.extract_strided_slice %13 {offsets = [0, 32], sizes = [16, 32], strides = [1, 1]} : vector<16x96xf32> to vector<16x32xf32>
    %16 = vector.extract_strided_slice %13 {offsets = [0, 64], sizes = [16, 32], strides = [1, 1]} : vector<16x96xf32> to vector<16x32xf32>
    %17 = vector.shape_cast %14 : vector<16x32xf32> to vector<8x2x32xf32>
    %18 = vector.shape_cast %15 : vector<16x32xf32> to vector<8x2x32xf32>
    %19 = vector.shape_cast %16 : vector<16x32xf32> to vector<8x2x32xf32>
    %20 = vector.extract_strided_slice %17 {offsets = [0, 0, 0], sizes = [8, 2, 8], strides = [1, 1, 1]} : vector<8x2x32xf32> to vector<8x2x8xf32>
    %21 = arith.truncf %20 : vector<8x2x8xf32> to vector<8x2x8xbf16>
    %22 = vector.extract_strided_slice %18 {offsets = [0, 0, 0], sizes = [8, 2, 8], strides = [1, 1, 1]} : vector<8x2x32xf32> to vector<8x2x8xf32>
    %23 = arith.truncf %22 : vector<8x2x8xf32> to vector<8x2x8xbf16>
    %24 = vector.extract_strided_slice %19 {offsets = [0, 0, 0], sizes = [8, 2, 8], strides = [1, 1, 1]} : vector<8x2x32xf32> to vector<8x2x8xf32>
    %25 = arith.truncf %24 : vector<8x2x8xf32> to vector<8x2x8xbf16>
    "tpu.trace_start"() <{level = 10 : i32, message = "lbd,lcd->lbc"}> : () -> ()
    %cst_13 = arith.constant dense<0.000000e+00> : vector<8x2x2xf32>
    %26 = tpu.matmul %21, %23, %cst_13 {dimension_numbers = #tpu.dot_dimension_numbers<[2], [2], [1], [1], [0, 0, 0, 1, 1, 1], [0], [0]>} : vector<8x2x8xbf16>, vector<8x2x8xbf16>, vector<8x2x2xf32> -> vector<8x2x2xf32>
    "tpu.trace_stop"() : () -> ()
    %cst_14 = arith.constant dense<0xFF800000> : vector<8x2xf32>
    %27 = vector.multi_reduction <maximumf>, %26, %cst_14 [2] : vector<8x2x2xf32> to vector<8x2xf32>
    %28 = vector.shape_cast %27 : vector<8x2xf32> to vector<8x2x1xf32>
    %29 = vector.broadcast %28 : vector<8x2x1xf32> to vector<8x2x2xf32>
    %30 = arith.subf %26, %29 : vector<8x2x2xf32>
    %31 = math.exp %30 : vector<8x2x2xf32>
    %cst_15 = arith.constant dense<0.000000e+00> : vector<8x2xf32>
    %32 = vector.multi_reduction <add>, %31, %cst_15 [2] : vector<8x2x2xf32> to vector<8x2xf32>
    %33 = vector.shape_cast %32 : vector<8x2xf32> to vector<8x2x1xf32>
    %34 = tpu.reciprocal %33 {approx = true} : vector<8x2x1xf32> -> vector<8x2x1xf32>
    %35 = vector.broadcast %34 : vector<8x2x1xf32> to vector<8x2x2xf32>
    %36 = arith.mulf %31, %35 : vector<8x2x2xf32>
    %37 = arith.truncf %36 : vector<8x2x2xf32> to vector<8x2x2xbf16>
    "tpu.trace_start"() <{level = 10 : i32, message = "lbc,lcd->lbd"}> : () -> ()
    %cst_16 = arith.constant dense<0.000000e+00> : vector<8x2x8xf32>
    %38 = tpu.matmul %37, %25, %cst_16 {dimension_numbers = #tpu.dot_dimension_numbers<[2], [1], [1], [2], [0, 0, 0, 1, 1, 2], [0], [0]>} : vector<8x2x2xbf16>, vector<8x2x8xbf16>, vector<8x2x8xf32> -> vector<8x2x8xf32>
    "tpu.trace_stop"() : () -> ()
    %39 = vector.extract_strided_slice %17 {offsets = [0, 0, 8], sizes = [8, 2, 8], strides = [1, 1, 1]} : vector<8x2x32xf32> to vector<8x2x8xf32>
    %40 = arith.truncf %39 : vector<8x2x8xf32> to vector<8x2x8xbf16>
    %41 = vector.extract_strided_slice %18 {offsets = [0, 0, 8], sizes = [8, 2, 8], strides = [1, 1, 1]} : vector<8x2x32xf32> to vector<8x2x8xf32>
    %42 = arith.truncf %41 : vector<8x2x8xf32> to vector<8x2x8xbf16>
    %43 = vector.extract_strided_slice %19 {offsets = [0, 0, 8], sizes = [8, 2, 8], strides = [1, 1, 1]} : vector<8x2x32xf32> to vector<8x2x8xf32>
    %44 = arith.truncf %43 : vector<8x2x8xf32> to vector<8x2x8xbf16>
    "tpu.trace_start"() <{level = 10 : i32, message = "lbd,lcd->lbc"}> : () -> ()
    %cst_17 = arith.constant dense<0.000000e+00> : vector<8x2x2xf32>
    %45 = tpu.matmul %40, %42, %cst_17 {dimension_numbers = #tpu.dot_dimension_numbers<[2], [2], [1], [1], [0, 0, 0, 1, 1, 1], [0], [0]>} : vector<8x2x8xbf16>, vector<8x2x8xbf16>, vector<8x2x2xf32> -> vector<8x2x2xf32>
    "tpu.trace_stop"() : () -> ()
    %cst_18 = arith.constant dense<0xFF800000> : vector<8x2xf32>
    %46 = vector.multi_reduction <maximumf>, %45, %cst_18 [2] : vector<8x2x2xf32> to vector<8x2xf32>
    %47 = vector.shape_cast %46 : vector<8x2xf32> to vector<8x2x1xf32>
    %48 = vector.broadcast %47 : vector<8x2x1xf32> to vector<8x2x2xf32>
    %49 = arith.subf %45, %48 : vector<8x2x2xf32>
    %50 = math.exp %49 : vector<8x2x2xf32>
    %cst_19 = arith.constant dense<0.000000e+00> : vector<8x2xf32>
    %51 = vector.multi_reduction <add>, %50, %cst_19 [2] : vector<8x2x2xf32> to vector<8x2xf32>
    %52 = vector.shape_cast %51 : vector<8x2xf32> to vector<8x2x1xf32>
    %53 = tpu.reciprocal %52 {approx = true} : vector<8x2x1xf32> -> vector<8x2x1xf32>
    %54 = vector.broadcast %53 : vector<8x2x1xf32> to vector<8x2x2xf32>
    %55 = arith.mulf %50, %54 : vector<8x2x2xf32>
    %56 = arith.truncf %55 : vector<8x2x2xf32> to vector<8x2x2xbf16>
    "tpu.trace_start"() <{level = 10 : i32, message = "lbc,lcd->lbd"}> : () -> ()
    %cst_20 = arith.constant dense<0.000000e+00> : vector<8x2x8xf32>
    %57 = tpu.matmul %56, %44, %cst_20 {dimension_numbers = #tpu.dot_dimension_numbers<[2], [1], [1], [2], [0, 0, 0, 1, 1, 2], [0], [0]>} : vector<8x2x2xbf16>, vector<8x2x8xbf16>, vector<8x2x8xf32> -> vector<8x2x8xf32>
    "tpu.trace_stop"() : () -> ()
    %58 = vector.extract_strided_slice %17 {offsets = [0, 0, 16], sizes = [8, 2, 8], strides = [1, 1, 1]} : vector<8x2x32xf32> to vector<8x2x8xf32>
    %59 = arith.truncf %58 : vector<8x2x8xf32> to vector<8x2x8xbf16>
    %60 = vector.extract_strided_slice %18 {offsets = [0, 0, 16], sizes = [8, 2, 8], strides = [1, 1, 1]} : vector<8x2x32xf32> to vector<8x2x8xf32>
    %61 = arith.truncf %60 : vector<8x2x8xf32> to vector<8x2x8xbf16>
    %62 = vector.extract_strided_slice %19 {offsets = [0, 0, 16], sizes = [8, 2, 8], strides = [1, 1, 1]} : vector<8x2x32xf32> to vector<8x2x8xf32>
    %63 = arith.truncf %62 : vector<8x2x8xf32> to vector<8x2x8xbf16>
    "tpu.trace_start"() <{level = 10 : i32, message = "lbd,lcd->lbc"}> : () -> ()
    %cst_21 = arith.constant dense<0.000000e+00> : vector<8x2x2xf32>
    %64 = tpu.matmul %59, %61, %cst_21 {dimension_numbers = #tpu.dot_dimension_numbers<[2], [2], [1], [1], [0, 0, 0, 1, 1, 1], [0], [0]>} : vector<8x2x8xbf16>, vector<8x2x8xbf16>, vector<8x2x2xf32> -> vector<8x2x2xf32>
    "tpu.trace_stop"() : () -> ()
    %cst_22 = arith.constant dense<0xFF800000> : vector<8x2xf32>
    %65 = vector.multi_reduction <maximumf>, %64, %cst_22 [2] : vector<8x2x2xf32> to vector<8x2xf32>
    %66 = vector.shape_cast %65 : vector<8x2xf32> to vector<8x2x1xf32>
    %67 = vector.broadcast %66 : vector<8x2x1xf32> to vector<8x2x2xf32>
    %68 = arith.subf %64, %67 : vector<8x2x2xf32>
    %69 = math.exp %68 : vector<8x2x2xf32>
    %cst_23 = arith.constant dense<0.000000e+00> : vector<8x2xf32>
    %70 = vector.multi_reduction <add>, %69, %cst_23 [2] : vector<8x2x2xf32> to vector<8x2xf32>
    %71 = vector.shape_cast %70 : vector<8x2xf32> to vector<8x2x1xf32>
    %72 = tpu.reciprocal %71 {approx = true} : vector<8x2x1xf32> -> vector<8x2x1xf32>
    %73 = vector.broadcast %72 : vector<8x2x1xf32> to vector<8x2x2xf32>
    %74 = arith.mulf %69, %73 : vector<8x2x2xf32>
    %75 = arith.truncf %74 : vector<8x2x2xf32> to vector<8x2x2xbf16>
    "tpu.trace_start"() <{level = 10 : i32, message = "lbc,lcd->lbd"}> : () -> ()
    %cst_24 = arith.constant dense<0.000000e+00> : vector<8x2x8xf32>
    %76 = tpu.matmul %75, %63, %cst_24 {dimension_numbers = #tpu.dot_dimension_numbers<[2], [1], [1], [2], [0, 0, 0, 1, 1, 2], [0], [0]>} : vector<8x2x2xbf16>, vector<8x2x8xbf16>, vector<8x2x8xf32> -> vector<8x2x8xf32>
    "tpu.trace_stop"() : () -> ()
    %77 = vector.extract_strided_slice %17 {offsets = [0, 0, 24], sizes = [8, 2, 8], strides = [1, 1, 1]} : vector<8x2x32xf32> to vector<8x2x8xf32>
    %78 = arith.truncf %77 : vector<8x2x8xf32> to vector<8x2x8xbf16>
    %79 = vector.extract_strided_slice %18 {offsets = [0, 0, 24], sizes = [8, 2, 8], strides = [1, 1, 1]} : vector<8x2x32xf32> to vector<8x2x8xf32>
    %80 = arith.truncf %79 : vector<8x2x8xf32> to vector<8x2x8xbf16>
    %81 = vector.extract_strided_slice %19 {offsets = [0, 0, 24], sizes = [8, 2, 8], strides = [1, 1, 1]} : vector<8x2x32xf32> to vector<8x2x8xf32>
    %82 = arith.truncf %81 : vector<8x2x8xf32> to vector<8x2x8xbf16>
    "tpu.trace_start"() <{level = 10 : i32, message = "lbd,lcd->lbc"}> : () -> ()
    %cst_25 = arith.constant dense<0.000000e+00> : vector<8x2x2xf32>
    %83 = tpu.matmul %78, %80, %cst_25 {dimension_numbers = #tpu.dot_dimension_numbers<[2], [2], [1], [1], [0, 0, 0, 1, 1, 1], [0], [0]>} : vector<8x2x8xbf16>, vector<8x2x8xbf16>, vector<8x2x2xf32> -> vector<8x2x2xf32>
    "tpu.trace_stop"() : () -> ()
    %cst_26 = arith.constant dense<0xFF800000> : vector<8x2xf32>
    %84 = vector.multi_reduction <maximumf>, %83, %cst_26 [2] : vector<8x2x2xf32> to vector<8x2xf32>
    %85 = vector.shape_cast %84 : vector<8x2xf32> to vector<8x2x1xf32>
    %86 = vector.broadcast %85 : vector<8x2x1xf32> to vector<8x2x2xf32>
    %87 = arith.subf %83, %86 : vector<8x2x2xf32>
    %88 = math.exp %87 : vector<8x2x2xf32>
    %cst_27 = arith.constant dense<0.000000e+00> : vector<8x2xf32>
    %89 = vector.multi_reduction <add>, %88, %cst_27 [2] : vector<8x2x2xf32> to vector<8x2xf32>
    %90 = vector.shape_cast %89 : vector<8x2xf32> to vector<8x2x1xf32>
    %91 = tpu.reciprocal %90 {approx = true} : vector<8x2x1xf32> -> vector<8x2x1xf32>
    %92 = vector.broadcast %91 : vector<8x2x1xf32> to vector<8x2x2xf32>
    %93 = arith.mulf %88, %92 : vector<8x2x2xf32>
    %94 = arith.truncf %93 : vector<8x2x2xf32> to vector<8x2x2xbf16>
    "tpu.trace_start"() <{level = 10 : i32, message = "lbc,lcd->lbd"}> : () -> ()
    %cst_28 = arith.constant dense<0.000000e+00> : vector<8x2x8xf32>
    %95 = tpu.matmul %94, %82, %cst_28 {dimension_numbers = #tpu.dot_dimension_numbers<[2], [1], [1], [2], [0, 0, 0, 1, 1, 2], [0], [0]>} : vector<8x2x2xbf16>, vector<8x2x8xbf16>, vector<8x2x8xf32> -> vector<8x2x8xf32>
    "tpu.trace_stop"() : () -> ()
    %96 = tpu.concatenate %38, %57, %76, %95 in 2 : vector<8x2x8xf32>, vector<8x2x8xf32>, vector<8x2x8xf32>, vector<8x2x8xf32> -> vector<8x2x32xf32>
    %97 = vector.shape_cast %96 : vector<8x2x32xf32> to vector<16x32xf32>
    %98 = arith.truncf %97 : vector<16x32xf32> to vector<16x32xbf16>
    %cst_29 = arith.constant dense<0.000000e+00> : vector<16x32xf32>
    %99 = tpu.matmul %98, %8, %cst_29 {dimension_numbers = #tpu.dot_dimension_numbers<[1], [0], [0], [1], [0, 0, 1, 1], [], []>} : vector<16x32xbf16>, vector<32x32xbf16>, vector<16x32xf32> -> vector<16x32xf32>
    %100 = vector.broadcast %9 : vector<1x32xf32> to vector<16x32xf32>
    %101 = arith.addf %99, %100 : vector<16x32xf32>
    %102 = arith.addf %0, %101 : vector<16x32xf32>
    %103 = vector.extract_strided_slice %3 {offsets = [3, 0], sizes = [1, 32], strides = [1, 1]} : vector<9x32xf32> to vector<1x32xf32>
    %104 = vector.extract_strided_slice %3 {offsets = [4, 0], sizes = [1, 32], strides = [1, 1]} : vector<9x32xf32> to vector<1x32xf32>
    %cst_30 = arith.constant dense<0.000000e+00> : vector<16xf32>
    %105 = vector.multi_reduction <add>, %102, %cst_30 [1] : vector<16x32xf32> to vector<16xf32>
    %106 = vector.shape_cast %105 : vector<16xf32> to vector<16x1xf32>
    %cst_31 = arith.constant 3.200000e+01 : f32
    %107 = vector.broadcast %cst_31 : f32 to vector<16x1xf32>
    %108 = arith.divf %106, %107 : vector<16x1xf32>
    %109 = vector.broadcast %108 : vector<16x1xf32> to vector<16x32xf32>
    %110 = arith.subf %102, %109 : vector<16x32xf32>
    %111 = arith.mulf %110, %110 : vector<16x32xf32>
    %cst_32 = arith.constant dense<0.000000e+00> : vector<16xf32>
    %112 = vector.multi_reduction <add>, %111, %cst_32 [1] : vector<16x32xf32> to vector<16xf32>
    %113 = vector.shape_cast %112 : vector<16xf32> to vector<16x1xf32>
    %cst_33 = arith.constant 3.200000e+01 : f32
    %114 = vector.broadcast %cst_33 : f32 to vector<16x1xf32>
    %115 = arith.divf %113, %114 : vector<16x1xf32>
    %116 = vector.broadcast %108 : vector<16x1xf32> to vector<16x32xf32>
    %117 = arith.subf %102, %116 : vector<16x32xf32>
    %cst_34 = arith.constant 9.99999974E-6 : f32
    %118 = vector.broadcast %cst_34 : f32 to vector<16x1xf32>
    %119 = arith.addf %115, %118 : vector<16x1xf32>
    %120 = math.rsqrt %119 : vector<16x1xf32>
    %121 = vector.broadcast %120 : vector<16x1xf32> to vector<16x32xf32>
    %122 = arith.mulf %117, %121 : vector<16x32xf32>
    %123 = vector.broadcast %103 : vector<1x32xf32> to vector<16x32xf32>
    %124 = arith.mulf %122, %123 : vector<16x32xf32>
    %125 = vector.broadcast %104 : vector<1x32xf32> to vector<16x32xf32>
    %126 = arith.addf %124, %125 : vector<16x32xf32>
    %c1 = arith.constant 1 : index
    %c0_35 = arith.constant 0 : index
    %c0_36 = arith.constant 0 : index
    %127 = vector.load %arg3[%c1, %c0_35, %c0_36] : memref<2x32x96xbf16, #tpu.memory_space<vmem>>, vector<1x32x96xbf16>
    %128 = vector.shape_cast %127 : vector<1x32x96xbf16> to vector<32x96xbf16>
    %129 = vector.extract_strided_slice %2 {offsets = [1, 0], sizes = [1, 96], strides = [1, 1]} : vector<2x96xf32> to vector<1x96xf32>
    %c1_37 = arith.constant 1 : index
    %c0_38 = arith.constant 0 : index
    %c0_39 = arith.constant 0 : index
    %130 = vector.load %arg5[%c1_37, %c0_38, %c0_39] : memref<2x32x32xbf16, #tpu.memory_space<vmem>>, vector<1x32x32xbf16>
    %131 = vector.shape_cast %130 : vector<1x32x32xbf16> to vector<32x32xbf16>
    %132 = vector.extract_strided_slice %3 {offsets = [1, 0], sizes = [1, 32], strides = [1, 1]} : vector<9x32xf32> to vector<1x32xf32>
    %133 = vector.extract_strided_slice %128 {offsets = [0, 0], sizes = [32, 32], strides = [1, 1]} : vector<32x96xbf16> to vector<32x32xbf16>
    %134 = arith.truncf %126 : vector<16x32xf32> to vector<16x32xbf16>
    %cst_40 = arith.constant dense<0.000000e+00> : vector<16x32xf32>
    %135 = tpu.matmul %134, %133, %cst_40 {dimension_numbers = #tpu.dot_dimension_numbers<[1], [0], [0], [1], [0, 0, 1, 1], [], []>} : vector<16x32xbf16>, vector<32x32xbf16>, vector<16x32xf32> -> vector<16x32xf32>
    %136 = vector.extract_strided_slice %129 {offsets = [0, 0], sizes = [1, 32], strides = [1, 1]} : vector<1x96xf32> to vector<1x32xf32>
    %137 = vector.broadcast %136 : vector<1x32xf32> to vector<16x32xf32>
    %138 = arith.addf %135, %137 : vector<16x32xf32>
    %139 = vector.extract_strided_slice %128 {offsets = [0, 32], sizes = [32, 64], strides = [1, 1]} : vector<32x96xbf16> to vector<32x64xbf16>
    %140 = arith.truncf %1 : vector<16x32xf32> to vector<16x32xbf16>
    %cst_41 = arith.constant dense<0.000000e+00> : vector<16x64xf32>
    %141 = tpu.matmul %140, %139, %cst_41 {dimension_numbers = #tpu.dot_dimension_numbers<[1], [0], [0], [1], [0, 0, 1, 1], [], []>} : vector<16x32xbf16>, vector<32x64xbf16>, vector<16x64xf32> -> vector<16x64xf32>
    %142 = vector.extract_strided_slice %129 {offsets = [0, 32], sizes = [1, 64], strides = [1, 1]} : vector<1x96xf32> to vector<1x64xf32>
    %143 = vector.broadcast %142 : vector<1x64xf32> to vector<16x64xf32>
    %144 = arith.addf %141, %143 : vector<16x64xf32>
    %145 = vector.extract_strided_slice %144 {offsets = [0, 0], sizes = [16, 32], strides = [1, 1]} : vector<16x64xf32> to vector<16x32xf32>
    %146 = vector.extract_strided_slice %144 {offsets = [0, 32], sizes = [16, 32], strides = [1, 1]} : vector<16x64xf32> to vector<16x32xf32>
    %147 = vector.shape_cast %138 : vector<16x32xf32> to vector<8x2x32xf32>
    %148 = vector.shape_cast %145 : vector<16x32xf32> to vector<8x2x32xf32>
    %149 = vector.shape_cast %146 : vector<16x32xf32> to vector<8x2x32xf32>
    %150 = vector.extract_strided_slice %147 {offsets = [0, 0, 0], sizes = [8, 2, 8], strides = [1, 1, 1]} : vector<8x2x32xf32> to vector<8x2x8xf32>
    %151 = arith.truncf %150 : vector<8x2x8xf32> to vector<8x2x8xbf16>
    %152 = vector.extract_strided_slice %148 {offsets = [0, 0, 0], sizes = [8, 2, 8], strides = [1, 1, 1]} : vector<8x2x32xf32> to vector<8x2x8xf32>
    %153 = arith.truncf %152 : vector<8x2x8xf32> to vector<8x2x8xbf16>
    %154 = vector.extract_strided_slice %149 {offsets = [0, 0, 0], sizes = [8, 2, 8], strides = [1, 1, 1]} : vector<8x2x32xf32> to vector<8x2x8xf32>
    %155 = arith.truncf %154 : vector<8x2x8xf32> to vector<8x2x8xbf16>
    "tpu.trace_start"() <{level = 10 : i32, message = "lbd,lcd->lbc"}> : () -> ()
    %cst_42 = arith.constant dense<0.000000e+00> : vector<8x2x2xf32>
    %156 = tpu.matmul %151, %153, %cst_42 {dimension_numbers = #tpu.dot_dimension_numbers<[2], [2], [1], [1], [0, 0, 0, 1, 1, 1], [0], [0]>} : vector<8x2x8xbf16>, vector<8x2x8xbf16>, vector<8x2x2xf32> -> vector<8x2x2xf32>
    "tpu.trace_stop"() : () -> ()
    %cst_43 = arith.constant dense<0xFF800000> : vector<8x2xf32>
    %157 = vector.multi_reduction <maximumf>, %156, %cst_43 [2] : vector<8x2x2xf32> to vector<8x2xf32>
    %158 = vector.shape_cast %157 : vector<8x2xf32> to vector<8x2x1xf32>
    %159 = vector.broadcast %158 : vector<8x2x1xf32> to vector<8x2x2xf32>
    %160 = arith.subf %156, %159 : vector<8x2x2xf32>
    %161 = math.exp %160 : vector<8x2x2xf32>
    %cst_44 = arith.constant dense<0.000000e+00> : vector<8x2xf32>
    %162 = vector.multi_reduction <add>, %161, %cst_44 [2] : vector<8x2x2xf32> to vector<8x2xf32>
    %163 = vector.shape_cast %162 : vector<8x2xf32> to vector<8x2x1xf32>
    %164 = tpu.reciprocal %163 {approx = true} : vector<8x2x1xf32> -> vector<8x2x1xf32>
    %165 = vector.broadcast %164 : vector<8x2x1xf32> to vector<8x2x2xf32>
    %166 = arith.mulf %161, %165 : vector<8x2x2xf32>
    %167 = arith.truncf %166 : vector<8x2x2xf32> to vector<8x2x2xbf16>
    "tpu.trace_start"() <{level = 10 : i32, message = "lbc,lcd->lbd"}> : () -> ()
    %cst_45 = arith.constant dense<0.000000e+00> : vector<8x2x8xf32>
    %168 = tpu.matmul %167, %155, %cst_45 {dimension_numbers = #tpu.dot_dimension_numbers<[2], [1], [1], [2], [0, 0, 0, 1, 1, 2], [0], [0]>} : vector<8x2x2xbf16>, vector<8x2x8xbf16>, vector<8x2x8xf32> -> vector<8x2x8xf32>
    "tpu.trace_stop"() : () -> ()
    %169 = vector.extract_strided_slice %147 {offsets = [0, 0, 8], sizes = [8, 2, 8], strides = [1, 1, 1]} : vector<8x2x32xf32> to vector<8x2x8xf32>
    %170 = arith.truncf %169 : vector<8x2x8xf32> to vector<8x2x8xbf16>
    %171 = vector.extract_strided_slice %148 {offsets = [0, 0, 8], sizes = [8, 2, 8], strides = [1, 1, 1]} : vector<8x2x32xf32> to vector<8x2x8xf32>
    %172 = arith.truncf %171 : vector<8x2x8xf32> to vector<8x2x8xbf16>
    %173 = vector.extract_strided_slice %149 {offsets = [0, 0, 8], sizes = [8, 2, 8], strides = [1, 1, 1]} : vector<8x2x32xf32> to vector<8x2x8xf32>
    %174 = arith.truncf %173 : vector<8x2x8xf32> to vector<8x2x8xbf16>
    "tpu.trace_start"() <{level = 10 : i32, message = "lbd,lcd->lbc"}> : () -> ()
    %cst_46 = arith.constant dense<0.000000e+00> : vector<8x2x2xf32>
    %175 = tpu.matmul %170, %172, %cst_46 {dimension_numbers = #tpu.dot_dimension_numbers<[2], [2], [1], [1], [0, 0, 0, 1, 1, 1], [0], [0]>} : vector<8x2x8xbf16>, vector<8x2x8xbf16>, vector<8x2x2xf32> -> vector<8x2x2xf32>
    "tpu.trace_stop"() : () -> ()
    %cst_47 = arith.constant dense<0xFF800000> : vector<8x2xf32>
    %176 = vector.multi_reduction <maximumf>, %175, %cst_47 [2] : vector<8x2x2xf32> to vector<8x2xf32>
    %177 = vector.shape_cast %176 : vector<8x2xf32> to vector<8x2x1xf32>
    %178 = vector.broadcast %177 : vector<8x2x1xf32> to vector<8x2x2xf32>
    %179 = arith.subf %175, %178 : vector<8x2x2xf32>
    %180 = math.exp %179 : vector<8x2x2xf32>
    %cst_48 = arith.constant dense<0.000000e+00> : vector<8x2xf32>
    %181 = vector.multi_reduction <add>, %180, %cst_48 [2] : vector<8x2x2xf32> to vector<8x2xf32>
    %182 = vector.shape_cast %181 : vector<8x2xf32> to vector<8x2x1xf32>
    %183 = tpu.reciprocal %182 {approx = true} : vector<8x2x1xf32> -> vector<8x2x1xf32>
    %184 = vector.broadcast %183 : vector<8x2x1xf32> to vector<8x2x2xf32>
    %185 = arith.mulf %180, %184 : vector<8x2x2xf32>
    %186 = arith.truncf %185 : vector<8x2x2xf32> to vector<8x2x2xbf16>
    "tpu.trace_start"() <{level = 10 : i32, message = "lbc,lcd->lbd"}> : () -> ()
    %cst_49 = arith.constant dense<0.000000e+00> : vector<8x2x8xf32>
    %187 = tpu.matmul %186, %174, %cst_49 {dimension_numbers = #tpu.dot_dimension_numbers<[2], [1], [1], [2], [0, 0, 0, 1, 1, 2], [0], [0]>} : vector<8x2x2xbf16>, vector<8x2x8xbf16>, vector<8x2x8xf32> -> vector<8x2x8xf32>
    "tpu.trace_stop"() : () -> ()
    %188 = vector.extract_strided_slice %147 {offsets = [0, 0, 16], sizes = [8, 2, 8], strides = [1, 1, 1]} : vector<8x2x32xf32> to vector<8x2x8xf32>
    %189 = arith.truncf %188 : vector<8x2x8xf32> to vector<8x2x8xbf16>
    %190 = vector.extract_strided_slice %148 {offsets = [0, 0, 16], sizes = [8, 2, 8], strides = [1, 1, 1]} : vector<8x2x32xf32> to vector<8x2x8xf32>
    %191 = arith.truncf %190 : vector<8x2x8xf32> to vector<8x2x8xbf16>
    %192 = vector.extract_strided_slice %149 {offsets = [0, 0, 16], sizes = [8, 2, 8], strides = [1, 1, 1]} : vector<8x2x32xf32> to vector<8x2x8xf32>
    %193 = arith.truncf %192 : vector<8x2x8xf32> to vector<8x2x8xbf16>
    "tpu.trace_start"() <{level = 10 : i32, message = "lbd,lcd->lbc"}> : () -> ()
    %cst_50 = arith.constant dense<0.000000e+00> : vector<8x2x2xf32>
    %194 = tpu.matmul %189, %191, %cst_50 {dimension_numbers = #tpu.dot_dimension_numbers<[2], [2], [1], [1], [0, 0, 0, 1, 1, 1], [0], [0]>} : vector<8x2x8xbf16>, vector<8x2x8xbf16>, vector<8x2x2xf32> -> vector<8x2x2xf32>
    "tpu.trace_stop"() : () -> ()
    %cst_51 = arith.constant dense<0xFF800000> : vector<8x2xf32>
    %195 = vector.multi_reduction <maximumf>, %194, %cst_51 [2] : vector<8x2x2xf32> to vector<8x2xf32>
    %196 = vector.shape_cast %195 : vector<8x2xf32> to vector<8x2x1xf32>
    %197 = vector.broadcast %196 : vector<8x2x1xf32> to vector<8x2x2xf32>
    %198 = arith.subf %194, %197 : vector<8x2x2xf32>
    %199 = math.exp %198 : vector<8x2x2xf32>
    %cst_52 = arith.constant dense<0.000000e+00> : vector<8x2xf32>
    %200 = vector.multi_reduction <add>, %199, %cst_52 [2] : vector<8x2x2xf32> to vector<8x2xf32>
    %201 = vector.shape_cast %200 : vector<8x2xf32> to vector<8x2x1xf32>
    %202 = tpu.reciprocal %201 {approx = true} : vector<8x2x1xf32> -> vector<8x2x1xf32>
    %203 = vector.broadcast %202 : vector<8x2x1xf32> to vector<8x2x2xf32>
    %204 = arith.mulf %199, %203 : vector<8x2x2xf32>
    %205 = arith.truncf %204 : vector<8x2x2xf32> to vector<8x2x2xbf16>
    "tpu.trace_start"() <{level = 10 : i32, message = "lbc,lcd->lbd"}> : () -> ()
    %cst_53 = arith.constant dense<0.000000e+00> : vector<8x2x8xf32>
    %206 = tpu.matmul %205, %193, %cst_53 {dimension_numbers = #tpu.dot_dimension_numbers<[2], [1], [1], [2], [0, 0, 0, 1, 1, 2], [0], [0]>} : vector<8x2x2xbf16>, vector<8x2x8xbf16>, vector<8x2x8xf32> -> vector<8x2x8xf32>
    "tpu.trace_stop"() : () -> ()
    %207 = vector.extract_strided_slice %147 {offsets = [0, 0, 24], sizes = [8, 2, 8], strides = [1, 1, 1]} : vector<8x2x32xf32> to vector<8x2x8xf32>
    %208 = arith.truncf %207 : vector<8x2x8xf32> to vector<8x2x8xbf16>
    %209 = vector.extract_strided_slice %148 {offsets = [0, 0, 24], sizes = [8, 2, 8], strides = [1, 1, 1]} : vector<8x2x32xf32> to vector<8x2x8xf32>
    %210 = arith.truncf %209 : vector<8x2x8xf32> to vector<8x2x8xbf16>
    %211 = vector.extract_strided_slice %149 {offsets = [0, 0, 24], sizes = [8, 2, 8], strides = [1, 1, 1]} : vector<8x2x32xf32> to vector<8x2x8xf32>
    %212 = arith.truncf %211 : vector<8x2x8xf32> to vector<8x2x8xbf16>
    "tpu.trace_start"() <{level = 10 : i32, message = "lbd,lcd->lbc"}> : () -> ()
    %cst_54 = arith.constant dense<0.000000e+00> : vector<8x2x2xf32>
    %213 = tpu.matmul %208, %210, %cst_54 {dimension_numbers = #tpu.dot_dimension_numbers<[2], [2], [1], [1], [0, 0, 0, 1, 1, 1], [0], [0]>} : vector<8x2x8xbf16>, vector<8x2x8xbf16>, vector<8x2x2xf32> -> vector<8x2x2xf32>
    "tpu.trace_stop"() : () -> ()
    %cst_55 = arith.constant dense<0xFF800000> : vector<8x2xf32>
    %214 = vector.multi_reduction <maximumf>, %213, %cst_55 [2] : vector<8x2x2xf32> to vector<8x2xf32>
    %215 = vector.shape_cast %214 : vector<8x2xf32> to vector<8x2x1xf32>
    %216 = vector.broadcast %215 : vector<8x2x1xf32> to vector<8x2x2xf32>
    %217 = arith.subf %213, %216 : vector<8x2x2xf32>
    %218 = math.exp %217 : vector<8x2x2xf32>
    %cst_56 = arith.constant dense<0.000000e+00> : vector<8x2xf32>
    %219 = vector.multi_reduction <add>, %218, %cst_56 [2] : vector<8x2x2xf32> to vector<8x2xf32>
    %220 = vector.shape_cast %219 : vector<8x2xf32> to vector<8x2x1xf32>
    %221 = tpu.reciprocal %220 {approx = true} : vector<8x2x1xf32> -> vector<8x2x1xf32>
    %222 = vector.broadcast %221 : vector<8x2x1xf32> to vector<8x2x2xf32>
    %223 = arith.mulf %218, %222 : vector<8x2x2xf32>
    %224 = arith.truncf %223 : vector<8x2x2xf32> to vector<8x2x2xbf16>
    "tpu.trace_start"() <{level = 10 : i32, message = "lbc,lcd->lbd"}> : () -> ()
    %cst_57 = arith.constant dense<0.000000e+00> : vector<8x2x8xf32>
    %225 = tpu.matmul %224, %212, %cst_57 {dimension_numbers = #tpu.dot_dimension_numbers<[2], [1], [1], [2], [0, 0, 0, 1, 1, 2], [0], [0]>} : vector<8x2x2xbf16>, vector<8x2x8xbf16>, vector<8x2x8xf32> -> vector<8x2x8xf32>
    "tpu.trace_stop"() : () -> ()
    %226 = tpu.concatenate %168, %187, %206, %225 in 2 : vector<8x2x8xf32>, vector<8x2x8xf32>, vector<8x2x8xf32>, vector<8x2x8xf32> -> vector<8x2x32xf32>
    %227 = vector.shape_cast %226 : vector<8x2x32xf32> to vector<16x32xf32>
    %228 = arith.truncf %227 : vector<16x32xf32> to vector<16x32xbf16>
    %cst_58 = arith.constant dense<0.000000e+00> : vector<16x32xf32>
    %229 = tpu.matmul %228, %131, %cst_58 {dimension_numbers = #tpu.dot_dimension_numbers<[1], [0], [0], [1], [0, 0, 1, 1], [], []>} : vector<16x32xbf16>, vector<32x32xbf16>, vector<16x32xf32> -> vector<16x32xf32>
    %230 = vector.broadcast %132 : vector<1x32xf32> to vector<16x32xf32>
    %231 = arith.addf %229, %230 : vector<16x32xf32>
    %232 = arith.addf %126, %231 : vector<16x32xf32>
    %233 = vector.extract_strided_slice %3 {offsets = [5, 0], sizes = [1, 32], strides = [1, 1]} : vector<9x32xf32> to vector<1x32xf32>
    %234 = vector.extract_strided_slice %3 {offsets = [6, 0], sizes = [1, 32], strides = [1, 1]} : vector<9x32xf32> to vector<1x32xf32>
    %cst_59 = arith.constant dense<0.000000e+00> : vector<16xf32>
    %235 = vector.multi_reduction <add>, %232, %cst_59 [1] : vector<16x32xf32> to vector<16xf32>
    %236 = vector.shape_cast %235 : vector<16xf32> to vector<16x1xf32>
    %cst_60 = arith.constant 3.200000e+01 : f32
    %237 = vector.broadcast %cst_60 : f32 to vector<16x1xf32>
    %238 = arith.divf %236, %237 : vector<16x1xf32>
    %239 = vector.broadcast %238 : vector<16x1xf32> to vector<16x32xf32>
    %240 = arith.subf %232, %239 : vector<16x32xf32>
    %241 = arith.mulf %240, %240 : vector<16x32xf32>
    %cst_61 = arith.constant dense<0.000000e+00> : vector<16xf32>
    %242 = vector.multi_reduction <add>, %241, %cst_61 [1] : vector<16x32xf32> to vector<16xf32>
    %243 = vector.shape_cast %242 : vector<16xf32> to vector<16x1xf32>
    %cst_62 = arith.constant 3.200000e+01 : f32
    %244 = vector.broadcast %cst_62 : f32 to vector<16x1xf32>
    %245 = arith.divf %243, %244 : vector<16x1xf32>
    %246 = vector.broadcast %238 : vector<16x1xf32> to vector<16x32xf32>
    %247 = arith.subf %232, %246 : vector<16x32xf32>
    %cst_63 = arith.constant 9.99999974E-6 : f32
    %248 = vector.broadcast %cst_63 : f32 to vector<16x1xf32>
    %249 = arith.addf %245, %248 : vector<16x1xf32>
    %250 = math.rsqrt %249 : vector<16x1xf32>
    %251 = vector.broadcast %250 : vector<16x1xf32> to vector<16x32xf32>
    %252 = arith.mulf %247, %251 : vector<16x32xf32>
    %253 = vector.broadcast %233 : vector<1x32xf32> to vector<16x32xf32>
    %254 = arith.mulf %252, %253 : vector<16x32xf32>
    %255 = vector.broadcast %234 : vector<1x32xf32> to vector<16x32xf32>
    %256 = arith.addf %254, %255 : vector<16x32xf32>
    %c0_64 = arith.constant 0 : index
    %c0_65 = arith.constant 0 : index
    %257 = vector.load %arg7[%c0_64, %c0_65] : memref<32x64xbf16, #tpu.memory_space<vmem>>, vector<32x64xbf16>
    %258 = arith.truncf %256 : vector<16x32xf32> to vector<16x32xbf16>
    %cst_66 = arith.constant dense<0.000000e+00> : vector<16x64xf32>
    %259 = tpu.matmul %258, %257, %cst_66 {dimension_numbers = #tpu.dot_dimension_numbers<[1], [0], [0], [1], [0, 0, 1, 1], [], []>} : vector<16x32xbf16>, vector<32x64xbf16>, vector<16x64xf32> -> vector<16x64xf32>
    %c0_67 = arith.constant 0 : index
    %c0_68 = arith.constant 0 : index
    %260 = vector.load %arg8[%c0_67, %c0_68] : memref<1x64xf32, #tpu.memory_space<vmem>>, vector<1x64xf32>
    %261 = vector.broadcast %260 : vector<1x64xf32> to vector<16x64xf32>
    %262 = arith.addf %259, %261 : vector<16x64xf32>
    %cst_69 = arith.constant 0.000000e+00 : f32
    %263 = vector.broadcast %cst_69 : f32 to vector<16x64xf32>
    %264 = arith.maximumf %262, %263 : vector<16x64xf32>
    %c0_70 = arith.constant 0 : index
    %c0_71 = arith.constant 0 : index
    %265 = vector.load %arg9[%c0_70, %c0_71] : memref<64x32xbf16, #tpu.memory_space<vmem>>, vector<64x32xbf16>
    %266 = arith.truncf %264 : vector<16x64xf32> to vector<16x64xbf16>
    %cst_72 = arith.constant dense<0.000000e+00> : vector<16x32xf32>
    %267 = tpu.matmul %266, %265, %cst_72 {dimension_numbers = #tpu.dot_dimension_numbers<[1], [0], [0], [1], [0, 0, 1, 1], [], []>} : vector<16x64xbf16>, vector<64x32xbf16>, vector<16x32xf32> -> vector<16x32xf32>
    %268 = vector.extract_strided_slice %3 {offsets = [2, 0], sizes = [1, 32], strides = [1, 1]} : vector<9x32xf32> to vector<1x32xf32>
    %269 = vector.broadcast %268 : vector<1x32xf32> to vector<16x32xf32>
    %270 = arith.addf %267, %269 : vector<16x32xf32>
    %271 = arith.addf %256, %270 : vector<16x32xf32>
    %272 = vector.extract_strided_slice %3 {offsets = [7, 0], sizes = [1, 32], strides = [1, 1]} : vector<9x32xf32> to vector<1x32xf32>
    %273 = vector.extract_strided_slice %3 {offsets = [8, 0], sizes = [1, 32], strides = [1, 1]} : vector<9x32xf32> to vector<1x32xf32>
    %cst_73 = arith.constant dense<0.000000e+00> : vector<16xf32>
    %274 = vector.multi_reduction <add>, %271, %cst_73 [1] : vector<16x32xf32> to vector<16xf32>
    %275 = vector.shape_cast %274 : vector<16xf32> to vector<16x1xf32>
    %cst_74 = arith.constant 3.200000e+01 : f32
    %276 = vector.broadcast %cst_74 : f32 to vector<16x1xf32>
    %277 = arith.divf %275, %276 : vector<16x1xf32>
    %278 = vector.broadcast %277 : vector<16x1xf32> to vector<16x32xf32>
    %279 = arith.subf %271, %278 : vector<16x32xf32>
    %280 = arith.mulf %279, %279 : vector<16x32xf32>
    %cst_75 = arith.constant dense<0.000000e+00> : vector<16xf32>
    %281 = vector.multi_reduction <add>, %280, %cst_75 [1] : vector<16x32xf32> to vector<16xf32>
    %282 = vector.shape_cast %281 : vector<16xf32> to vector<16x1xf32>
    %cst_76 = arith.constant 3.200000e+01 : f32
    %283 = vector.broadcast %cst_76 : f32 to vector<16x1xf32>
    %284 = arith.divf %282, %283 : vector<16x1xf32>
    %285 = vector.broadcast %277 : vector<16x1xf32> to vector<16x32xf32>
    %286 = arith.subf %271, %285 : vector<16x32xf32>
    %cst_77 = arith.constant 9.99999974E-6 : f32
    %287 = vector.broadcast %cst_77 : f32 to vector<16x1xf32>
    %288 = arith.addf %284, %287 : vector<16x1xf32>
    %289 = math.rsqrt %288 : vector<16x1xf32>
    %290 = vector.broadcast %289 : vector<16x1xf32> to vector<16x32xf32>
    %291 = arith.mulf %286, %290 : vector<16x32xf32>
    %292 = vector.broadcast %272 : vector<1x32xf32> to vector<16x32xf32>
    %293 = arith.mulf %291, %292 : vector<16x32xf32>
    %294 = vector.broadcast %273 : vector<1x32xf32> to vector<16x32xf32>
    %295 = arith.addf %293, %294 : vector<16x32xf32>
    %c0_78 = arith.constant 0 : index
    %c0_79 = arith.constant 0 : index
    %296 = vector.load %arg10[%c0_78, %c0_79] : memref<16x32xf32, #tpu.memory_space<vmem>>, vector<16x32xf32>
    tpu.vector_store %arg10[%c0_78, %c0_79], %295 {strides = array<i32>} : memref<16x32xf32, #tpu.memory_space<vmem>>, vector<16x32xf32>,
    return
  }
  func.func @transform_0(%arg0: i32) -> (i32, i32) {
    %c0_i32 = arith.constant 0 : i32
    %c0_i32_0 = arith.constant 0 : i32
    return %arg0, %c0_i32 : i32, i32
  }
  func.func @transform_1(%arg0: i32) -> (i32, i32) {
    %c0_i32 = arith.constant 0 : i32
    %c0_i32_0 = arith.constant 0 : i32
    return %arg0, %c0_i32 : i32, i32
  }
  func.func @transform_2(%arg0: i32) -> (i32, i32, i32) {
    %c0_i32 = arith.constant 0 : i32
    %c0_i32_0 = arith.constant 0 : i32
    %c0_i32_1 = arith.constant 0 : i32
    %c0_i32_2 = arith.constant 0 : i32
    return %c0_i32, %c0_i32_0, %c0_i32_1 : i32, i32, i32
  }
  func.func @transform_3(%arg0: i32) -> (i32, i32) {
    %c0_i32 = arith.constant 0 : i32
    %c0_i32_0 = arith.constant 0 : i32
    %c0_i32_1 = arith.constant 0 : i32
    return %c0_i32, %c0_i32_0 : i32, i32
  }
  func.func @transform_4(%arg0: i32) -> (i32, i32, i32) {
    %c0_i32 = arith.constant 0 : i32
    %c0_i32_0 = arith.constant 0 : i32
    %c0_i32_1 = arith.constant 0 : i32
    %c0_i32_2 = arith.constant 0 : i32
    return %c0_i32, %c0_i32_0, %c0_i32_1 : i32, i32, i32
  }
  func.func @transform_5(%arg0: i32) -> (i32, i32) {
    %c0_i32 = arith.constant 0 : i32
    %c0_i32_0 = arith.constant 0 : i32
    %c0_i32_1 = arith.constant 0 : i32
    return %c0_i32, %c0_i32_0 : i32, i32
  }
  func.func @transform_6(%arg0: i32) -> (i32, i32) {
    %c0_i32 = arith.constant 0 : i32
    %c0_i32_0 = arith.constant 0 : i32
    %c0_i32_1 = arith.constant 0 : i32
    return %c0_i32, %c0_i32_0 : i32, i32
  }
  func.func @transform_7(%arg0: i32) -> (i32, i32) {
    %c0_i32 = arith.constant 0 : i32
    %c0_i32_0 = arith.constant 0 : i32
    %c0_i32_1 = arith.constant 0 : i32
    return %c0_i32, %c0_i32_0 : i32, i32
  }
  func.func @transform_8(%arg0: i32) -> (i32, i32) {
    %c0_i32 = arith.constant 0 : i32
    %c0_i32_0 = arith.constant 0 : i32
    %c0_i32_1 = arith.constant 0 : i32
    return %c0_i32, %c0_i32_0 : i32, i32
  }
  func.func @transform_9(%arg0: i32) -> (i32, i32) {
    %c0_i32 = arith.constant 0 : i32
    %c0_i32_0 = arith.constant 0 : i32
    return %arg0, %c0_i32 : i32, i32
  }
}

</mosaic_0001>

<bundles_post_ra>
// kernel: tpu_custom_call.1
= control target key start
LH: loop header
LB: loop body
LE: loop exit
PB: predicated region body
PF: predicated region fallthrough
CT: control target
= control target key end

     0   :  { %14 = vsyncpa [#allocation3], 0  ;;  %s6802_s0 = inlined_call_operand.vmem [shape: f32[16,32], index: 0, kind: input, shape index: {}]   ;;  %s6803_s1 = inlined_call_operand.hbm [shape: f32[16,32], index: 1, kind: input, shape index: {}]   ;;  %s6804_s2 = inlined_call_operand.vmem [shape: bf16[2,32,96], index: 2, kind: input, shape index: {}]   ;;  %s6805_s3 = inlined_call_operand.vmem [shape: f32[2,96], index: 3, kind: input, shape index: {}]   ;;  %s6806_s4 = inlined_call_operand.hbm [shape: bf16[2,32,32], index: 4, kind: input, shape index: {}]   ;;  %s6807_s5 = inlined_call_operand.hbm [shape: f32[9,32], index: 5, kind: input, shape index: {}]   ;;  %s6808_s6 = inlined_call_operand.hbm [shape: bf16[32,64], index: 6, kind: input, shape index: {}]   ;;  %s6809_s7 = inlined_call_operand.vmem [shape: f32[1,64], index: 7, kind: input, shape index: {}]   ;;  %s6810_s8 = inlined_call_operand.vmem [shape: bf16[64,32], index: 8, kind: input, shape index: {}]   ;;  %s6811_s9 = inlined_call_operand.hbm [shape: f32[16,32], index: 9, kind: output, shape index: {}]  }
   0x1   :  { %15 = vsyncpa [#allocation6], 0 }
   0x2   :  { %16 = vsyncpa [#allocation9], 0  ;;  %s41_s11 = sshll.u32 %s6806_s4, 4  ;;  %s42_s11 = int_to_ptr.hbm [resolvable:$true] %s41_s11 }
   0x3   :  { %17 = vsyncpa [#allocation4], 0  ;;  %s5162_s12 = smov [#allocation5]   ;;  %s24_s16 = sshll.u32 %s6803_s1, 4  ;;  %s25_s16 = int_to_ptr.hbm [resolvable:$true] %s24_s16 }
   0x4   :  { %s43_s13 = sshll.u32 %s5162_s12, 4  ;;  %s5163_s17 = smov 64   ;;  %s44_s13 = int_to_ptr.vmem [resolvable:$true] %s43_s13 }
   0x5   :  { %s5164_s18 = smov 4   ;;  %s5165_s19 = smov [#allocation2]  }
   0x6   :  { %49 = dma.hbm_to_vmem [thread:$0]  %s42_s11, 512, %s44_s13, [#allocation6], %s5163_s17, %s5163_s17, %s5164_s18  }
   0x7   :  { %s26_s20 = sshll.u32 %s5165_s19, 4  ;;  %s5166_s21 = smov 128   ;;  %s27_s20 = int_to_ptr.vmem [resolvable:$true] %s26_s20 }
   0x8   :  { %s5167_s4 = smov 8   ;;  %s54_s24 = sshll.u32 %s6807_s5, 4  ;;  %s55_s24 = int_to_ptr.hbm [resolvable:$true] %s54_s24 }
   0x9   :  { %32 = dma.hbm_to_vmem [thread:$0]  %s25_s16, 256, %s27_s20, [#allocation3], %s5166_s21, %s5166_s21, %s5167_s4  }
   0xa   :  { %s5168_s1 = smov [#allocation7]   ;;  %s67_s28 = sshll.u32 %s6808_s6, 4  ;;  %s68_s28 = int_to_ptr.hbm [resolvable:$true] %s67_s28 }
   0xb   :  { %s56_s25 = sshll.u32 %s5168_s1, 4  ;;  %s5169_s29 = smov [#allocation8]   ;;  %s57_s25 = int_to_ptr.vmem [resolvable:$true] %s56_s25 }
   0xc   :  { %62 = dma.hbm_to_vmem [thread:$0]  %s55_s24, 256, %s57_s25, [#allocation6], %s5166_s21, %s5166_s21, %s5167_s4  }
   0xd   :  { %s69_s30 = sshll.u32 %s5169_s29, 4  ;;  %s70_s30 = int_to_ptr.vmem [resolvable:$true] %s69_s30 }
   0xe   :  { %75 = dma.hbm_to_vmem [thread:$0]  %s68_s28, 256, %s70_s30, [#allocation9], %s5163_s17, %s5163_s17, %s5164_s18  }
   0xf   :  { %5154 = dma.done.wait [#allocation3], 256  }
  0x10   :  { %5155 = vsyncadd [#allocation3], 4294967040 }
  0x11   :  { %5156 = dma.done.wait [#allocation6], 768  }
  0x12   :  { %5157 = vsyncadd [#allocation6], 4294966528 }
  0x13   :  { %5158 = dma.done.wait [#allocation9], 256  }
  0x14   :  { %5159 = vsyncadd [#allocation9], 4294967040  ;;  %v4723_v0 = vld [vmem:[%s6804_s2 + $0x8] sm:$0xff]  ;;  %v4722_v1 = vld [vmem:[%s6804_s2] sm:$0xff]  ;;  %vm126_vm0 = vcmask 261120   ;;  %s5170_s19 = smov 96  }
  0x15   :  { %136 = vmatpush.bf16.msra.mxu0 %v4723_v0  ;;  %v97_v2 = vld [vmem:[%s6802_s0] sm:$0xff]  ;;  %v98_v3 = vld [vmem:[%s6802_s0 + $0x8] sm:$0xff]  ;;  %s5171_s20 = smov 88   ;;  %vm171_vm1 = vcmask 64512   ;;  %vm462_vm2 = vcmask 1040384   ;;  %vm359_vm3 = vcmask 9216  }
  0x16   :  { %v112_v4 = vpack.c.bf16 %v98_v3, %v97_v2  ;;  %v101_v5 = vld [vmem:[%s6805_s3] sm:$0x3]  ;;  %s5172_s22 = smov 120   ;;  %s5174_s23 = smov 80   ;;  %vm458_vm4 = vcmask 15360   ;;  %vm2083_vm5 = vcmask 195584  }
  0x17   :  { %v113_v6 = vperm.slane %v101_v5, 0  ;;  %s5175_s24 = smov 112   ;;  %s5176_s1 = smov 48   ;;  %vm2074_vm6 = vcmask 130048  }
  0x18   :  { %s5177_s25 = smov 104   ;;  %s5178_s26 = smov 72  }
  0x19   :  { %137 = vmatpush.bf16.msra.mxu0 %v4722_v1  ;;  %s5179_s27 = smov 40   ;;  %s5180_s28 = smov 16  }
  0x1a   :  { %s5181_s29 = smov 24  }
  0x1c   :  { %4535 = vmatmul.msk.bf16.vlgmr.msra.gmra.mxu0 %vm126_vm0, %v112_v4 }
  0x99   :  { %v139_v7 = vpop.f32.mrf.mxu0 }
  0x9a   :  { %v140_v8 = vadd.f32 %v139_v7, %v113_v6 }
  0x9c   :  { %v146_v9 = vrot.slane %v140_v8, 2  ;;  %v148_v10 = vrot.slane %v140_v8, 6  ;;  %v158_v11 = vpack.c.bf16 %v140_v8, %v140_v8  ;;  %v147_v12 = vrot.slane %v140_v8, 4 }
  0x9e   :  { %v5272_v13 = vpack.c.bf16 %v146_v9, %v146_v9  ;;  %v167_v14 = vunpack.c.l.b16 %v158_v11  ;;  %v161_v15 = vpack.c.bf16 %v148_v10, %v148_v10  ;;  %v5277_v19 = vpack.c.bf16 %v147_v12, %v147_v12 }
  0xa0   :  { %v5274_v16 = vpack.c.b16 %v167_v14, %v167_v14  ;;  %v192_v17 = vunpack.c.l.b16 %v5272_v13  ;;  %v240_v22 = vunpack.c.l.b16 %v161_v15  ;;  %v216_v24 = vunpack.c.l.b16 %v5277_v19 }
  0xa1   :  { %v141_v18 = vpop.f32.mrf.mxu0 }
  0xa2   :  { %v5279_v20 = vpack.c.b16 %v192_v17, %v192_v17  ;;  %v142_v21 = vadd.f32 %v141_v18, %v113_v6  ;;  %169 = vrot.lane.b32.xlu2 %v5274_v16, %s5170_s19  ;;  %v5288_v27 = vpack.c.b16 %v240_v22, %v240_v22  ;;  %v5291_v29 = vpack.c.b16 %v216_v24, %v216_v24 }
  0xa4   :  { %v149_v23 = vrot.slane %v142_v21, 2  ;;  %194 = vrot.lane.b32.xlu0 %v5279_v20, %s5170_s19  ;;  %v150_v25 = vrot.slane %v142_v21, 4  ;;  %v5293_v30 = vpack.c.bf16 %v142_v21, %v142_v21  ;;  %v151_v33 = vrot.slane %v142_v21, 6 }
  0xa6   :  { %v5286_v26 = vpack.c.bf16 %v149_v23, %v149_v23  ;;  %v5295_v31 = vpack.c.bf16 %v150_v25, %v150_v25  ;;  %v264_v34 = vunpack.c.l.b16 %v5293_v30  ;;  %v5307_v36 = vpack.c.bf16 %v151_v33, %v151_v33 }
  0xa8   :  { %v288_v28 = vunpack.c.l.b16 %v5286_v26  ;;  %v312_v35 = vunpack.c.l.b16 %v5295_v31  ;;  %v5309_v37 = vpack.c.b16 %v264_v34, %v264_v34  ;;  %v336_v39 = vunpack.c.l.b16 %v5307_v36 }
  0xaa   :  { %v5297_v32 = vpack.c.b16 %v288_v28, %v288_v28  ;;  %242 = vrot.lane.b32.xlu2 %v5288_v27, %s5170_s19  ;;  %v5311_v38 = vpack.c.b16 %v312_v35, %v312_v35  ;;  %v5320_v40 = vpack.c.b16 %v336_v39, %v336_v39 }
  0xac   :  { %290 = vrot.lane.b32.xlu1 %v5297_v32, %s5170_s19  ;;  %218 = vrot.lane.b32.xlu0 %v5291_v29, %s5170_s19 }
  0xb2   :  { %479 = vrot.lane.b32.xlu2 %v5279_v20, %s5163_s17 }
  0xb4   :  { %314 = vrot.lane.b32.xlu1 %v5311_v38, %s5170_s19  ;;  %266 = vrot.lane.b32.xlu0 %v5309_v37, %s5170_s19 }
  0xba   :  { %456 = vrot.lane.b32.xlu2 %v5274_v16, %s5163_s17 }
  0xbc   :  { %338 = vrot.lane.b32.xlu1 %v5320_v40, %s5170_s19  ;;  %500 = vrot.lane.b32.xlu0 %v5291_v29, %s5163_s17 }
  0xc2   :  { %521 = vrot.lane.b32.xlu2 %v5288_v27, %s5163_s17 }
  0xc4   :  { %584 = vrot.lane.b32.xlu1 %v5311_v38, %s5163_s17 }
  0xca   :  { %651 = vrot.lane.b32.xlu2 %v5279_v20, %s5171_s20 }
  0xd2   :  { %563 = vrot.lane.b32.xlu2 %v5297_v32, %s5163_s17 }
  0xfc   :  { %v170_v41 = vpop.permute.xlu2 %169 }
  0xfd   :  { %v176_v42 = vsel %vm171_vm1, %v170_v41, 0 }
  0xfe   :  { %185 = vmatpush.bf16.xpose.msra.mxu1 %v176_v42 }
 0x104   :  { %v243_v43 = vpop.permute.xlu2 %242 }
 0x105   :  { %4536 = vmatmul.msk.bf16.vlgmr.msra.gmra.mxu1 %vm171_vm1, %v158_v11  ;;  %v248_v44 = vsel %vm171_vm1, %v243_v43, 0 }
 0x106   :  { %257 = vmatpush.bf16.xpose.msrb.mxu0 %v248_v44 }
 0x10c   :  { %v480_v45 = vpop.permute.xlu2 %479 }
 0x10d   :  { %4539 = vmatmul.msk.bf16.vlgmr.msrb.gmra.mxu0 %vm171_vm1, %v161_v15  ;;  %v485_v54 = vsel %vm462_vm2, %v480_v45, 0 }
 0x114   :  { %v457_v46 = vpop.permute.xlu2 %456 }
 0x115   :  { %v464_v60 = vsel %vm462_vm2, %v457_v46, 0 }
 0x116   :  { %v195_v47 = vpop.permute.xlu0 %194 }
 0x117   :  { %v200_v48 = vsel %vm171_vm1, %v195_v47, 0 }
 0x118   :  { %209 = vmatpush.bf16.xpose.msra.mxu2 %v200_v48 }
 0x11c   :  { %v522_v49 = vpop.permute.xlu2 %521 }
 0x11d   :  { %v527_v3 = vsel %vm462_vm2, %v522_v49, 0 }
 0x11e   :  { %v291_v50 = vpop.permute.xlu1 %290  ;;  %v219_v51 = vpop.permute.xlu0 %218 }
 0x11f   :  { %4537 = vmatmul.msk.bf16.vlgmr.msra.gmra.mxu2 %vm171_vm1, %v5272_v13  ;;  %v224_v52 = vsel %vm171_vm1, %v219_v51, 0  ;;  %v296_v53 = vsel %vm171_vm1, %v291_v50, 0 }
 0x120   :  { %233 = vmatpush.bf16.xpose.msra.mxu3 %v224_v52  ;;  %305 = vmatpush.bf16.xpose.msrb.mxu2 %v296_v53 }
 0x124   :  { %v5346_v55 = vpop.permute.xlu2 %651 }
 0x126   :  { %v315_v56 = vpop.permute.xlu1 %314  ;;  %v267_v57 = vpop.permute.xlu0 %266 }
 0x127   :  { %4538 = vmatmul.msk.bf16.vlgmr.msra.gmra.mxu3 %vm171_vm1, %v5277_v19  ;;  %v272_v58 = vsel %vm171_vm1, %v267_v57, 0  ;;  %v320_v59 = vsel %vm171_vm1, %v315_v56, 0 }
 0x128   :  { %494 = vmatpush.bf16.msra.mxu2 %v485_v54  ;;  %281 = vmatpush.bf16.xpose.msrb.mxu1 %v272_v58 }
 0x129   :  { %329 = vmatpush.bf16.xpose.msrb.mxu3 %v320_v59 }
 0x12c   :  { %v564_v61 = vpop.permute.xlu2 %563 }
 0x12d   :  { %v569_v62 = vsel %vm462_vm2, %v564_v61, 0 }
 0x12e   :  { %v339_v63 = vpop.permute.xlu1 %338  ;;  %v501_v0 = vpop.permute.xlu0 %500 }
 0x12f   :  { %v344_v1 = vsel %vm171_vm1, %v339_v63, 0  ;;  %v506_v2 = vsel %vm462_vm2, %v501_v0, 0  ;;  %4540 = vmatmul.msk.bf16.vlgmr.msrb.gmra.mxu1 %vm171_vm1, %v5293_v30  ;;  %4541 = vmatmul.msk.bf16.vlgmr.msrb.gmra.mxu2 %vm171_vm1, %v5286_v26 }
 0x130   :  { %473 = vmatpush.bf16.msra.mxu1 %v464_v60  ;;  %578 = vmatpush.bf16.msrb.mxu2 %v569_v62 }
 0x131   :  { %353 = vmatpush.bf16.xpose.msra.mxu0 %v344_v1  ;;  %515 = vmatpush.bf16.msra.mxu3 %v506_v2 }
 0x136   :  { %v585_v4 = vpop.permute.xlu1 %584 }
 0x137   :  { %v590_v5 = vsel %vm462_vm2, %v585_v4, 0  ;;  %4542 = vmatmul.msk.bf16.vlgmr.msrb.gmra.mxu3 %vm171_vm1, %v5295_v31 }
 0x138   :  { %4543 = vmatmul.msk.bf16.vlgmr.msra.gmra.mxu0 %vm171_vm1, %v5307_v36  ;;  %599 = vmatpush.bf16.msrb.mxu3 %v590_v5 }
 0x139   :  { %536 = vmatpush.bf16.msrb.mxu0 %v527_v3 }
 0x182   :  { %v187_v6 = vpop.f32.mrf.mxu1 }
 0x183   :  { %v360_v7 = vsel %vm359_vm3, %v187_v6, -inf }
 0x184   :  { %361 = vmax.xlane.f32.xlu2 %v360_v7 }
 0x18a   :  { %v189_v8 = vpop.f32.mrf.mxu1  ;;  %v259_v9 = vpop.f32.mrf.mxu0 }
 0x18b   :  { %v369_v10 = vsel %vm359_vm3, %v259_v9, -inf }
 0x18c   :  { %370 = vmax.xlane.f32.xlu0 %v369_v10 }
 0x192   :  { %v261_v11 = vpop.f32.mrf.mxu0 }
 0x1a2   :  { %v211_v12 = vpop.f32.mrf.mxu2 }
 0x1a3   :  { %v363_v13 = vsel %vm359_vm3, %v211_v12, -inf }
 0x1a4   :  { %364 = vmax.xlane.f32.xlu2 %v363_v13 }
 0x1aa   :  { %v213_v14 = vpop.f32.mrf.mxu2  ;;  %v235_v15 = vpop.f32.mrf.mxu3 }
 0x1ab   :  { %v366_v17 = vsel %vm359_vm3, %v235_v15, -inf }
 0x1ac   :  { %367 = vmax.xlane.f32.xlu0 %v366_v17  ;;  %v283_v18 = vpop.f32.mrf.mxu1 }
 0x1ad   :  { %v372_v19 = vsel %vm359_vm3, %v283_v18, -inf }
 0x1ae   :  { %373 = vmax.xlane.f32.xlu1 %v372_v19 }
 0x1b2   :  { %v237_v21 = vpop.f32.mrf.mxu3  ;;  %v307_v22 = vpop.f32.mrf.mxu2 }
 0x1b3   :  { %v375_v26 = vsel %vm359_vm3, %v307_v22, -inf }
 0x1b4   :  { %v285_v23 = vpop.f32.mrf.mxu1 }
 0x1b5   :  { %v355_v24 = vpop.f32.mrf.mxu0 }
 0x1b6   :  { %v381_v25 = vsel %vm359_vm3, %v355_v24, -inf  ;;  %376 = vmax.xlane.f32.xlu1 %v375_v26 }
 0x1b7   :  { %382 = vmax.xlane.f32.xlu2 %v381_v25 }
 0x1ba   :  { %v309_v28 = vpop.f32.mrf.mxu2  ;;  %v331_v30 = vpop.f32.mrf.mxu3 }
 0x1bb   :  { %v378_v33 = vsel %vm359_vm3, %v331_v30, -inf }
 0x1bd   :  { %v357_v31 = vpop.f32.mrf.mxu0 }
 0x1bf   :  { %379 = vmax.xlane.f32.xlu2 %v378_v33 }
 0x1c0   :  { %649 = vrot.lane.b32.xlu0 %v5279_v20, %s5172_s22 }
 0x1c2   :  { %v333_v34 = vpop.f32.mrf.mxu3 }
 0x1c8   :  { %672 = vrot.lane.b32.xlu0 %v5291_v29, %s5172_s22 }
 0x1cf   :  { %674 = vrot.lane.b32.xlu1 %v5291_v29, %s5171_s20 }
 0x1d0   :  { %542 = vrot.lane.b32.xlu0 %v5309_v37, %s5163_s17 }
 0x1d7   :  { %605 = vrot.lane.b32.xlu2 %v5320_v40, %s5163_s17  ;;  %s5173_s17 = smov 56  }
 0x1f7   :  { %v362_v35 = vpop.xlane.xlu2 %361 }
 0x1f8   :  { %v384_v36 = vsub.f32 %v187_v6, %v362_v35 }
 0x1fa   :  { %v392_v39 = vmul.f32 1.442695, %v384_v36 }
 0x1fc   :  { %4760 = vpow2.f32 %v392_v39 }
 0x1ff   :  { %v371_v41 = vpop.xlane.xlu0 %370 }
 0x200   :  { %v387_v42 = vsub.f32 %v259_v9, %v371_v41 }
 0x202   :  { %v5384_v43 = vpop.eup %4760  ;;  %v398_v44 = vmul.f32 1.442695, %v387_v42 }
 0x203   :  { %v408_v45 = vsel %vm359_vm3, %v5384_v43, 0.0 }
 0x204   :  { %4762 = vpow2.f32 %v398_v44  ;;  %409 = vadd.xlane.f32.xlu1 %v408_v45  ;;  %v657_v44 = vsel %vm171_vm1, %v5346_v55, 0 }
 0x20a   :  { %v5388_v46 = vpop.eup %4762 }
 0x20b   :  { %v417_v47 = vsel %vm359_vm3, %v5388_v46, 0.0 }
 0x20c   :  { %418 = vadd.xlane.f32.xlu0 %v417_v47 }
 0x217   :  { %v365_v48 = vpop.xlane.xlu2 %364 }
 0x218   :  { %v385_v49 = vsub.f32 %v211_v12, %v365_v48 }
 0x21a   :  { %v394_v50 = vmul.f32 1.442695, %v385_v49 }
 0x21c   :  { %4764 = vpow2.f32 %v394_v50 }
 0x21f   :  { %v368_v51 = vpop.xlane.xlu0 %367 }
 0x220   :  { %v386_v52 = vsub.f32 %v235_v15, %v368_v51 }
 0x221   :  { %v374_v53 = vpop.xlane.xlu1 %373 }
 0x222   :  { %v5392_v54 = vpop.eup %4764  ;;  %v396_v56 = vmul.f32 1.442695, %v386_v52  ;;  %v388_v57 = vsub.f32 %v283_v18, %v374_v53 }
 0x223   :  { %v411_v58 = vsel %vm359_vm3, %v5392_v54, 0.0 }
 0x224   :  { %4766 = vpow2.f32 %v396_v56  ;;  %v400_v59 = vmul.f32 1.442695, %v388_v57  ;;  %412 = vadd.xlane.f32.xlu0 %v411_v58 }
 0x226   :  { %4768 = vpow2.f32 %v400_v59 }
 0x229   :  { %v377_v61 = vpop.xlane.xlu1 %376 }
 0x22a   :  { %v383_v60 = vpop.xlane.xlu2 %382  ;;  %v5396_v62 = vpop.eup %4766  ;;  %v389_v3 = vsub.f32 %v307_v22, %v377_v61 }
 0x22b   :  { %v391_v63 = vsub.f32 %v355_v24, %v383_v60  ;;  %v414_v0 = vsel %vm359_vm3, %v5396_v62, 0.0 }
 0x22c   :  { %v5400_v1 = vpop.eup %4768  ;;  %415 = vadd.xlane.f32.xlu1 %v414_v0  ;;  %v402_v5 = vmul.f32 1.442695, %v389_v3 }
 0x22d   :  { %v406_v2 = vmul.f32 1.442695, %v391_v63  ;;  %v420_v4 = vsel %vm359_vm3, %v5400_v1, 0.0 }
 0x22e   :  { %421 = vadd.xlane.f32.xlu2 %v420_v4 }
 0x22f   :  { %4770 = vpow2.f32 %v406_v2 }
 0x230   :  { %4772 = vpow2.f32 %v402_v5 }
 0x232   :  { %v380_v6 = vpop.xlane.xlu2 %379  ;;  %v5404_v7 = vpop.permute.xlu0 %649 }
 0x233   :  { %v390_v9 = vsub.f32 %v331_v30, %v380_v6 }
 0x235   :  { %v5406_v8 = vpop.eup %4770  ;;  %v404_v11 = vmul.f32 1.442695, %v390_v9 }
 0x236   :  { %v429_v10 = vsel %vm359_vm3, %v5406_v8, 0.0  ;;  %v5412_v13 = vpop.eup %4772 }
 0x237   :  { %430 = vadd.xlane.f32.xlu1 %v429_v10  ;;  %4774 = vpow2.f32 %v404_v11  ;;  %v423_v17 = vsel %vm359_vm3, %v5412_v13, 0.0 }
 0x238   :  { %743 = vrot.lane.b32.xlu0 %v5297_v32, %s5171_s20 }
 0x23a   :  { %v606_v12 = vpop.permute.xlu2 %605  ;;  %v5415_v15 = vpop.permute.xlu0 %672 }
 0x23b   :  { %v611_v14 = vsel %vm462_vm2, %v606_v12, 0 }
 0x23c   :  { %620 = vmatpush.bf16.msra.mxu0 %v611_v14 }
 0x23d   :  { %v5421_v18 = vpop.eup %4774 }
 0x23e   :  { %v426_v22 = vsel %vm359_vm3, %v5421_v18, 0.0 }
 0x23f   :  { %424 = vadd.xlane.f32.xlu1 %v423_v17 }
 0x240   :  { %628 = vrot.lane.b32.xlu0 %v5274_v16, %s5171_s20 }
 0x241   :  { %v675_v23 = vpop.permute.xlu1 %674 }
 0x242   :  { %v543_v19 = vpop.permute.xlu0 %542  ;;  %v680_v53 = vsel %vm171_vm1, %v675_v23, 0 }
 0x243   :  { %v548_v21 = vsel %vm462_vm2, %v543_v19, 0 }
 0x244   :  { %557 = vmatpush.bf16.msrb.mxu1 %v548_v21 }
 0x246   :  { %741 = vrot.lane.b32.xlu2 %v5297_v32, %s5172_s22 }
 0x247   :  { %427 = vadd.xlane.f32.xlu1 %v426_v22 }
 0x248   :  { %697 = vrot.lane.b32.xlu0 %v5288_v27, %s5171_s20 }
 0x24e   :  { %695 = vrot.lane.b32.xlu2 %v5288_v27, %s5172_s22 }
 0x250   :  { %764 = vrot.lane.b32.xlu0 %v5311_v38, %s5172_s22 }
 0x256   :  { %718 = vrot.lane.b32.xlu2 %v5309_v37, %s5172_s22 }
 0x258   :  { %720 = vrot.lane.b32.xlu0 %v5309_v37, %s5171_s20 }
 0x25e   :  { %927 = vrot.lane.b32.xlu2 %v5279_v20, %s5173_s17 }
 0x260   :  { %766 = vrot.lane.b32.xlu1 %v5311_v38, %s5171_s20  ;;  %787 = vrot.lane.b32.xlu0 %v5320_v40, %s5172_s22 }
 0x266   :  { %1011 = vrot.lane.b32.xlu2 %v5297_v32, %s5173_s17 }
 0x268   :  { %626 = vrot.lane.b32.xlu1 %v5274_v16, %s5172_s22  ;;  %948 = vrot.lane.b32.xlu0 %v5291_v29, %s5173_s17 }
 0x26e   :  { %906 = vrot.lane.b32.xlu2 %v5274_v16, %s5173_s17 }
 0x270   :  { %789 = vrot.lane.b32.xlu1 %v5320_v40, %s5171_s20  ;;  %1099 = vrot.lane.b32.xlu0 %v5279_v20, %s5174_s23 }
 0x276   :  { %969 = vrot.lane.b32.xlu2 %v5288_v27, %s5173_s17 }
 0x277   :  { %v410_v24 = vpop.xlane.xlu1 %409 }
 0x278   :  { %1032 = vrot.lane.b32.xlu1 %v5311_v38, %s5173_s17  ;;  %4776 = vrcp.f32 %v410_v24  ;;  %1122 = vrot.lane.b32.xlu0 %v5291_v29, %s5174_s23 }
 0x27e   :  { %v4777_v25 = vpop.eup %4776  ;;  %990 = vrot.lane.b32.xlu2 %v5309_v37, %s5173_s17 }
 0x27f   :  { %v440_v26 = vmul.f32 %v4777_v25, %v5384_v43  ;;  %v419_v28 = vpop.xlane.xlu0 %418 }
 0x280   :  { %4778 = vrcp.f32 %v419_v28 }
 0x281   :  { %v448_v30 = vpack.c.bf16 %v440_v26, %v440_v26 }
 0x283   :  { %4544 = vmatmul.msk.bf16.vlgmr.msra.gmra.mxu1 %vm458_vm4, %v448_v30 }
 0x286   :  { %v4779_v31 = vpop.eup %4778 }
 0x287   :  { %v443_v33 = vmul.f32 %v4779_v31, %v5388_v46 }
 0x289   :  { %v451_v34 = vpack.c.bf16 %v443_v33, %v443_v33 }
 0x28b   :  { %4547 = vmatmul.msk.bf16.vlgmr.msrb.gmra.mxu0 %vm458_vm4, %v451_v34 }
 0x297   :  { %v413_v35 = vpop.xlane.xlu0 %412 }
 0x298   :  { %4780 = vrcp.f32 %v413_v35 }
 0x29e   :  { %v4781_v36 = vpop.eup %4780 }
 0x29f   :  { %v441_v39 = vmul.f32 %v4781_v36, %v5392_v54  ;;  %v416_v41 = vpop.xlane.xlu1 %415 }
 0x2a0   :  { %4782 = vrcp.f32 %v416_v41 }
 0x2a1   :  { %v449_v42 = vpack.c.bf16 %v441_v39, %v441_v39  ;;  %v422_v43 = vpop.xlane.xlu2 %421 }
 0x2a2   :  { %4784 = vrcp.f32 %v422_v43 }
 0x2a3   :  { %4545 = vmatmul.msk.bf16.vlgmr.msra.gmra.mxu2 %vm458_vm4, %v449_v42 }
 0x2a4   :  { %666 = vmatpush.bf16.xpose.msra.mxu2 %v657_v44 }
 0x2a6   :  { %v4783_v45 = vpop.eup %4782 }
 0x2a7   :  { %v442_v46 = vmul.f32 %v4783_v45, %v5396_v62 }
 0x2a8   :  { %v4785_v47 = vpop.eup %4784 }
 0x2a9   :  { %v450_v48 = vpack.c.bf16 %v442_v46, %v442_v46  ;;  %v444_v49 = vmul.f32 %v4785_v47, %v5400_v1  ;;  %v742_v50 = vpop.permute.xlu2 %741 }
 0x2aa   :  { %v431_v51 = vpop.xlane.xlu1 %430  ;;  %v744_v52 = vpop.permute.xlu0 %743 }
 0x2ab   :  { %4786 = vrcp.f32 %v431_v51  ;;  %v452_v54 = vpack.c.bf16 %v444_v49, %v444_v49  ;;  %4546 = vmatmul.msk.bf16.vlgmr.msra.gmra.mxu3 %vm458_vm4, %v450_v48  ;;  %v749_v5 = vsel %vm171_vm1, %v744_v52, 0 }
 0x2ac   :  { %689 = vmatpush.bf16.xpose.msra.mxu3 %v680_v53 }
 0x2ad   :  { %4548 = vmatmul.msk.bf16.vlgmr.msrb.gmra.mxu1 %vm458_vm4, %v452_v54 }
 0x2b1   :  { %v4787_v55 = vpop.eup %4786  ;;  %v696_v57 = vpop.permute.xlu2 %695 }
 0x2b2   :  { %v447_v56 = vmul.f32 %v4787_v55, %v5406_v8  ;;  %v425_v58 = vpop.xlane.xlu1 %424  ;;  %v629_v59 = vpop.permute.xlu0 %628 }
 0x2b3   :  { %4788 = vrcp.f32 %v425_v58  ;;  %v634_v61 = vsel %vm171_vm1, %v629_v59, 0 }
 0x2b4   :  { %v455_v60 = vpack.c.bf16 %v447_v56, %v447_v56  ;;  %643 = vmatpush.bf16.xpose.msra.mxu1 %v634_v61 }
 0x2b6   :  { %4551 = vmatmul.msk.bf16.vlgmr.msra.gmra.mxu0 %vm458_vm4, %v455_v60 }
 0x2b9   :  { %v4789_v62 = vpop.eup %4788  ;;  %v719_v0 = vpop.permute.xlu2 %718 }
 0x2ba   :  { %v445_v63 = vmul.f32 %v4789_v62, %v5412_v13  ;;  %v428_v1 = vpop.xlane.xlu1 %427  ;;  %v698_v2 = vpop.permute.xlu0 %697 }
 0x2bb   :  { %4790 = vrcp.f32 %v428_v1  ;;  %v703_v4 = vsel %vm171_vm1, %v698_v2, 0 }
 0x2bc   :  { %v453_v3 = vpack.c.bf16 %v445_v63, %v445_v63  ;;  %712 = vmatpush.bf16.xpose.msrb.mxu0 %v703_v4 }
 0x2be   :  { %4549 = vmatmul.msk.bf16.vlgmr.msrb.gmra.mxu2 %vm458_vm4, %v453_v3 }
 0x2bf   :  { %758 = vmatpush.bf16.xpose.msrb.mxu2 %v749_v5 }
 0x2c1   :  { %v4791_v6 = vpop.eup %4790  ;;  %v928_v9 = vpop.permute.xlu2 %927 }
 0x2c2   :  { %v446_v8 = vmul.f32 %v4791_v6, %v5421_v18  ;;  %v765_v10 = vpop.permute.xlu0 %764  ;;  %v933_v17 = vsel %vm462_vm2, %v928_v9, 0 }
 0x2c4   :  { %v454_v11 = vpack.c.bf16 %v446_v8, %v446_v8 }
 0x2c6   :  { %4550 = vmatmul.msk.bf16.vlgmr.msrb.gmra.mxu3 %vm458_vm4, %v454_v11  ;;  %4555 = vmatmul.msk.bf16.vlgmr.msrb.gmra.mxu0 %vm171_vm1, %v696_v57 }
 0x2c9   :  { %v1012_v12 = vpop.permute.xlu2 %1011 }
 0x2ca   :  { %v721_v13 = vpop.permute.xlu0 %720 }
 0x2cb   :  { %v726_v14 = vsel %vm171_vm1, %v721_v13, 0 }
 0x2cc   :  { %735 = vmatpush.bf16.xpose.msrb.mxu1 %v726_v14 }
 0x2ce   :  { %4553 = vmatmul.msk.bf16.vlgmr.msra.gmra.mxu2 %vm171_vm1, %v5404_v7  ;;  %v1017_v7 = vsel %vm462_vm2, %v1012_v12, 0 }
 0x2cf   :  { %942 = vmatpush.bf16.msra.mxu2 %v933_v17 }
 0x2d1   :  { %v907_v22 = vpop.permute.xlu2 %906 }
 0x2d2   :  { %v767_v19 = vpop.permute.xlu1 %766  ;;  %v788_v21 = vpop.permute.xlu0 %787  ;;  %v912_v24 = vsel %vm462_vm2, %v907_v22, 0 }
 0x2d3   :  { %v772_v18 = vsel %vm171_vm1, %v767_v19, 0 }
 0x2d4   :  { %781 = vmatpush.bf16.xpose.msrb.mxu3 %v772_v18 }
 0x2d6   :  { %4554 = vmatmul.msk.bf16.vlgmr.msra.gmra.mxu3 %vm171_vm1, %v5415_v15 }
 0x2d9   :  { %v970_v28 = vpop.permute.xlu2 %969 }
 0x2da   :  { %v627_v23 = vpop.permute.xlu1 %626  ;;  %v949_v25 = vpop.permute.xlu0 %948  ;;  %v975_v15 = vsel %vm462_vm2, %v970_v28, 0 }
 0x2db   :  { %4552 = vmatmul.msk.bf16.vlgmr.msra.gmra.mxu1 %vm171_vm1, %v627_v23  ;;  %v954_v26 = vsel %vm462_vm2, %v949_v25, 0 }
 0x2dc   :  { %921 = vmatpush.bf16.msra.mxu1 %v912_v24  ;;  %963 = vmatpush.bf16.msra.mxu3 %v954_v26 }
 0x2de   :  { %4557 = vmatmul.msk.bf16.vlgmr.msrb.gmra.mxu2 %vm171_vm1, %v742_v50 }
 0x2df   :  { %1026 = vmatpush.bf16.msrb.mxu2 %v1017_v7 }
 0x2e1   :  { %v991_v33 = vpop.permute.xlu2 %990 }
 0x2e2   :  { %v790_v30 = vpop.permute.xlu1 %789  ;;  %v996_v35 = vsel %vm462_vm2, %v991_v33, 0  ;;  %v5539_v18 = vpop.permute.xlu0 %1099 }
 0x2e3   :  { %v795_v31 = vsel %vm171_vm1, %v790_v30, 0 }
 0x2e4   :  { %804 = vmatpush.bf16.xpose.msra.mxu0 %v795_v31 }
 0x2e6   :  { %4558 = vmatmul.msk.bf16.vlgmr.msrb.gmra.mxu3 %vm171_vm1, %v765_v10 }
 0x2ea   :  { %v1033_v34 = vpop.permute.xlu1 %1032 }
 0x2eb   :  { %v1038_v36 = vsel %vm462_vm2, %v1033_v34, 0  ;;  %4556 = vmatmul.msk.bf16.vlgmr.msrb.gmra.mxu1 %vm171_vm1, %v719_v0  ;;  %4559 = vmatmul.msk.bf16.vlgmr.msra.gmra.mxu0 %vm171_vm1, %v788_v21  ;;  %v5541_v21 = vpop.permute.xlu0 %1122 }
 0x2ec   :  { %984 = vmatpush.bf16.msrb.mxu0 %v975_v15  ;;  %1005 = vmatpush.bf16.msrb.mxu1 %v996_v35 }
 0x2ed   :  { %1047 = vmatpush.bf16.msrb.mxu3 %v1038_v36 }
 0x300   :  { %v5506_v39 = vpop.f32.mrf.mxu1 }
 0x308   :  { %v477_v41 = vpop.f32.mrf.mxu1  ;;  %v5508_v42 = vpop.f32.mrf.mxu0 }
 0x310   :  { %v540_v43 = vpop.f32.mrf.mxu0 }
 0x326   :  { %v5510_v44 = vpop.f32.mrf.mxu2 }
 0x32a   :  { %v5512_v45 = vpop.f32.mrf.mxu1 }
 0x32e   :  { %v498_v46 = vpop.f32.mrf.mxu2  ;;  %v5514_v47 = vpop.f32.mrf.mxu3 }
 0x332   :  { %v561_v48 = vpop.f32.mrf.mxu1 }
 0x333   :  { %v5516_v49 = vpop.f32.mrf.mxu0 }
 0x336   :  { %v519_v50 = vpop.f32.mrf.mxu3 }
 0x33b   :  { %v624_v51 = vpop.f32.mrf.mxu0 }
 0x341   :  { %v5518_v52 = vpop.f32.mrf.mxu2 }
 0x343   :  { %v714_v53 = vpop.f32.mrf.mxu0 }
 0x344   :  { %v819_v54 = vsel %vm359_vm3, %v714_v53, -inf }
 0x345   :  { %820 = vmax.xlane.f32.xlu0 %v819_v54 }
 0x349   :  { %v582_v55 = vpop.f32.mrf.mxu2  ;;  %v5521_v56 = vpop.f32.mrf.mxu3 }
 0x34b   :  { %v716_v57 = vpop.f32.mrf.mxu0 }
 0x351   :  { %v603_v58 = vpop.f32.mrf.mxu3  ;;  %v668_v59 = vpop.f32.mrf.mxu2 }
 0x352   :  { %v813_v60 = vsel %vm359_vm3, %v668_v59, -inf }
 0x353   :  { %814 = vmax.xlane.f32.xlu1 %v813_v60 }
 0x358   :  { %v645_v61 = vpop.f32.mrf.mxu1 }
 0x359   :  { %v670_v62 = vpop.f32.mrf.mxu2  ;;  %v691_v63 = vpop.f32.mrf.mxu3  ;;  %v810_v0 = vsel %vm359_vm3, %v645_v61, -inf }
 0x35a   :  { %811 = vmax.xlane.f32.xlu2 %v810_v0  ;;  %v816_v4 = vsel %vm359_vm3, %v691_v63, -inf }
 0x360   :  { %v647_v1 = vpop.f32.mrf.mxu1 }
 0x361   :  { %v693_v2 = vpop.f32.mrf.mxu3  ;;  %v760_v3 = vpop.f32.mrf.mxu2 }
 0x362   :  { %817 = vmax.xlane.f32.xlu2 %v816_v4  ;;  %v825_v5 = vsel %vm359_vm3, %v760_v3, -inf }
 0x363   :  { %826 = vmax.xlane.f32.xlu0 %v825_v5 }
 0x368   :  { %v737_v6 = vpop.f32.mrf.mxu1  ;;  %v806_v8 = vpop.f32.mrf.mxu0 }
 0x369   :  { %v762_v9 = vpop.f32.mrf.mxu2  ;;  %v5527_v10 = vpop.f32.mrf.mxu3  ;;  %v822_v11 = vsel %vm359_vm3, %v737_v6, -inf  ;;  %v831_v12 = vsel %vm359_vm3, %v806_v8, -inf }
 0x36a   :  { %823 = vmax.xlane.f32.xlu1 %v822_v11  ;;  %832 = vmax.xlane.f32.xlu2 %v831_v12  ;;  %v828_v19 = vsel %vm359_vm3, %v5527_v10, -inf }
 0x370   :  { %v739_v13 = vpop.f32.mrf.mxu1  ;;  %v808_v14 = vpop.f32.mrf.mxu0 }
 0x371   :  { %v785_v17 = vpop.f32.mrf.mxu3 }
 0x372   :  { %829 = vmax.xlane.f32.xlu1 %v828_v19 }
 0x377   :  { %1053 = vrot.lane.b32.xlu0 %v5320_v40, %s5173_s17 }
 0x382   :  { %1214 = vrot.lane.b32.xlu2 %v5311_v38, %s5174_s23 }
 0x38b   :  { %1097 = vrot.lane.b32.xlu1 %v5279_v20, %s5175_s24 }
 0x3b8   :  { %v821_v22 = vpop.xlane.xlu0 %820 }
 0x3b9   :  { %v837_v23 = vsub.f32 %v714_v53, %v821_v22 }
 0x3bb   :  { %v848_v24 = vmul.f32 1.442695, %v837_v23 }
 0x3bd   :  { %4792 = vpow2.f32 %v848_v24 }
 0x3c3   :  { %v5543_v25 = vpop.eup %4792 }
 0x3c4   :  { %v867_v26 = vsel %vm359_vm3, %v5543_v25, 0.0 }
 0x3c5   :  { %868 = vadd.xlane.f32.xlu0 %v867_v26 }
 0x3c6   :  { %v815_v7 = vpop.xlane.xlu1 %814 }
 0x3c7   :  { %v835_v28 = vsub.f32 %v668_v59, %v815_v7 }
 0x3c9   :  { %v844_v30 = vmul.f32 1.442695, %v835_v28 }
 0x3cb   :  { %4794 = vpow2.f32 %v844_v30 }
 0x3cd   :  { %v812_v31 = vpop.xlane.xlu2 %811 }
 0x3ce   :  { %v834_v15 = vsub.f32 %v645_v61, %v812_v31 }
 0x3d0   :  { %v842_v33 = vmul.f32 1.442695, %v834_v15 }
 0x3d1   :  { %v5547_v34 = vpop.eup %4794 }
 0x3d2   :  { %4796 = vpow2.f32 %v842_v33  ;;  %v861_v35 = vsel %vm359_vm3, %v5547_v34, 0.0 }
 0x3d3   :  { %862 = vadd.xlane.f32.xlu0 %v861_v35 }
 0x3d5   :  { %v818_v36 = vpop.xlane.xlu2 %817 }
 0x3d6   :  { %v836_v41 = vsub.f32 %v691_v63, %v818_v36  ;;  %v827_v53 = vpop.xlane.xlu0 %826 }
 0x3d7   :  { %v839_v60 = vsub.f32 %v760_v3, %v827_v53 }
 0x3d8   :  { %v5551_v43 = vpop.eup %4796  ;;  %v846_v46 = vmul.f32 1.442695, %v836_v41 }
 0x3d9   :  { %v858_v48 = vsel %vm359_vm3, %v5551_v43, 0.0  ;;  %v852_v62 = vmul.f32 1.442695, %v839_v60 }
 0x3da   :  { %4798 = vpow2.f32 %v846_v46  ;;  %859 = vadd.xlane.f32.xlu1 %v858_v48 }
 0x3dd   :  { %v824_v50 = vpop.xlane.xlu1 %823  ;;  %v833_v51 = vpop.xlane.xlu2 %832 }
 0x3de   :  { %v838_v54 = vsub.f32 %v737_v6, %v824_v50  ;;  %v841_v55 = vsub.f32 %v806_v8, %v833_v51  ;;  %v1128_v50 = vsel %vm171_vm1, %v5541_v21, 0 }
 0x3e0   :  { %v5555_v57 = vpop.eup %4798  ;;  %v850_v58 = vmul.f32 1.442695, %v838_v54  ;;  %v856_v59 = vmul.f32 1.442695, %v841_v55 }
 0x3e1   :  { %v864_v61 = vsel %vm359_vm3, %v5555_v57, 0.0 }
 0x3e2   :  { %4800 = vpow2.f32 %v850_v58  ;;  %865 = vadd.xlane.f32.xlu1 %v864_v61 }
 0x3e3   :  { %4802 = vpow2.f32 %v856_v59 }
 0x3e4   :  { %4804 = vpow2.f32 %v852_v62 }
 0x3e5   :  { %v830_v63 = vpop.xlane.xlu1 %829  ;;  %v1215_v31 = vpop.permute.xlu2 %1214 }
 0x3e6   :  { %v840_v2 = vsub.f32 %v5527_v10, %v830_v63 }
 0x3e7   :  { %1120 = vrot.lane.b32.xlu0 %v5291_v29, %s5175_s24 }
 0x3e8   :  { %v5561_v0 = vpop.eup %4800  ;;  %v854_v8 = vmul.f32 1.442695, %v840_v2 }
 0x3e9   :  { %v5563_v1 = vpop.eup %4802  ;;  %v1054_v4 = vpop.permute.xlu0 %1053  ;;  %v870_v3 = vsel %vm359_vm3, %v5561_v0, 0.0 }
 0x3ea   :  { %v1059_v5 = vsel %vm462_vm2, %v1054_v4, 0  ;;  %871 = vadd.xlane.f32.xlu2 %v870_v3  ;;  %v879_v6 = vsel %vm359_vm3, %v5563_v1, 0.0  ;;  %v5571_v9 = vpop.eup %4804  ;;  %4806 = vpow2.f32 %v854_v8 }
 0x3eb   :  { %880 = vadd.xlane.f32.xlu1 %v879_v6  ;;  %1068 = vmatpush.bf16.msra.mxu0 %v1059_v5  ;;  %v873_v10 = vsel %vm359_vm3, %v5571_v9, 0.0 }
 0x3ef   :  { %1191 = vrot.lane.b32.xlu0 %v5297_v32, %s5174_s23 }
 0x3f0   :  { %v5577_v11 = vpop.eup %4806 }
 0x3f1   :  { %v876_v12 = vsel %vm359_vm3, %v5577_v11, 0.0 }
 0x3f3   :  { %874 = vadd.xlane.f32.xlu1 %v873_v10  ;;  %v1220_v10 = vsel %vm171_vm1, %v1215_v31, 0 }
 0x3f7   :  { %1076 = vrot.lane.b32.xlu0 %v5274_v16, %s5174_s23 }
 0x3fb   :  { %877 = vadd.xlane.f32.xlu1 %v876_v12 }
 0x3fd   :  { %v5619_v22 = vpop.permute.xlu1 %1097 }
 0x3ff   :  { %1212 = vrot.lane.b32.xlu0 %v5311_v38, %s5175_s24 }
 0x402   :  { %1189 = vrot.lane.b32.xlu2 %v5297_v32, %s5175_s24 }
 0x407   :  { %1168 = vrot.lane.b32.xlu0 %v5309_v37, %s5174_s23 }
 0x40a   :  { %1143 = vrot.lane.b32.xlu2 %v5288_v27, %s5175_s24 }
 0x40f   :  { %1235 = vrot.lane.b32.xlu0 %v5320_v40, %s5175_s24 }
 0x412   :  { %1166 = vrot.lane.b32.xlu2 %v5309_v37, %s5175_s24 }
 0x414   :  { %1145 = vrot.lane.b32.xlu1 %v5288_v27, %s5174_s23 }
 0x417   :  { %1396 = vrot.lane.b32.xlu0 %v5291_v29, %s5176_s1 }
 0x41a   :  { %1417 = vrot.lane.b32.xlu2 %v5288_v27, %s5176_s1 }
 0x41c   :  { %1074 = vrot.lane.b32.xlu1 %v5274_v16, %s5175_s24 }
 0x41f   :  { %1438 = vrot.lane.b32.xlu0 %v5309_v37, %s5176_s1 }
 0x422   :  { %1545 = vrot.lane.b32.xlu2 %v5279_v20, %s5177_s25 }
 0x424   :  { %1237 = vrot.lane.b32.xlu1 %v5320_v40, %s5174_s23 }
 0x427   :  { %1501 = vrot.lane.b32.xlu0 %v5320_v40, %s5176_s1 }
 0x42c   :  { %1375 = vrot.lane.b32.xlu1 %v5279_v20, %s5176_s1 }
 0x42f   :  { %1570 = vrot.lane.b32.xlu0 %v5291_v29, %s5178_s26 }
 0x434   :  { %1354 = vrot.lane.b32.xlu1 %v5274_v16, %s5176_s1 }
 0x437   :  { %1568 = vrot.lane.b32.xlu0 %v5291_v29, %s5177_s25 }
 0x438   :  { %v869_v13 = vpop.xlane.xlu0 %868 }
 0x439   :  { %4808 = vrcp.f32 %v869_v13 }
 0x43c   :  { %1459 = vrot.lane.b32.xlu1 %v5297_v32, %s5176_s1 }
 0x43f   :  { %v4809_v14 = vpop.eup %4808  ;;  %1524 = vrot.lane.b32.xlu0 %v5274_v16, %s5178_s26 }
 0x440   :  { %v893_v17 = vmul.f32 %v4809_v14, %v5543_v25  ;;  %v1105_v25 = vsel %vm171_vm1, %v5539_v18, 0 }
 0x442   :  { %v901_v19 = vpack.c.bf16 %v893_v17, %v893_v17 }
 0x444   :  { %1480 = vrot.lane.b32.xlu1 %v5311_v38, %s5176_s1  ;;  %4563 = vmatmul.msk.bf16.vlgmr.msrb.gmra.mxu0 %vm458_vm4, %v901_v19 }
 0x446   :  { %v863_v23 = vpop.xlane.xlu0 %862 }
 0x447   :  { %4810 = vrcp.f32 %v863_v23 }
 0x44c   :  { %1547 = vrot.lane.b32.xlu1 %v5279_v20, %s5178_s26 }
 0x44d   :  { %v4811_v24 = vpop.eup %4810  ;;  %v860_v26 = vpop.xlane.xlu1 %859 }
 0x44e   :  { %v891_v7 = vmul.f32 %v4811_v24, %v5547_v34  ;;  %4812 = vrcp.f32 %v860_v26 }
 0x450   :  { %v899_v28 = vpack.c.bf16 %v891_v7, %v891_v7 }
 0x452   :  { %4561 = vmatmul.msk.bf16.vlgmr.msra.gmra.mxu2 %vm458_vm4, %v899_v28 }
 0x453   :  { %1114 = vmatpush.bf16.xpose.msra.mxu2 %v1105_v25 }
 0x454   :  { %v4813_v30 = vpop.eup %4812 }
 0x455   :  { %v890_v15 = vmul.f32 %v4813_v30, %v5551_v43  ;;  %v866_v33 = vpop.xlane.xlu1 %865 }
 0x456   :  { %4814 = vrcp.f32 %v866_v33 }
 0x457   :  { %v898_v35 = vpack.c.bf16 %v890_v15, %v890_v15 }
 0x459   :  { %4560 = vmatmul.msk.bf16.vlgmr.msra.gmra.mxu1 %vm458_vm4, %v898_v35  ;;  %v1121_v36 = vpop.permute.xlu0 %1120 }
 0x45c   :  { %v4815_v41 = vpop.eup %4814 }
 0x45d   :  { %v892_v34 = vmul.f32 %v4815_v41, %v5555_v57  ;;  %v872_v46 = vpop.xlane.xlu2 %871 }
 0x45e   :  { %v881_v48 = vpop.xlane.xlu1 %880  ;;  %4816 = vrcp.f32 %v872_v46 }
 0x45f   :  { %v900_v18 = vpack.c.bf16 %v892_v34, %v892_v34  ;;  %4818 = vrcp.f32 %v881_v48 }
 0x461   :  { %4562 = vmatmul.msk.bf16.vlgmr.msra.gmra.mxu3 %vm458_vm4, %v900_v18  ;;  %v1192_v43 = vpop.permute.xlu0 %1191 }
 0x462   :  { %1137 = vmatpush.bf16.xpose.msra.mxu3 %v1128_v50 }
 0x464   :  { %v4817_v51 = vpop.eup %4816 }
 0x465   :  { %v4819_v53 = vpop.eup %4818  ;;  %v894_v54 = vmul.f32 %v4817_v51, %v5561_v0  ;;  %v1190_v5 = vpop.permute.xlu2 %1189 }
 0x466   :  { %v897_v55 = vmul.f32 %v4819_v53, %v5563_v1  ;;  %v875_v58 = vpop.xlane.xlu1 %874  ;;  %v1197_v1 = vsel %vm171_vm1, %v1192_v43, 0 }
 0x467   :  { %v902_v57 = vpack.c.bf16 %v894_v54, %v894_v54  ;;  %4820 = vrcp.f32 %v875_v58 }
 0x468   :  { %v905_v59 = vpack.c.bf16 %v897_v55, %v897_v55 }
 0x469   :  { %4564 = vmatmul.msk.bf16.vlgmr.msrb.gmra.mxu1 %vm458_vm4, %v902_v57  ;;  %v1077_v60 = vpop.permute.xlu0 %1076 }
 0x46a   :  { %4567 = vmatmul.msk.bf16.vlgmr.msra.gmra.mxu0 %vm458_vm4, %v905_v59  ;;  %v1082_v21 = vsel %vm171_vm1, %v1077_v60, 0 }
 0x46b   :  { %1091 = vmatpush.bf16.xpose.msra.mxu1 %v1082_v21 }
 0x46d   :  { %v4821_v61 = vpop.eup %4820  ;;  %v1144_v12 = vpop.permute.xlu2 %1143 }
 0x46e   :  { %v895_v62 = vmul.f32 %v4821_v61, %v5571_v9  ;;  %v878_v63 = vpop.xlane.xlu1 %877 }
 0x46f   :  { %4822 = vrcp.f32 %v878_v63 }
 0x470   :  { %v903_v0 = vpack.c.bf16 %v895_v62, %v895_v62 }
 0x471   :  { %v1213_v2 = vpop.permute.xlu0 %1212 }
 0x472   :  { %4565 = vmatmul.msk.bf16.vlgmr.msrb.gmra.mxu2 %vm458_vm4, %v903_v0 }
 0x473   :  { %1206 = vmatpush.bf16.xpose.msrb.mxu2 %v1197_v1 }
 0x475   :  { %v4823_v4 = vpop.eup %4822  ;;  %v1167_v23 = vpop.permute.xlu2 %1166 }
 0x476   :  { %v896_v3 = vmul.f32 %v4823_v4, %v5577_v11 }
 0x478   :  { %v904_v6 = vpack.c.bf16 %v896_v3, %v896_v3 }
 0x479   :  { %v1169_v8 = vpop.permute.xlu0 %1168 }
 0x47a   :  { %4566 = vmatmul.msk.bf16.vlgmr.msrb.gmra.mxu3 %vm458_vm4, %v904_v6  ;;  %v1174_v9 = vsel %vm171_vm1, %v1169_v8, 0 }
 0x47b   :  { %1229 = vmatpush.bf16.xpose.msrb.mxu3 %v1220_v10  ;;  %1183 = vmatpush.bf16.xpose.msrb.mxu1 %v1174_v9 }
 0x481   :  { %v1236_v13 = vpop.permute.xlu0 %1235 }
 0x482   :  { %4569 = vmatmul.msk.bf16.vlgmr.msra.gmra.mxu2 %vm171_vm1, %v5619_v22  ;;  %v1418_v22 = vpop.permute.xlu2 %1417 }
 0x483   :  { %v1423_v25 = vsel %vm462_vm2, %v1418_v22, 0 }
 0x486   :  { %v1146_v14 = vpop.permute.xlu1 %1145 }
 0x487   :  { %v1151_v17 = vsel %vm171_vm1, %v1146_v14, 0 }
 0x488   :  { %1160 = vmatpush.bf16.xpose.msrb.mxu0 %v1151_v17 }
 0x489   :  { %v1397_v11 = vpop.permute.xlu0 %1396 }
 0x48a   :  { %4570 = vmatmul.msk.bf16.vlgmr.msra.gmra.mxu3 %vm171_vm1, %v1121_v36  ;;  %v1402_v19 = vsel %vm462_vm2, %v1397_v11, 0 }
 0x48b   :  { %1411 = vmatpush.bf16.msra.mxu3 %v1402_v19 }
 0x48e   :  { %v1075_v24 = vpop.permute.xlu1 %1074 }
 0x48f   :  { %4568 = vmatmul.msk.bf16.vlgmr.msra.gmra.mxu1 %vm171_vm1, %v1075_v24  ;;  %4571 = vmatmul.msk.bf16.vlgmr.msrb.gmra.mxu0 %vm171_vm1, %v1144_v12 }
 0x491   :  { %v1439_v26 = vpop.permute.xlu0 %1438 }
 0x492   :  { %4573 = vmatmul.msk.bf16.vlgmr.msrb.gmra.mxu2 %vm171_vm1, %v1190_v5  ;;  %v1444_v41 = vsel %vm462_vm2, %v1439_v26, 0 }
 0x496   :  { %v1238_v7 = vpop.permute.xlu1 %1237 }
 0x497   :  { %v1243_v28 = vsel %vm171_vm1, %v1238_v7, 0 }
 0x498   :  { %1252 = vmatpush.bf16.xpose.msra.mxu0 %v1243_v28 }
 0x499   :  { %v1502_v30 = vpop.permute.xlu0 %1501 }
 0x49a   :  { %4574 = vmatmul.msk.bf16.vlgmr.msrb.gmra.mxu3 %vm171_vm1, %v1213_v2  ;;  %v1507_v15 = vsel %vm462_vm2, %v1502_v30, 0 }
 0x49e   :  { %v1376_v31 = vpop.permute.xlu1 %1375 }
 0x49f   :  { %v1381_v33 = vsel %vm462_vm2, %v1376_v31, 0  ;;  %4572 = vmatmul.msk.bf16.vlgmr.msrb.gmra.mxu1 %vm171_vm1, %v1167_v23  ;;  %4575 = vmatmul.msk.bf16.vlgmr.msra.gmra.mxu0 %vm171_vm1, %v1236_v13 }
 0x4a0   :  { %1432 = vmatpush.bf16.msrb.mxu0 %v1423_v25  ;;  %1390 = vmatpush.bf16.msra.mxu2 %v1381_v33 }
 0x4a1   :  { %v5699_v33 = vpop.permute.xlu0 %1570 }
 0x4a4   :  { %1516 = vmatpush.bf16.msra.mxu0 %v1507_v15 }
 0x4a6   :  { %v1355_v35 = vpop.permute.xlu1 %1354 }
 0x4a7   :  { %v1360_v36 = vsel %vm462_vm2, %v1355_v35, 0 }
 0x4a8   :  { %1369 = vmatpush.bf16.msra.mxu1 %v1360_v36 }
 0x4a9   :  { %v5701_v35 = vpop.permute.xlu0 %1568 }
 0x4ac   :  { %1453 = vmatpush.bf16.msrb.mxu1 %v1444_v41  ;;  %v5705_v41 = vpop.permute.xlu2 %1545 }
 0x4ae   :  { %v1460_v34 = vpop.permute.xlu1 %1459 }
 0x4af   :  { %v1465_v46 = vsel %vm462_vm2, %v1460_v34, 0 }
 0x4b0   :  { %1474 = vmatpush.bf16.msrb.mxu2 %v1465_v46 }
 0x4b1   :  { %v5703_v36 = vpop.permute.xlu0 %1524 }
 0x4b6   :  { %v1481_v48 = vpop.permute.xlu1 %1480 }
 0x4b7   :  { %v1486_v18 = vsel %vm462_vm2, %v1481_v48, 0 }
 0x4b8   :  { %1495 = vmatpush.bf16.msrb.mxu3 %v1486_v18 }
 0x4c1   :  { %v5664_v50 = vpop.f32.mrf.mxu0 }
 0x4c9   :  { %v988_v43 = vpop.f32.mrf.mxu0 }
 0x4d5   :  { %v5666_v51 = vpop.f32.mrf.mxu2 }
 0x4d6   :  { %v5668_v53 = vpop.f32.mrf.mxu1 }
 0x4dd   :  { %v946_v54 = vpop.f32.mrf.mxu2 }
 0x4de   :  { %v925_v55 = vpop.f32.mrf.mxu1  ;;  %v5707_v54 = vpop.permute.xlu1 %1547 }
 0x4e4   :  { %v5670_v58 = vpop.f32.mrf.mxu3 }
 0x4e6   :  { %v5672_v57 = vpop.f32.mrf.mxu1 }
 0x4e7   :  { %v5674_v59 = vpop.f32.mrf.mxu0 }
 0x4ec   :  { %v967_v60 = vpop.f32.mrf.mxu3 }
 0x4ee   :  { %v1009_v21 = vpop.f32.mrf.mxu1 }
 0x4ef   :  { %v1072_v61 = vpop.f32.mrf.mxu0 }
 0x4f5   :  { %v5676_v62 = vpop.f32.mrf.mxu2 }
 0x4fd   :  { %v1030_v63 = vpop.f32.mrf.mxu2  ;;  %v5678_v0 = vpop.f32.mrf.mxu3 }
 0x505   :  { %v1051_v2 = vpop.f32.mrf.mxu3  ;;  %v5680_v1 = vpop.f32.mrf.mxu2 }
 0x506   :  { %v1261_v31 = vsel %vm359_vm3, %v5680_v1, -inf }
 0x50c   :  { %v1093_v4 = vpop.f32.mrf.mxu1  ;;  %v1162_v3 = vpop.f32.mrf.mxu0 }
 0x50d   :  { %v1118_v5 = vpop.f32.mrf.mxu2  ;;  %v1139_v6 = vpop.f32.mrf.mxu3  ;;  %v1267_v8 = vsel %vm359_vm3, %v1162_v3, -inf  ;;  %v1258_v10 = vsel %vm359_vm3, %v1093_v4, -inf }
 0x50e   :  { %1268 = vmax.xlane.f32.xlu2 %v1267_v8  ;;  %1259 = vmax.xlane.f32.xlu0 %v1258_v10  ;;  %v1264_v30 = vsel %vm359_vm3, %v1139_v6, -inf }
 0x514   :  { %v1095_v9 = vpop.f32.mrf.mxu1  ;;  %v1164_v12 = vpop.f32.mrf.mxu0 }
 0x515   :  { %v1141_v13 = vpop.f32.mrf.mxu3  ;;  %v5684_v14 = vpop.f32.mrf.mxu2 }
 0x516   :  { %v1273_v15 = vsel %vm359_vm3, %v5684_v14, -inf }
 0x51c   :  { %v1185_v17 = vpop.f32.mrf.mxu1  ;;  %v1254_v11 = vpop.f32.mrf.mxu0 }
 0x51d   :  { %v1210_v19 = vpop.f32.mrf.mxu2  ;;  %v5686_v23 = vpop.f32.mrf.mxu3  ;;  %v1270_v24 = vsel %vm359_vm3, %v1185_v17, -inf  ;;  %v1279_v26 = vsel %vm359_vm3, %v1254_v11, -inf }
 0x51e   :  { %1271 = vmax.xlane.f32.xlu2 %v1270_v24  ;;  %1280 = vmax.xlane.f32.xlu1 %v1279_v26  ;;  %v1276_v22 = vsel %vm359_vm3, %v5686_v23, -inf }
 0x51f   :  { %1277 = vmax.xlane.f32.xlu0 %v1276_v22 }
 0x524   :  { %v1187_v7 = vpop.f32.mrf.mxu1  ;;  %v1256_v28 = vpop.f32.mrf.mxu0 }
 0x525   :  { %v1233_v25 = vpop.f32.mrf.mxu3 }
 0x526   :  { %1265 = vmax.xlane.f32.xlu2 %v1264_v30  ;;  %1262 = vmax.xlane.f32.xlu1 %v1261_v31 }
 0x52e   :  { %1274 = vmax.xlane.f32.xlu1 %v1273_v15 }
 0x547   :  { %1593 = vrot.lane.b32.xlu1 %v5288_v27, %s5178_s26 }
 0x581   :  { %v1260_v34 = vpop.xlane.xlu0 %1259  ;;  %v1269_v46 = vpop.xlane.xlu2 %1268 }
 0x582   :  { %v1282_v48 = vsub.f32 %v1093_v4, %v1260_v34  ;;  %v1285_v43 = vsub.f32 %v1162_v3, %v1269_v46 }
 0x584   :  { %v1290_v18 = vmul.f32 1.442695, %v1282_v48  ;;  %v1296_v55 = vmul.f32 1.442695, %v1285_v43 }
 0x586   :  { %4824 = vpow2.f32 %v1290_v18 }
 0x587   :  { %4826 = vpow2.f32 %v1296_v55 }
 0x58c   :  { %v5709_v60 = vpop.eup %4824 }
 0x58d   :  { %v1306_v21 = vsel %vm359_vm3, %v5709_v60, 0.0  ;;  %v5713_v8 = vpop.eup %4826 }
 0x58e   :  { %1307 = vadd.xlane.f32.xlu2 %v1306_v21  ;;  %v1315_v3 = vsel %vm359_vm3, %v5713_v8, 0.0 }
 0x591   :  { %v1272_v61 = vpop.xlane.xlu2 %1271  ;;  %v1281_v63 = vpop.xlane.xlu1 %1280 }
 0x592   :  { %v1286_v2 = vsub.f32 %v1185_v17, %v1272_v61  ;;  %v1289_v5 = vsub.f32 %v1254_v11, %v1281_v63  ;;  %v1278_v30 = vpop.xlane.xlu0 %1277 }
 0x593   :  { %v1288_v31 = vsub.f32 %v5686_v23, %v1278_v30 }
 0x594   :  { %v1298_v4 = vmul.f32 1.442695, %v1286_v2  ;;  %v1304_v10 = vmul.f32 1.442695, %v1289_v5 }
 0x595   :  { %v1302_v46 = vmul.f32 1.442695, %v1288_v31 }
 0x596   :  { %4828 = vpow2.f32 %v1298_v4  ;;  %1316 = vadd.xlane.f32.xlu2 %v1315_v3  ;;  %v1530_v4 = vsel %vm171_vm1, %v5703_v36, 0 }
 0x597   :  { %4830 = vpow2.f32 %v1304_v10 }
 0x599   :  { %v1266_v9 = vpop.xlane.xlu2 %1265  ;;  %v1263_v12 = vpop.xlane.xlu1 %1262 }
 0x59a   :  { %v1284_v13 = vsub.f32 %v1139_v6, %v1266_v9  ;;  %v1283_v19 = vsub.f32 %v5680_v1, %v1263_v12 }
 0x59c   :  { %v5718_v24 = vpop.eup %4828  ;;  %v1294_v26 = vmul.f32 1.442695, %v1284_v13  ;;  %v1292_v17 = vmul.f32 1.442695, %v1283_v19 }
 0x59d   :  { %v5720_v11 = vpop.eup %4830  ;;  %v1318_v22 = vsel %vm359_vm3, %v5718_v24, 0.0 }
 0x59e   :  { %4832 = vpow2.f32 %v1294_v26  ;;  %1319 = vadd.xlane.f32.xlu1 %v1318_v22  ;;  %v1327_v7 = vsel %vm359_vm3, %v5720_v11, 0.0 }
 0x59f   :  { %4834 = vpow2.f32 %v1292_v17  ;;  %1328 = vadd.xlane.f32.xlu2 %v1327_v7 }
 0x5a0   :  { %4836 = vpow2.f32 %v1302_v46  ;;  %v1553_v46 = vsel %vm171_vm1, %v5707_v54, 0 }
 0x5a1   :  { %v1275_v15 = vpop.xlane.xlu1 %1274 }
 0x5a2   :  { %v1287_v34 = vsub.f32 %v5684_v14, %v1275_v15 }
 0x5a4   :  { %v5726_v28 = vpop.eup %4832  ;;  %v1300_v48 = vmul.f32 1.442695, %v1287_v34 }
 0x5a5   :  { %v5728_v6 = vpop.eup %4834  ;;  %v1312_v1 = vsel %vm359_vm3, %v5726_v28, 0.0 }
 0x5a6   :  { %v1309_v25 = vsel %vm359_vm3, %v5728_v6, 0.0  ;;  %4838 = vpow2.f32 %v1300_v48  ;;  %v5746_v18 = vpop.eup %4836 }
 0x5a7   :  { %1310 = vadd.xlane.f32.xlu0 %v1309_v25  ;;  %1313 = vadd.xlane.f32.xlu2 %v1312_v1  ;;  %v1324_v55 = vsel %vm359_vm3, %v5746_v18, 0.0 }
 0x5ac   :  { %v5748_v43 = vpop.eup %4838 }
 0x5ad   :  { %v1321_v21 = vsel %vm359_vm3, %v5748_v43, 0.0 }
 0x5b7   :  { %1522 = vrot.lane.b32.xlu1 %v5274_v16, %s5177_s25 }
 0x5b9   :  { %v1594_v61 = vpop.permute.xlu1 %1593 }
 0x5ba   :  { %v1599_v13 = vsel %vm171_vm1, %v1594_v61, 0 }
 0x5bb   :  { %1639 = vrot.lane.b32.xlu0 %v5297_v32, %s5178_s26 }
 0x5bf   :  { %1662 = vrot.lane.b32.xlu2 %v5311_v38, %s5178_s26  ;;  %1660 = vrot.lane.b32.xlu1 %v5311_v38, %s5177_s25 }
 0x5c7   :  { %1614 = vrot.lane.b32.xlu1 %v5309_v37, %s5177_s25 }
 0x5e5   :  { %1325 = vadd.xlane.f32.xlu0 %v1324_v55 }
 0x5e8   :  { %1322 = vadd.xlane.f32.xlu2 %v1321_v21 }
 0x5f9   :  { %1591 = vrot.lane.b32.xlu0 %v5288_v27, %s5177_s25 }
 0x600   :  { %1637 = vrot.lane.b32.xlu2 %v5297_v32, %s5177_s25 }
 0x601   :  { %1616 = vrot.lane.b32.xlu0 %v5309_v37, %s5178_s26  ;;  %v1308_v14 = vpop.xlane.xlu2 %1307 }
 0x602   :  { %4840 = vrcp.f32 %v1308_v14 }
 0x608   :  { %1685 = vrot.lane.b32.xlu2 %v5320_v40, %s5178_s26  ;;  %v4841_v23 = vpop.eup %4840 }
 0x609   :  { %1683 = vrot.lane.b32.xlu0 %v5320_v40, %s5177_s25  ;;  %v1338_v63 = vmul.f32 %v4841_v23, %v5709_v60  ;;  %v1317_v2 = vpop.xlane.xlu2 %1316 }
 0x60a   :  { %4842 = vrcp.f32 %v1317_v2 }
 0x60b   :  { %v1346_v5 = vpack.c.bf16 %v1338_v63, %v1338_v63 }
 0x60d   :  { %4576 = vmatmul.msk.bf16.vlgmr.msra.gmra.mxu1 %vm458_vm4, %v1346_v5 }
 0x60e   :  { %1539 = vmatpush.bf16.xpose.msra.mxu1 %v1530_v4 }
 0x610   :  { %1823 = vrot.lane.b32.xlu2 %v5279_v20, %s5179_s27  ;;  %v4843_v10 = vpop.eup %4842 }
 0x611   :  { %v1320_v3 = vpop.xlane.xlu1 %1319  ;;  %v1341_v9 = vmul.f32 %v4843_v10, %v5713_v8 }
 0x612   :  { %4844 = vrcp.f32 %v1320_v3  ;;  %v1329_v12 = vpop.xlane.xlu2 %1328 }
 0x613   :  { %v1349_v60 = vpack.c.bf16 %v1341_v9, %v1341_v9  ;;  %4846 = vrcp.f32 %v1329_v12 }
 0x615   :  { %4579 = vmatmul.msk.bf16.vlgmr.msrb.gmra.mxu0 %vm458_vm4, %v1349_v60 }
 0x616   :  { %1608 = vmatpush.bf16.xpose.msrb.mxu0 %v1599_v13 }
 0x618   :  { %v4845_v36 = vpop.eup %4844 }
 0x619   :  { %v1342_v19 = vmul.f32 %v4845_v36, %v5718_v24  ;;  %v4847_v20 = vpop.eup %4846  ;;  %v1576_v24 = vsel %vm171_vm1, %v5699_v33, 0 }
 0x61a   :  { %v1314_v26 = vpop.xlane.xlu2 %1313  ;;  %v1311_v17 = vpop.xlane.xlu0 %1310  ;;  %v1345_v8 = vmul.f32 %v4847_v20, %v5720_v11 }
 0x61b   :  { %v1350_v22 = vpack.c.bf16 %v1342_v19, %v1342_v19  ;;  %4848 = vrcp.f32 %v1314_v26 }
 0x61c   :  { %4850 = vrcp.f32 %v1311_v17  ;;  %v1353_v31 = vpack.c.bf16 %v1345_v8, %v1345_v8 }
 0x61d   :  { %4580 = vmatmul.msk.bf16.vlgmr.msrb.gmra.mxu1 %vm458_vm4, %v1350_v22 }
 0x621   :  { %v4849_v7 = vpop.eup %4848 }
 0x622   :  { %v4851_v1 = vpop.eup %4850  ;;  %v1340_v25 = vmul.f32 %v4849_v7, %v5726_v28 }
 0x623   :  { %v1339_v30 = vmul.f32 %v4851_v1, %v5728_v6  ;;  %v1663_v6 = vpop.permute.xlu2 %1662 }
 0x624   :  { %v1348_v15 = vpack.c.bf16 %v1340_v25, %v1340_v25  ;;  %v1668_v63 = vsel %vm171_vm1, %v1663_v6, 0 }
 0x625   :  { %v1347_v34 = vpack.c.bf16 %v1339_v30, %v1339_v30  ;;  %4583 = vmatmul.msk.bf16.vlgmr.msra.gmra.mxu0 %vm458_vm4, %v1353_v31 }
 0x626   :  { %4578 = vmatmul.msk.bf16.vlgmr.msra.gmra.mxu3 %vm458_vm4, %v1348_v15 }
 0x627   :  { %4577 = vmatmul.msk.bf16.vlgmr.msra.gmra.mxu2 %vm458_vm4, %v1347_v34  ;;  %1585 = vmatpush.bf16.xpose.msra.mxu3 %v1576_v24 }
 0x628   :  { %1562 = vmatpush.bf16.xpose.msra.mxu2 %v1553_v46 }
 0x629   :  { %v1523_v11 = vpop.permute.xlu1 %1522 }
 0x62d   :  { %4584 = vmatmul.msk.bf16.vlgmr.msra.gmra.mxu1 %vm171_vm1, %v1523_v11  ;;  %v1640_v28 = vpop.permute.xlu0 %1639 }
 0x62e   :  { %v1645_v5 = vsel %vm171_vm1, %v1640_v28, 0 }
 0x658   :  { %v1326_v48 = vpop.xlane.xlu0 %1325 }
 0x659   :  { %4852 = vrcp.f32 %v1326_v48 }
 0x65b   :  { %v1323_v55 = vpop.xlane.xlu2 %1322 }
 0x65c   :  { %4854 = vrcp.f32 %v1323_v55 }
 0x65f   :  { %v4853_v33 = vpop.eup %4852 }
 0x660   :  { %v1344_v21 = vmul.f32 %v4853_v33, %v5746_v18 }
 0x662   :  { %v4855_v14 = vpop.eup %4854  ;;  %v1352_v23 = vpack.c.bf16 %v1344_v21, %v1344_v21 }
 0x663   :  { %v1343_v54 = vmul.f32 %v4855_v14, %v5748_v43  ;;  %v1638_v61 = vpop.permute.xlu2 %1637  ;;  %v1661_v43 = vpop.permute.xlu1 %1660 }
 0x664   :  { %4582 = vmatmul.msk.bf16.vlgmr.msrb.gmra.mxu3 %vm458_vm4, %v1352_v23 }
 0x665   :  { %v1351_v2 = vpack.c.bf16 %v1343_v54, %v1343_v54  ;;  %1677 = vmatpush.bf16.xpose.msrb.mxu3 %v1668_v63 }
 0x667   :  { %4581 = vmatmul.msk.bf16.vlgmr.msrb.gmra.mxu2 %vm458_vm4, %v1351_v2 }
 0x668   :  { %1654 = vmatpush.bf16.xpose.msrb.mxu2 %v1645_v5 }
 0x66b   :  { %v1686_v4 = vpop.permute.xlu2 %1685  ;;  %v1592_v10 = vpop.permute.xlu0 %1591 }
 0x66c   :  { %v1691_v18 = vsel %vm171_vm1, %v1686_v4, 0  ;;  %4587 = vmatmul.msk.bf16.vlgmr.msrb.gmra.mxu0 %vm171_vm1, %v1592_v10  ;;  %v1615_v13 = vpop.permute.xlu1 %1614 }
 0x66d   :  { %1700 = vmatpush.bf16.xpose.msra.mxu0 %v1691_v18 }
 0x673   :  { %v1617_v3 = vpop.permute.xlu0 %1616  ;;  %v1824_v9 = vpop.permute.xlu2 %1823 }
 0x674   :  { %v1622_v12 = vsel %vm171_vm1, %v1617_v3, 0  ;;  %4586 = vmatmul.msk.bf16.vlgmr.msra.gmra.mxu3 %vm171_vm1, %v5701_v35  ;;  %v1829_v60 = vsel %vm462_vm2, %v1824_v9, 0 }
 0x675   :  { %1631 = vmatpush.bf16.xpose.msrb.mxu1 %v1622_v12 }
 0x677   :  { %4585 = vmatmul.msk.bf16.vlgmr.msra.gmra.mxu2 %vm171_vm1, %v5705_v41 }
 0x678   :  { %1838 = vmatpush.bf16.msra.mxu2 %v1829_v60 }
 0x67b   :  { %v1684_v36 = vpop.permute.xlu0 %1683 }
 0x67c   :  { %4588 = vmatmul.msk.bf16.vlgmr.msrb.gmra.mxu1 %vm171_vm1, %v1615_v13  ;;  %4591 = vmatmul.msk.bf16.vlgmr.msra.gmra.mxu0 %vm171_vm1, %v1684_v36 }
 0x684   :  { %4590 = vmatmul.msk.bf16.vlgmr.msrb.gmra.mxu3 %vm171_vm1, %v1661_v43 }
 0x687   :  { %4589 = vmatmul.msk.bf16.vlgmr.msrb.gmra.mxu2 %vm171_vm1, %v1638_v61 }
 0x68a   :  { %v5804_v19 = vpop.f32.mrf.mxu1 }
 0x692   :  { %v1373_v35 = vpop.f32.mrf.mxu1  ;;  %v5806_v26 = vpop.f32.mrf.mxu0 }
 0x69a   :  { %v1436_v17 = vpop.f32.mrf.mxu0  ;;  %v5808_v22 = vpop.f32.mrf.mxu1 }
 0x6a2   :  { %v1457_v41 = vpop.f32.mrf.mxu1  ;;  %v5810_v20 = vpop.f32.mrf.mxu0 }
 0x6a9   :  { %v5812_v8 = vpop.f32.mrf.mxu3 }
 0x6aa   :  { %v5814_v7 = vpop.f32.mrf.mxu2  ;;  %v1520_v1 = vpop.f32.mrf.mxu0 }
 0x6ab   :  { %v1541_v25 = vpop.f32.mrf.mxu1 }
 0x6ac   :  { %v1706_v30 = vsel %vm359_vm3, %v1541_v25, -inf }
 0x6ad   :  { %1707 = vmax.xlane.f32.xlu0 %v1706_v30 }
 0x6b1   :  { %v1415_v31 = vpop.f32.mrf.mxu3 }
 0x6b2   :  { %v1394_v15 = vpop.f32.mrf.mxu2 }
 0x6b3   :  { %v1543_v34 = vpop.f32.mrf.mxu1 }
 0x6c1   :  { %1802 = vrot.lane.b32.xlu0 %v5274_v16, %s5179_s27 }
 0x6e7   :  { %v5819_v24 = vpop.f32.mrf.mxu3 }
 0x6e9   :  { %v1610_v46 = vpop.f32.mrf.mxu0 }
 0x6ea   :  { %v5821_v11 = vpop.f32.mrf.mxu2  ;;  %v1715_v28 = vsel %vm359_vm3, %v1610_v46, -inf }
 0x6eb   :  { %1716 = vmax.xlane.f32.xlu2 %v1715_v28 }
 0x6ef   :  { %v1499_v6 = vpop.f32.mrf.mxu3 }
 0x6f1   :  { %v1612_v48 = vpop.f32.mrf.mxu0 }
 0x6f2   :  { %v1478_v55 = vpop.f32.mrf.mxu2 }
 0x6f7   :  { %v1587_v33 = vpop.f32.mrf.mxu3 }
 0x6f8   :  { %v1712_v10 = vsel %vm359_vm3, %v1587_v33, -inf }
 0x6f9   :  { %v1633_v21 = vpop.f32.mrf.mxu1  ;;  %v1702_v14 = vpop.f32.mrf.mxu0 }
 0x6fa   :  { %v1564_v23 = vpop.f32.mrf.mxu2  ;;  %v1718_v54 = vsel %vm359_vm3, %v1633_v21, -inf  ;;  %v1727_v61 = vsel %vm359_vm3, %v1702_v14, -inf }
 0x6fb   :  { %1719 = vmax.xlane.f32.xlu2 %v1718_v54  ;;  %1728 = vmax.xlane.f32.xlu1 %v1727_v61  ;;  %v1709_v4 = vsel %vm359_vm3, %v1564_v23, -inf }
 0x6ff   :  { %v1589_v16 = vpop.f32.mrf.mxu3 }
 0x701   :  { %v1635_v63 = vpop.f32.mrf.mxu1  ;;  %v1704_v2 = vpop.f32.mrf.mxu0 }
 0x702   :  { %v1566_v5 = vpop.f32.mrf.mxu2 }
 0x703   :  { %1710 = vmax.xlane.f32.xlu2 %v1709_v4  ;;  %1713 = vmax.xlane.f32.xlu1 %v1712_v10 }
 0x707   :  { %v1679_v18 = vpop.f32.mrf.mxu3 }
 0x708   :  { %v1724_v43 = vsel %vm359_vm3, %v1679_v18, -inf }
 0x709   :  { %1725 = vmax.xlane.f32.xlu0 %v1724_v43 }
 0x70a   :  { %v1656_v3 = vpop.f32.mrf.mxu2 }
 0x70b   :  { %v1721_v9 = vsel %vm359_vm3, %v1656_v3, -inf }
 0x70c   :  { %1722 = vmax.xlane.f32.xlu1 %v1721_v9 }
 0x70f   :  { %v1681_v12 = vpop.f32.mrf.mxu3 }
 0x712   :  { %v1658_v60 = vpop.f32.mrf.mxu2 }
 0x71b   :  { %1865 = vrot.lane.b32.xlu2 %v5288_v27, %s5179_s27 }
 0x720   :  { %v1708_v13 = vpop.xlane.xlu0 %1707 }
 0x721   :  { %v1730_v17 = vsub.f32 %v1541_v25, %v1708_v13 }
 0x723   :  { %v1738_v41 = vmul.f32 1.442695, %v1730_v17 }
 0x725   :  { %1844 = vrot.lane.b32.xlu1 %v5291_v29, %s5179_s27  ;;  %4856 = vpow2.f32 %v1738_v41 }
 0x72b   :  { %v5835_v1 = vpop.eup %4856 }
 0x72c   :  { %v1754_v30 = vsel %vm359_vm3, %v5835_v1, 0.0 }
 0x733   :  { %v1803_v36 = vpop.permute.xlu0 %1802 }
 0x734   :  { %v1808_v35 = vsel %vm462_vm2, %v1803_v36, 0 }
 0x735   :  { %1817 = vmatpush.bf16.msra.mxu1 %v1808_v35 }
 0x74f   :  { %1755 = vadd.xlane.f32.xlu1 %v1754_v30 }
 0x75e   :  { %v1717_v31 = vpop.xlane.xlu2 %1716 }
 0x75f   :  { %v1733_v15 = vsub.f32 %v1610_v46, %v1717_v31 }
 0x761   :  { %v1744_v27 = vmul.f32 1.442695, %v1733_v15 }
 0x763   :  { %4858 = vpow2.f32 %v1744_v27 }
 0x769   :  { %v5839_v34 = vpop.eup %4858 }
 0x76a   :  { %v1763_v29 = vsel %vm359_vm3, %v5839_v34, 0.0 }
 0x76b   :  { %1764 = vadd.xlane.f32.xlu0 %v1763_v29 }
 0x76e   :  { %v1720_v28 = vpop.xlane.xlu2 %1719  ;;  %v1729_v25 = vpop.xlane.xlu1 %1728 }
 0x76f   :  { %v1734_v6 = vsub.f32 %v1633_v21, %v1720_v28  ;;  %v1737_v48 = vsub.f32 %v1702_v14, %v1729_v25 }
 0x771   :  { %v1746_v55 = vmul.f32 1.442695, %v1734_v6  ;;  %v1752_v54 = vmul.f32 1.442695, %v1737_v48 }
 0x773   :  { %4860 = vpow2.f32 %v1746_v55 }
 0x774   :  { %4862 = vpow2.f32 %v1752_v54 }
 0x776   :  { %v1711_v61 = vpop.xlane.xlu2 %1710  ;;  %v1714_v16 = vpop.xlane.xlu1 %1713 }
 0x777   :  { %v1731_v63 = vsub.f32 %v1564_v23, %v1711_v61  ;;  %v1732_v46 = vsub.f32 %v1587_v33, %v1714_v16 }
 0x779   :  { %v5843_v2 = vpop.eup %4860  ;;  %v1740_v5 = vmul.f32 1.442695, %v1731_v63  ;;  %v1742_v4 = vmul.f32 1.442695, %v1732_v46 }
 0x77a   :  { %v5845_v10 = vpop.eup %4862  ;;  %v1766_v43 = vsel %vm359_vm3, %v5843_v2, 0.0 }
 0x77b   :  { %4864 = vpow2.f32 %v1740_v5  ;;  %1767 = vadd.xlane.f32.xlu2 %v1766_v43  ;;  %v1775_v21 = vsel %vm359_vm3, %v5845_v10, 0.0 }
 0x77c   :  { %4866 = vpow2.f32 %v1742_v4  ;;  %1776 = vadd.xlane.f32.xlu0 %v1775_v21  ;;  %v1726_v14 = vpop.xlane.xlu0 %1725 }
 0x77d   :  { %v1736_v9 = vsub.f32 %v1679_v18, %v1726_v14 }
 0x77e   :  { %v1866_v23 = vpop.permute.xlu2 %1865 }
 0x77f   :  { %v1750_v33 = vmul.f32 1.442695, %v1736_v9  ;;  %v1871_v12 = vsel %vm462_vm2, %v1866_v23, 0  ;;  %v1723_v60 = vpop.xlane.xlu1 %1722 }
 0x780   :  { %v1735_v13 = vsub.f32 %v1656_v3, %v1723_v60  ;;  %1880 = vmatpush.bf16.msrb.mxu0 %v1871_v12 }
 0x781   :  { %v4865_v36 = vpop.eup %4864  ;;  %4868 = vpow2.f32 %v1750_v33 }
 0x782   :  { %v4867_v35 = vpop.eup %4866  ;;  %v1748_v17 = vmul.f32 1.442695, %v1735_v13  ;;  %v1757_v41 = vsel %vm359_vm3, %v4865_v36, 0.0 }
 0x783   :  { %v1760_v30 = vsel %vm359_vm3, %v4867_v35, 0.0 }
 0x784   :  { %4870 = vpow2.f32 %v1748_v17  ;;  %1758 = vadd.xlane.f32.xlu0 %v1757_v41  ;;  %1761 = vadd.xlane.f32.xlu2 %v1760_v30 }
 0x787   :  { %v5854_v31 = vpop.eup %4868 }
 0x788   :  { %v1772_v18 = vsel %vm359_vm3, %v5854_v31, 0.0 }
 0x789   :  { %1773 = vadd.xlane.f32.xlu1 %v1772_v18 }
 0x78a   :  { %v5858_v15 = vpop.eup %4870 }
 0x78b   :  { %v1769_v3 = vsel %vm359_vm3, %v5858_v15, 0.0 }
 0x78c   :  { %1770 = vadd.xlane.f32.xlu0 %v1769_v3 }
 0x797   :  { %v1845_v27 = vpop.permute.xlu1 %1844 }
 0x798   :  { %v1850_v29 = vsel %vm462_vm2, %v1845_v27, 0 }
 0x799   :  { %1859 = vmatpush.bf16.msra.mxu3 %v1850_v29 }
 0x79c   :  { %1928 = vrot.lane.b32.xlu2 %v5311_v38, %s5179_s27 }
 0x7a0   :  { %1886 = vrot.lane.b32.xlu0 %v5309_v37, %s5179_s27 }
 0x7a2   :  { %1907 = vrot.lane.b32.xlu1 %v5297_v32, %s5179_s27 }
 0x7a4   :  { %1980 = vrot.lane.b32.xlu2 %v5666_v51, %s5167_s4 }
 0x7a8   :  { %1949 = vrot.lane.b32.xlu0 %v5320_v40, %s5179_s27 }
 0x7aa   :  { %1978 = vrot.lane.b32.xlu1 %v5668_v53, %s5167_s4 }
 0x7ac   :  { %1986 = vrot.lane.b32.xlu2 %v5672_v57, %s5167_s4 }
 0x7b0   :  { %1982 = vrot.lane.b32.xlu0 %v5670_v58, %s5167_s4 }
 0x7b2   :  { %1984 = vrot.lane.b32.xlu1 %v5664_v50, %s5167_s4 }
 0x7b4   :  { %1992 = vrot.lane.b32.xlu2 %v5674_v59, %s5167_s4 }
 0x7b8   :  { %1988 = vrot.lane.b32.xlu0 %v5676_v62, %s5167_s4 }
 0x7ba   :  { %1990 = vrot.lane.b32.xlu1 %v5678_v0, %s5167_s4 }
 0x7bc   :  { %2014 = vrot.lane.b32.xlu2 %v5812_v8, %s5180_s28 }
 0x7c0   :  { %2010 = vrot.lane.b32.xlu0 %v5804_v19, %s5180_s28 }
 0x7c2   :  { %v1756_v32 = vpop.xlane.xlu1 %1755  ;;  %2012 = vrot.lane.b32.xlu1 %v5814_v7, %s5180_s28 }
 0x7c3   :  { %4872 = vrcp.f32 %v1756_v32 }
 0x7c4   :  { %2020 = vrot.lane.b32.xlu2 %v5821_v11, %s5180_s28 }
 0x7c8   :  { %2016 = vrot.lane.b32.xlu0 %v5806_v26, %s5180_s28 }
 0x7c9   :  { %v4873_v37 = vpop.eup %4872 }
 0x7ca   :  { %v1786_v38 = vmul.f32 %v4873_v37, %v5835_v1  ;;  %2018 = vrot.lane.b32.xlu1 %v5808_v22, %s5180_s28 }
 0x7cc   :  { %v1794_v40 = vpack.c.bf16 %v1786_v38, %v1786_v38 }
 0x7ce   :  { %4592 = vmatmul.msk.bf16.vlgmr.msra.gmra.mxu1 %vm458_vm4, %v1794_v40 }
 0x7d0   :  { %2022 = vrot.lane.b32.xlu0 %v5819_v24, %s5180_s28 }
 0x7d2   :  { %2024 = vrot.lane.b32.xlu1 %v5810_v20, %s5180_s28 }
 0x7de   :  { %v1765_v50 = vpop.xlane.xlu0 %1764 }
 0x7df   :  { %4874 = vrcp.f32 %v1765_v50 }
 0x7e5   :  { %v4875_v51 = vpop.eup %4874 }
 0x7e6   :  { %v1789_v53 = vmul.f32 %v4875_v51, %v5839_v34 }
 0x7e8   :  { %v1797_v58 = vpack.c.bf16 %v1789_v53, %v1789_v53 }
 0x7ea   :  { %4595 = vmatmul.msk.bf16.vlgmr.msrb.gmra.mxu0 %vm458_vm4, %v1797_v58 }
 0x7ee   :  { %v1768_v57 = vpop.xlane.xlu2 %1767 }
 0x7ef   :  { %v1777_v59 = vpop.xlane.xlu0 %1776 }
 0x7f7   :  { %v1762_v62 = vpop.xlane.xlu2 %1761  ;;  %v1759_v0 = vpop.xlane.xlu0 %1758 }
 0x7f8   :  { %4876 = vrcp.f32 %v1762_v62 }
 0x7f9   :  { %4878 = vrcp.f32 %v1759_v0 }
 0x7fc   :  { %v1774_v11 = vpop.xlane.xlu1 %1773 }
 0x7fd   :  { %4880 = vrcp.f32 %v1774_v11 }
 0x7fe   :  { %v4877_v19 = vpop.eup %4876  ;;  %4882 = vrcp.f32 %v1768_v57 }
 0x7ff   :  { %v4879_v26 = vpop.eup %4878  ;;  %v1788_v22 = vmul.f32 %v4877_v19, %v4867_v35  ;;  %v1929_v8 = vpop.permute.xlu2 %1928 }
 0x800   :  { %v1787_v7 = vmul.f32 %v4879_v26, %v4865_v36  ;;  %v1934_v20 = vsel %vm462_vm2, %v1929_v8, 0  ;;  %v1771_v34 = vpop.xlane.xlu0 %1770 }
 0x801   :  { %v1796_v24 = vpack.c.bf16 %v1788_v22, %v1788_v22  ;;  %1943 = vmatpush.bf16.msrb.mxu3 %v1934_v20  ;;  %4884 = vrcp.f32 %v1771_v34 }
 0x802   :  { %v1795_v1 = vpack.c.bf16 %v1787_v7, %v1787_v7  ;;  %4886 = vrcp.f32 %v1777_v59 }
 0x803   :  { %4594 = vmatmul.msk.bf16.vlgmr.msra.gmra.mxu3 %vm458_vm4, %v1796_v24  ;;  %v4881_v28 = vpop.eup %4880 }
 0x804   :  { %4593 = vmatmul.msk.bf16.vlgmr.msra.gmra.mxu2 %vm458_vm4, %v1795_v1  ;;  %v1792_v25 = vmul.f32 %v4881_v28, %v5854_v31  ;;  %v4883_v6 = vpop.eup %4882 }
 0x805   :  { %v1790_v55 = vmul.f32 %v4883_v6, %v5843_v2 }
 0x806   :  { %v1800_v54 = vpack.c.bf16 %v1792_v25, %v1792_v25 }
 0x807   :  { %v4885_v48 = vpop.eup %4884  ;;  %v1798_v5 = vpack.c.bf16 %v1790_v55, %v1790_v55  ;;  %v5923_v36 = vpop.permute.xlu2 %1980 }
 0x808   :  { %v1791_v16 = vmul.f32 %v4885_v48, %v5858_v15  ;;  %v4887_v43 = vpop.eup %4886 }
 0x809   :  { %v1793_v2 = vmul.f32 %v4887_v43, %v5845_v10 }
 0x80a   :  { %v1799_v21 = vpack.c.bf16 %v1791_v16, %v1791_v16  ;;  %v4725_v16 = vld [vmem:[#allocation5 + $0x8] sm:$0xff] }
 0x80b   :  { %v1801_v23 = vpack.c.bf16 %v1793_v2, %v1793_v2 }
 0x80f   :  { %v1987_v10 = vpop.permute.xlu2 %1986 }
 0x812   :  { %v1887_v61 = vpop.permute.xlu0 %1886 }
 0x813   :  { %4598 = vmatmul.msk.bf16.vlgmr.msrb.gmra.mxu3 %vm458_vm4, %v1800_v54  ;;  %v1892_v63 = vsel %vm462_vm2, %v1887_v61, 0 }
 0x814   :  { %v1908_v46 = vpop.permute.xlu1 %1907  ;;  %1901 = vmatpush.bf16.msrb.mxu1 %v1892_v63 }
 0x815   :  { %v1913_v4 = vsel %vm462_vm2, %v1908_v46, 0  ;;  %v4724_v46 = vld [vmem:[#allocation5] sm:$0xff] }
 0x816   :  { %1922 = vmatpush.bf16.msrb.mxu2 %v1913_v4 }
 0x817   :  { %4596 = vmatmul.msk.bf16.vlgmr.msrb.gmra.mxu1 %vm458_vm4, %v1798_v5  ;;  %v5926_v41 = vpop.permute.xlu2 %1992 }
 0x818   :  { %2142 = vmatpush.bf16.msra.mxu1 %v4725_v16  ;;  %v99_v16 = vld [vmem:[#allocation2] sm:$0xff] }
 0x819   :  { %4597 = vmatmul.msk.bf16.vlgmr.msrb.gmra.mxu2 %vm458_vm4, %v1799_v21  ;;  %v2067_v21 = vsel %vm171_vm1, %v5510_v44, %v5923_v36 }
 0x81a   :  { %v1950_v14 = vpop.permute.xlu0 %1949 }
 0x81b   :  { %v1955_v9 = vsel %vm462_vm2, %v1950_v14, 0 }
 0x81c   :  { %1964 = vmatpush.bf16.msra.mxu0 %v1955_v9  ;;  %v1979_v51 = vpop.permute.xlu1 %1978  ;;  %2143 = vmatpush.bf16.msra.mxu1 %v4724_v46 }
 0x81d   :  { %v2066_v57 = vsel %vm171_vm1, %v5506_v39, %v1979_v51 }
 0x81f   :  { %4599 = vmatmul.msk.bf16.vlgmr.msra.gmra.mxu0 %vm458_vm4, %v1801_v23  ;;  %v2015_v15 = vpop.permute.xlu2 %2014 }
 0x822   :  { %v1983_v31 = vpop.permute.xlu0 %1982 }
 0x824   :  { %v1985_v26 = vpop.permute.xlu1 %1984 }
 0x825   :  { %v2069_v8 = vsel %vm171_vm1, %v5508_v42, %v1985_v26  ;;  %v2068_v42 = vsel %vm171_vm1, %v5514_v47, %v1983_v31 }
 0x826   :  { %v2077_v61 = vsel %vm2074_vm6, %v2068_v42, %v2015_v15 }
 0x827   :  { %v2021_v40 = vpop.permute.xlu2 %2020 }
 0x82a   :  { %v1989_v29 = vpop.permute.xlu0 %1988 }
 0x82b   :  { %v2071_v47 = vsel %vm171_vm1, %v5518_v52, %v1989_v29  ;;  %v2073_v52 = vsel %vm171_vm1, %v5516_v49, %v5926_v41  ;;  %v5030_v49 = vld [vmem:[%s6802_s0] sm:$0xff] }
 0x82c   :  { %v1991_v24 = vpop.permute.xlu1 %1990  ;;  %v2080_v9 = vsel %vm2074_vm6, %v2071_v47, %v2021_v40 }
 0x82d   :  { %v2072_v28 = vsel %vm171_vm1, %v5521_v56, %v1991_v24  ;;  %v2070_v56 = vsel %vm171_vm1, %v5512_v45, %v1987_v10 }
 0x832   :  { %v2011_v53 = vpop.permute.xlu0 %2010 }
 0x833   :  { %v2075_v62 = vsel %vm2074_vm6, %v2066_v57, %v2011_v53  ;;  %v4726_v53 = vld [vmem:[%s6804_s2 + $0x10] sm:$0xff] }
 0x834   :  { %v2013_v11 = vpop.permute.xlu1 %2012 }
 0x835   :  { %v2076_v2 = vsel %vm2074_vm6, %v2067_v21, %v2013_v11  ;;  %v5032_v11 = vld [vmem:[%s6805_s3] sm:$0x3] }
 0x83a   :  { %v2017_v22 = vpop.permute.xlu0 %2016 }
 0x83b   :  { %v2078_v7 = vsel %vm2074_vm6, %v2069_v8, %v2017_v22 }
 0x83c   :  { %v2019_v1 = vpop.permute.xlu1 %2018 }
 0x83d   :  { %v2079_v5 = vsel %vm2074_vm6, %v2070_v56, %v2019_v1  ;;  %v5995_v1 = vperm.slane %v5032_v11, 1 }
 0x842   :  { %v2023_v34 = vpop.permute.xlu0 %2022 }
 0x843   :  { %v2081_v25 = vsel %vm2074_vm6, %v2072_v28, %v2023_v34 }
 0x844   :  { %v2025_v6 = vpop.permute.xlu1 %2024 }
 0x84b   :  { %v1819_v33 = vpop.f32.mrf.mxu1 }
 0x84c   :  { %2042 = vrot.lane.b32.xlu2 %v1819_v33, %s5181_s29 }
 0x853   :  { %v1821_v12 = vpop.f32.mrf.mxu1 }
 0x854   :  { %v2082_v12 = vsel %vm2074_vm6, %v2073_v52, %v2025_v6 }
 0x867   :  { %v1882_v60 = vpop.f32.mrf.mxu0 }
 0x868   :  { %2048 = vrot.lane.b32.xlu2 %v1882_v60, %s5181_s29 }
 0x86f   :  { %v1884_v13 = vpop.f32.mrf.mxu0 }
 0x886   :  { %v1861_v35 = vpop.f32.mrf.mxu3 }
 0x887   :  { %v1840_v17 = vpop.f32.mrf.mxu2  ;;  %2046 = vrot.lane.b32.xlu1 %v1861_v35, %s5181_s29  ;;  %v5968_v35 = vld [vmem:[#allocation7] sm:$0xff] }
 0x88e   :  { %v1863_v30 = vpop.f32.mrf.mxu3 }
 0x88f   :  { %v1842_v18 = vpop.f32.mrf.mxu2 }
 0x894   :  { %v1903_v3 = vpop.f32.mrf.mxu1 }
 0x895   :  { %2050 = vrot.lane.b32.xlu0 %v1903_v3, %s5181_s29 }
 0x896   :  { %v1945_v27 = vpop.f32.mrf.mxu3 }
 0x897   :  { %2054 = vrot.lane.b32.xlu2 %v1945_v27, %s5181_s29  ;;  %v5031_v27 = vld [vmem:[%s6802_s0 + $0x8] sm:$0xff] }
 0x89c   :  { %v1905_v32 = vpop.f32.mrf.mxu1  ;;  %v1924_v37 = vpop.f32.mrf.mxu2 }
 0x89d   :  { %v1966_v38 = vpop.f32.mrf.mxu0  ;;  %2052 = vrot.lane.b32.xlu1 %v1924_v37, %s5181_s29  ;;  %2044 = vrot.lane.b32.xlu0 %v1840_v17, %s5181_s29  ;;  %v2120_v17 = vperm.slane %v5968_v35, 0  ;;  %v5182_v37 = vmov 32.0  }
 0x89e   :  { %v1947_v50 = vpop.f32.mrf.mxu3  ;;  %4888 = vrcp.f32 %v5182_v37 }
 0x89f   :  { %v4727_v50 = vld [vmem:[%s6804_s2 + $0x18] sm:$0xff] }
 0x8a0   :  { %2242 = vmatpush.bf16.msra.mxu2 %v4727_v50 }
 0x8a4   :  { %v1926_v58 = vpop.f32.mrf.mxu2  ;;  %2243 = vmatpush.bf16.msra.mxu2 %v4726_v53 }
 0x8a5   :  { %v1968_v59 = vpop.f32.mrf.mxu0  ;;  %2056 = vrot.lane.b32.xlu0 %v1966_v38, %s5181_s29  ;;  %v4889_v38 = vpop.eup %4888 }
 0x8a6   :  { %v2043_v0 = vpop.permute.xlu2 %2042  ;;  %v2159_v40 = vmul.f32 32.0, %v4889_v38  ;;  %vm2163_vm7 = vweird.f32 %v4889_v38 }
 0x8a7   :  { %v2084_v19 = vsel %vm2083_vm5, %v2075_v62, %v2043_v0 }
 0x8a8   :  { %2100 = vst [vmem:[#allocation1] ss:$4 sm:$0xff] %v2084_v19  ;;  %v2160_v51 = vsub.f32 1.0, %v2159_v40 }
 0x8aa   :  { %v2161_v58 = vmul.f32 %v4889_v38, %v2160_v51 }
 0x8ac   :  { %v2162_v57 = vadd.f32 %v4889_v38, %v2161_v58 }
 0x8ae   :  { %v5986_v59 = vsel %vm2163_vm7, %v4889_v38, %v2162_v57 }
 0x8c2   :  { %v2049_v20 = vpop.permute.xlu2 %2048 }
 0x8c3   :  { %v2087_v39 = vsel %vm2083_vm5, %v2078_v7, %v2049_v20 }
 0x8c4   :  { %2106 = vst [vmem:[#allocation1 + $0x3] ss:$4 sm:$0xff] %v2087_v39 }
 0x8f1   :  { %v2055_v48 = vpop.permute.xlu2 %2054 }
 0x8f2   :  { %v2090_v55 = vsel %vm2083_vm5, %v2081_v25, %v2055_v48 }
 0x8f3   :  { %2112 = vst [vmem:[#allocation1 + $0x22] ss:$4 sm:$0xff] %v2090_v55 }
 0x8f9   :  { %v2047_v54 = vpop.permute.xlu1 %2046 }
 0x8fa   :  { %v2086_v63 = vsel %vm2083_vm5, %v2077_v61, %v2047_v54 }
 0x8fb   :  { %2104 = vst [vmem:[#allocation1 + $0x2] ss:$4 sm:$0xff] %v2086_v63  ;;  %v100_v63 = vld [vmem:[#allocation2 + $0x8] sm:$0xff] }
 0x907   :  { %v2051_v4 = vpop.permute.xlu0 %2050 }
 0x908   :  { %v2088_v43 = vsel %vm2083_vm5, %v2079_v5, %v2051_v4  ;;  %v2250_v4 = vpack.c.bf16 %v100_v63, %v99_v16 }
 0x909   :  { %2108 = vst [vmem:[#allocation1 + $0x20] ss:$4 sm:$0xff] %v2088_v43 }
 0x90f   :  { %v2053_v14 = vpop.permute.xlu1 %2052  ;;  %v2045_v23 = vpop.permute.xlu0 %2044 }
 0x910   :  { %v2089_v45 = vsel %vm2083_vm5, %v2080_v9, %v2053_v14  ;;  %v2085_v33 = vsel %vm2083_vm5, %v2076_v2, %v2045_v23 }
 0x911   :  { %2110 = vst [vmem:[#allocation1 + $0x21] ss:$4 sm:$0xff] %v2089_v45 }
 0x912   :  { %2102 = vst [vmem:[#allocation1 + $0x1] ss:$4 sm:$0xff] %v2085_v33  ;;  %v2203_v33 = vperm.slane %v5968_v35, 3 }
 0x917   :  { %v2057_v60 = vpop.permute.xlu0 %2056 }
 0x918   :  { %v2091_v44 = vsel %vm2083_vm5, %v2082_v12, %v2057_v60 }
 0x919   :  { %2114 = vst [vmem:[#allocation1 + $0x23] ss:$4 sm:$0xff] %v2091_v44  ;;  %v2115_v13 = vld.sshfl [vmem:[#allocation1] sm:$0xff pattern:$0x73625140]  ;;  %v2206_v44 = vperm.slane %v5968_v35, 4 }
 0x920   :  { %v2116_v36 = vld.sshfl [vmem:[#allocation1 + $0x20] sm:$0xff pattern:$0x73625140] }
 0x921   :  { %v2119_v10 = vpack.c.bf16 %v2116_v36, %v2115_v13 }
 0x923   :  { %4608 = vmatmul.msk.bf16.vlgmr.msra.gmra.mxu1 %vm126_vm0, %v2119_v10 }
 0x9a0   :  { %v2145_v30 = vpop.f32.mrf.mxu1 }
 0x9a1   :  { %v2146_v31 = vadd.f32 %v2145_v30, %v2120_v17 }
 0x9a3   :  { %v2150_v41 = vadd.f32 %v5030_v49, %v2146_v31 }
 0x9a5   :  { %v2152_v18 = vsel %vm126_vm0, %v2150_v41, 0.0 }
 0x9a6   :  { %2153 = vadd.xlane.f32.xlu1 %v2152_v18 }
 0x9a8   :  { %v2147_v15 = vpop.f32.mrf.mxu1 }
 0x9a9   :  { %v2148_v3 = vadd.f32 %v2147_v15, %v2120_v17 }
 0x9ab   :  { %v2151_v29 = vadd.f32 %v5031_v27, %v2148_v3 }
 0x9ad   :  { %v2155_v32 = vsel %vm126_vm0, %v2151_v29, 0.0 }
 0x9ae   :  { %2156 = vadd.xlane.f32.xlu2 %v2155_v32 }
 0x9bf   :  { %2253 = vrot.lane.b32.xlu1 %v4727_v50, %s5170_s19 }
 0xa19   :  { %v2154_v62 = vpop.xlane.xlu1 %2153 }
 0xa1a   :  { %v2165_v0 = vmul.f32 %v5986_v59, %v2154_v62 }
 0xa1c   :  { %v2167_v19 = vsub.f32 %v2150_v41, %v2165_v0 }
 0xa1e   :  { %v2169_v26 = vmul.f32 %v2167_v19, %v2167_v19 }
 0xa20   :  { %v2171_v22 = vsel %vm126_vm0, %v2169_v26, 0.0 }
 0xa21   :  { %v2157_v8 = vpop.xlane.xlu2 %2156  ;;  %2172 = vadd.xlane.f32.xlu0 %v2171_v22 }
 0xa22   :  { %v2166_v7 = vmul.f32 %v5986_v59, %v2157_v8 }
 0xa24   :  { %v2168_v20 = vsub.f32 %v2151_v29, %v2166_v7 }
 0xa26   :  { %v2170_v39 = vmul.f32 %v2168_v20, %v2168_v20 }
 0xa28   :  { %v2174_v24 = vsel %vm126_vm0, %v2170_v39, 0.0 }
 0xa29   :  { %2175 = vadd.xlane.f32.xlu2 %v2174_v24 }
 0xa31   :  { %v2254_v34 = vpop.permute.xlu1 %2253 }
 0xa32   :  { %2270 = vmatpush.bf16.msra.mxu3 %v2254_v34 }
 0xa35   :  { %2258 = vrot.lane.b32.xlu0 %v5995_v1, %s5170_s19 }
 0xa41   :  { %2251 = vrot.lane.b32.xlu2 %v4726_v53, %s5170_s19 }
 0xa94   :  { %v2173_v28 = vpop.xlane.xlu0 %2172 }
 0xa95   :  { %v2177_v25 = vmul.f32 %v2173_v28, %v5986_v59 }
 0xa97   :  { %v2179_v6 = vadd.f32 1e-05, %v2177_v25 }
 0xa99   :  { %4890 = vrsqrt.f32 %v2179_v6  ;;  %vm2187_vm9 = vweird.f32 %v2179_v6 }
 0xa9c   :  { %v2176_v48 = vpop.xlane.xlu2 %2175 }
 0xa9d   :  { %v2178_v55 = vmul.f32 %v2176_v48, %v5986_v59 }
 0xa9f   :  { %v4891_v42 = vpop.eup %4890  ;;  %v2180_v54 = vadd.f32 1e-05, %v2178_v55 }
 0xaa0   :  { %v2182_v61 = vmul.f32 %v4891_v42, %v2179_v6  ;;  %vm2188_vm8 = vweird.f32 %v4891_v42 }
 0xaa1   :  { %4892 = vrsqrt.f32 %v2180_v54  ;;  %vm2189_vm10 = vmor %vm2187_vm9, %vm2188_vm8  ;;  %vm2197_vm12 = vweird.f32 %v2180_v54 }
 0xaa2   :  { %v2183_v46 = vmul.f32 %v4891_v42, %v2182_v61 }
 0xaa4   :  { %v2184_v56 = vmul.f32 0.5, %v2183_v46  ;;  %v2252_v5 = vpop.permute.xlu2 %2251 }
 0xaa5   :  { %2271 = vmatpush.bf16.msra.mxu3 %v2252_v5 }
 0xaa6   :  { %v2185_v43 = vsub.f32 1.5, %v2184_v56 }
 0xaa7   :  { %v4893_v47 = vpop.eup %4892  ;;  %v2259_v49 = vpop.permute.xlu0 %2258 }
 0xaa8   :  { %v2186_v21 = vmul.f32 %v4891_v42, %v2185_v43  ;;  %v2192_v2 = vmul.f32 %v4893_v47, %v2180_v54  ;;  %4622 = vmatmul.msk.bf16.vlgmr.msra.gmra.mxu3 %vm126_vm0, %v2250_v4  ;;  %vm2198_vm11 = vweird.f32 %v4893_v47 }
 0xaa9   :  { %vm2199_vm13 = vmor %vm2197_vm12, %vm2198_vm11 }
 0xaaa   :  { %v2193_v14 = vmul.f32 %v4893_v47, %v2192_v2  ;;  %v2190_v9 = vsel %vm2189_vm10, %v4891_v42, %v2186_v21 }
 0xaab   :  { %v2201_v52 = vmul.f32 %v2190_v9, %v2167_v19 }
 0xaac   :  { %v2194_v23 = vmul.f32 0.5, %v2193_v14 }
 0xaad   :  { %v2204_v13 = vmul.f32 %v2203_v33, %v2201_v52 }
 0xaae   :  { %v2195_v45 = vsub.f32 1.5, %v2194_v23 }
 0xaaf   :  { %v6005_v17 = vadd.f32 %v2206_v44, %v2204_v13 }
 0xab0   :  { %v2196_v12 = vmul.f32 %v4893_v47, %v2195_v45 }
 0xab2   :  { %v2200_v60 = vsel %vm2199_vm13, %v4893_v47, %v2196_v12 }
 0xab3   :  { %v2202_v36 = vmul.f32 %v2200_v60, %v2168_v20 }
 0xab5   :  { %v2205_v10 = vmul.f32 %v2203_v33, %v2202_v36 }
 0xab7   :  { %v6007_v30 = vadd.f32 %v2206_v44, %v2205_v10 }
 0xab9   :  { %v2219_v31 = vpack.c.bf16 %v6007_v30, %v6005_v17 }
 0xabb   :  { %4621 = vmatmul.msk.bf16.vlgmr.msra.gmra.mxu2 %vm126_vm0, %v2219_v31 }
 0xb2b   :  { %v2273_v41 = vpop.f32.mrf.mxu3 }
 0xb2c   :  { %v2274_v18 = vadd.f32 %v2273_v41, %v2259_v49 }
 0xb2e   :  { %v2295_v15 = vrot.slane %v2274_v18, 4  ;;  %v2296_v3 = vrot.slane %v2274_v18, 6  ;;  %v2314_v27 = vpack.c.bf16 %v2274_v18, %v2274_v18  ;;  %v2294_v29 = vrot.slane %v2274_v18, 2 }
 0xb30   :  { %v2316_v35 = vpack.c.bf16 %v2295_v15, %v2295_v15  ;;  %v2317_v32 = vpack.c.bf16 %v2296_v3, %v2296_v3  ;;  %v2326_v37 = vsel %vm171_vm1, %v2314_v27, 0  ;;  %v2315_v38 = vpack.c.bf16 %v2294_v29, %v2294_v29 }
 0xb31   :  { %2335 = vmatpush.bf16.xpose.msrb.mxu0 %v2326_v37  ;;  %v2571_v16 = vunpack.c.l.b16 %v2314_v27 }
 0xb32   :  { %v2619_v40 = vunpack.c.l.b16 %v2316_v35  ;;  %v2643_v50 = vunpack.c.l.b16 %v2317_v32  ;;  %v2364_v51 = vsel %vm171_vm1, %v2316_v35, 0  ;;  %v2345_v58 = vsel %vm171_vm1, %v2315_v38, 0 }
 0xb33   :  { %v2275_v53 = vpop.f32.mrf.mxu3  ;;  %2373 = vmatpush.bf16.xpose.msrb.mxu2 %v2364_v51  ;;  %v2383_v57 = vsel %vm171_vm1, %v2317_v32, 0  ;;  %2354 = vmatpush.bf16.xpose.msrb.mxu1 %v2345_v58  ;;  %v6053_v21 = vpack.c.b16 %v2571_v16, %v2571_v16  ;;  %v2595_v2 = vunpack.c.l.b16 %v2315_v38 }
 0xb34   :  { %v6016_v62 = vpack.c.b16 %v2619_v40, %v2619_v40  ;;  %v6018_v0 = vpack.c.b16 %v2643_v50, %v2643_v50  ;;  %v2276_v19 = vadd.f32 %v2275_v53, %v2259_v49  ;;  %2392 = vmatpush.bf16.xpose.msrb.mxu3 %v2383_v57 }
 0xb35   :  { %v6064_v23 = vpack.c.b16 %v2595_v2, %v2595_v2 }
 0xb36   :  { %v2298_v26 = vrot.slane %v2276_v19, 4  ;;  %2645 = vrot.lane.b32.xlu2 %v6018_v0, %s5170_s19  ;;  %2621 = vrot.lane.b32.xlu0 %v6016_v62, %s5170_s19  ;;  %v6024_v22 = vpack.c.bf16 %v2276_v19, %v2276_v19  ;;  %v2297_v8 = vrot.slane %v2276_v19, 2  ;;  %v2299_v7 = vrot.slane %v2276_v19, 6 }
 0xb38   :  { %v2320_v20 = vpack.c.bf16 %v2298_v26, %v2298_v26  ;;  %v2402_v39 = vsel %vm171_vm1, %v6024_v22, 0  ;;  %v6028_v24 = vpack.c.bf16 %v2297_v8, %v2297_v8  ;;  %v2321_v11 = vpack.c.bf16 %v2299_v7, %v2299_v7 }
 0xb39   :  { %2411 = vmatpush.bf16.xpose.msra.mxu0 %v2402_v39 }
 0xb3a   :  { %v2715_v34 = vunpack.c.l.b16 %v2320_v20  ;;  %v2421_v28 = vsel %vm171_vm1, %v6028_v24, 0  ;;  %v2440_v25 = vsel %vm171_vm1, %v2320_v20, 0  ;;  %v2459_v6 = vsel %vm171_vm1, %v2321_v11, 0 }
 0xb3b   :  { %2430 = vmatpush.bf16.xpose.msra.mxu1 %v2421_v28  ;;  %v2739_v48 = vunpack.c.l.b16 %v2321_v11  ;;  %2449 = vmatpush.bf16.xpose.msra.mxu2 %v2440_v25 }
 0xb3c   :  { %v6034_v55 = vpack.c.b16 %v2715_v34, %v2715_v34  ;;  %2468 = vmatpush.bf16.xpose.msra.mxu3 %v2459_v6 }
 0xb3d   :  { %v6036_v42 = vpack.c.b16 %v2739_v48, %v2739_v48 }
 0xb3e   :  { %v2245_v54 = vpop.f32.mrf.mxu2  ;;  %2717 = vrot.lane.b32.xlu2 %v6034_v55, %s5170_s19 }
 0xb3f   :  { %v2246_v61 = vadd.f32 %v2245_v54, %v5995_v1  ;;  %2741 = vrot.lane.b32.xlu1 %v6036_v42, %s5170_s19 }
 0xb41   :  { %v2280_v63 = vrot.slane %v2246_v61, 2  ;;  %v2281_v46 = vrot.slane %v2246_v61, 4  ;;  %v2282_v56 = vrot.slane %v2246_v61, 6  ;;  %v6043_v5 = vpack.c.bf16 %v2246_v61, %v2246_v61 }
 0xb43   :  { %v6045_v4 = vpack.c.bf16 %v2280_v63, %v2280_v63  ;;  %v6047_v43 = vpack.c.bf16 %v2281_v46, %v2281_v46  ;;  %v6049_v47 = vpack.c.bf16 %v2282_v56, %v2282_v56  ;;  %4623 = vmatmul.msk.bf16.vlgmr.msrb.gmra.mxu0 %vm171_vm1, %v6043_v5 }
 0xb45   :  { %4624 = vmatmul.msk.bf16.vlgmr.msrb.gmra.mxu1 %vm171_vm1, %v6045_v4  ;;  %4625 = vmatmul.msk.bf16.vlgmr.msrb.gmra.mxu2 %vm171_vm1, %v6047_v43 }
 0xb46   :  { %4626 = vmatmul.msk.bf16.vlgmr.msrb.gmra.mxu3 %vm171_vm1, %v6049_v47  ;;  %2573 = vrot.lane.b32.xlu2 %v6053_v21, %s5170_s19  ;;  %v2247_v14 = vpop.f32.mrf.mxu2 }
 0xb47   :  { %v2248_v9 = vadd.f32 %v2247_v14, %v5995_v1 }
 0xb49   :  { %v2283_v45 = vrot.slane %v2248_v9, 2  ;;  %v2284_v33 = vrot.slane %v2248_v9, 4  ;;  %v2285_v52 = vrot.slane %v2248_v9, 6  ;;  %v6068_v12 = vpack.c.bf16 %v2248_v9, %v2248_v9 }
 0xb4b   :  { %v6070_v60 = vpack.c.bf16 %v2283_v45, %v2283_v45  ;;  %v6072_v44 = vpack.c.bf16 %v2284_v33, %v2284_v33  ;;  %v6076_v13 = vpack.c.bf16 %v2285_v52, %v2285_v52 }
 0xb4e   :  { %2597 = vrot.lane.b32.xlu2 %v6064_v23, %s5170_s19 }
 0xb53   :  { %4627 = vmatmul.msk.bf16.vlgmr.msra.gmra.mxu0 %vm171_vm1, %v6068_v12 }
 0xb55   :  { %4628 = vmatmul.msk.bf16.vlgmr.msra.gmra.mxu1 %vm171_vm1, %v6070_v60  ;;  %4629 = vmatmul.msk.bf16.vlgmr.msra.gmra.mxu2 %vm171_vm1, %v6072_v44 }
 0xb56   :  { %4630 = vmatmul.msk.bf16.vlgmr.msra.gmra.mxu3 %vm171_vm1, %v6076_v13 }
 0xb90   :  { %v2646_v1 = vpop.permute.xlu2 %2645 }
 0xb91   :  { %v2651_v36 = vsel %vm462_vm2, %v2646_v1, 0 }
 0xb92   :  { %2660 = vmatpush.bf16.msrb.mxu3 %v2651_v36 }
 0xb98   :  { %v2718_v10 = vpop.permute.xlu2 %2717 }
 0xb99   :  { %v2723_v27 = vsel %vm462_vm2, %v2718_v10, 0 }
 0xba0   :  { %v2574_v31 = vpop.permute.xlu2 %2573 }
 0xba1   :  { %v2579_v49 = vsel %vm462_vm2, %v2574_v31, 0 }
 0xba2   :  { %2588 = vmatpush.bf16.msrb.mxu0 %v2579_v49 }
 0xba8   :  { %v2622_v41 = vpop.permute.xlu0 %2621  ;;  %v2598_v18 = vpop.permute.xlu2 %2597 }
 0xba9   :  { %v2627_v15 = vsel %vm462_vm2, %v2622_v41, 0  ;;  %v2603_v3 = vsel %vm462_vm2, %v2598_v18, 0  ;;  %v2841_v18 = vunpack.c.l.b16 %v6049_v47  ;;  %v2667_v47 = vunpack.c.l.b16 %v6024_v22 }
 0xbaa   :  { %2612 = vmatpush.bf16.msrb.mxu1 %v2603_v3  ;;  %2636 = vmatpush.bf16.msrb.mxu2 %v2627_v15  ;;  %v2815_v3 = vunpack.c.l.b16 %v6047_v43 }
 0xbab   :  { %v6120_v15 = vpack.c.b16 %v2841_v18, %v2841_v18 }
 0xbae   :  { %2732 = vmatpush.bf16.msra.mxu2 %v2723_v27  ;;  %v6131_v27 = vpack.c.b16 %v2815_v3, %v2815_v3 }
 0xbb1   :  { %v2742_v29 = vpop.permute.xlu1 %2741 }
 0xbb2   :  { %v2747_v35 = vsel %vm462_vm2, %v2742_v29, 0  ;;  %v6136_v29 = vpack.c.b16 %v2667_v47, %v2667_v47 }
 0xbb3   :  { %2756 = vmatpush.bf16.msra.mxu3 %v2747_v35 }
 0xbc0   :  { %v2337_v32 = vpop.f32.mrf.mxu0 }
 0xbc1   :  { %v2474_v37 = vsel %vm359_vm3, %v2337_v32, -inf }
 0xbc2   :  { %2475 = vmax.xlane.f32.xlu0 %v2474_v37  ;;  %v2356_v38 = vpop.f32.mrf.mxu1 }
 0xbc3   :  { %v2477_v40 = vsel %vm359_vm3, %v2356_v38, -inf }
 0xbc4   :  { %2478 = vmax.xlane.f32.xlu2 %v2477_v40 }
 0xbc8   :  { %v2339_v50 = vpop.f32.mrf.mxu0  ;;  %v2375_v51 = vpop.f32.mrf.mxu2 }
 0xbc9   :  { %v6092_v53 = vpop.f32.mrf.mxu3  ;;  %v2480_v58 = vsel %vm359_vm3, %v2375_v51, -inf }
 0xbca   :  { %v2483_v57 = vsel %vm359_vm3, %v6092_v53, -inf  ;;  %2481 = vmax.xlane.f32.xlu1 %v2480_v58  ;;  %v2358_v19 = vpop.f32.mrf.mxu1 }
 0xbcb   :  { %2484 = vmax.xlane.f32.xlu0 %v2483_v57 }
 0xbd0   :  { %v2377_v26 = vpop.f32.mrf.mxu2  ;;  %v2413_v8 = vpop.f32.mrf.mxu0 }
 0xbd1   :  { %v2396_v7 = vpop.f32.mrf.mxu3  ;;  %v2486_v20 = vsel %vm359_vm3, %v2413_v8, -inf }
 0xbd2   :  { %2487 = vmax.xlane.f32.xlu1 %v2486_v20  ;;  %v2432_v39 = vpop.f32.mrf.mxu1 }
 0xbd3   :  { %v2489_v11 = vsel %vm359_vm3, %v2432_v39, -inf }
 0xbd4   :  { %2490 = vmax.xlane.f32.xlu0 %v2489_v11  ;;  %v2763_v11 = vunpack.c.l.b16 %v6043_v5 }
 0xbd8   :  { %v2415_v34 = vpop.f32.mrf.mxu0  ;;  %v6099_v28 = vpop.f32.mrf.mxu2 }
 0xbd9   :  { %v6101_v25 = vpop.f32.mrf.mxu3  ;;  %v2492_v6 = vsel %vm359_vm3, %v6099_v28, -inf }
 0xbda   :  { %v2495_v48 = vsel %vm359_vm3, %v6101_v25, -inf  ;;  %2493 = vmax.xlane.f32.xlu2 %v2492_v6  ;;  %v2434_v54 = vpop.f32.mrf.mxu1 }
 0xbdb   :  { %2496 = vmax.xlane.f32.xlu1 %v2495_v48  ;;  %v6163_v54 = vpack.c.b16 %v2763_v11, %v2763_v11 }
 0xbe0   :  { %v2453_v61 = vpop.f32.mrf.mxu2 }
 0xbe1   :  { %v2472_v16 = vpop.f32.mrf.mxu3 }
 0xc35   :  { %v2476_v63 = vpop.xlane.xlu0 %2475 }
 0xc36   :  { %v2498_v46 = vsub.f32 %v2337_v32, %v2476_v63  ;;  %v2691_v32 = vunpack.c.l.b16 %v6028_v24 }
 0xc37   :  { %v2479_v56 = vpop.xlane.xlu2 %2478 }
 0xc38   :  { %v2506_v2 = vmul.f32 1.442695, %v2498_v46  ;;  %v2499_v14 = vsub.f32 %v2356_v38, %v2479_v56  ;;  %v6141_v37 = vpack.c.b16 %v2691_v32, %v2691_v32  ;;  %v2945_v32 = vunpack.c.l.b16 %v6076_v13 }
 0xc3a   :  { %4894 = vpow2.f32 %v2506_v2  ;;  %v2508_v9 = vmul.f32 1.442695, %v2499_v14 }
 0xc3c   :  { %4896 = vpow2.f32 %v2508_v9 }
 0xc3d   :  { %v2482_v45 = vpop.xlane.xlu1 %2481 }
 0xc3e   :  { %v2500_v33 = vsub.f32 %v2375_v51, %v2482_v45  ;;  %v2485_v35 = vpop.xlane.xlu0 %2484 }
 0xc3f   :  { %v2501_v26 = vsub.f32 %v6092_v53, %v2485_v35 }
 0xc40   :  { %v6107_v52 = vpop.eup %4894  ;;  %v2510_v1 = vmul.f32 1.442695, %v2500_v33 }
 0xc41   :  { %v2522_v36 = vsel %vm359_vm3, %v6107_v52, 0.0 }
 0xc42   :  { %v6111_v10 = vpop.eup %4896  ;;  %4898 = vpow2.f32 %v2510_v1  ;;  %2523 = vadd.xlane.f32.xlu0 %v2522_v36 }
 0xc43   :  { %v2525_v31 = vsel %vm359_vm3, %v6111_v10, 0.0 }
 0xc44   :  { %2526 = vadd.xlane.f32.xlu1 %v2525_v31 }
 0xc45   :  { %v2488_v38 = vpop.xlane.xlu1 %2487 }
 0xc46   :  { %v2502_v50 = vsub.f32 %v2413_v8, %v2488_v38  ;;  %v2512_v8 = vmul.f32 1.442695, %v2501_v26  ;;  %v2789_v38 = vunpack.c.l.b16 %v6045_v4 }
 0xc47   :  { %v2491_v43 = vpop.xlane.xlu0 %2490 }
 0xc48   :  { %v6115_v49 = vpop.eup %4898  ;;  %v2503_v40 = vsub.f32 %v2432_v39, %v2491_v43  ;;  %v2514_v58 = vmul.f32 1.442695, %v2502_v50  ;;  %v2919_v39 = vunpack.c.l.b16 %v6072_v44  ;;  %v2893_v44 = vunpack.c.l.b16 %v6070_v60 }
 0xc49   :  { %v2528_v41 = vsel %vm359_vm3, %v6115_v49, 0.0  ;;  %v2867_v60 = vunpack.c.l.b16 %v6068_v12 }
 0xc4a   :  { %2529 = vadd.xlane.f32.xlu2 %v2528_v41  ;;  %v2516_v51 = vmul.f32 1.442695, %v2503_v40  ;;  %v6161_v6 = vpack.c.b16 %v2919_v39, %v2919_v39  ;;  %v6175_v16 = vpack.c.b16 %v2893_v44, %v2893_v44  ;;  %v6229_v40 = vpack.c.b16 %v2789_v38, %v2789_v38 }
 0xc4b   :  { %v6186_v46 = vpack.c.b16 %v2867_v60, %v2867_v60 }
 0xc4c   :  { %4900 = vpow2.f32 %v2516_v51 }
 0xc4d   :  { %4902 = vpow2.f32 %v2514_v58  ;;  %v2494_v7 = vpop.xlane.xlu2 %2493 }
 0xc4e   :  { %4904 = vpow2.f32 %v2512_v8  ;;  %v2504_v20 = vsub.f32 %v6099_v28, %v2494_v7  ;;  %v2497_v48 = vpop.xlane.xlu1 %2496 }
 0xc4f   :  { %v2505_v53 = vsub.f32 %v6101_v25, %v2497_v48 }
 0xc50   :  { %v2518_v34 = vmul.f32 1.442695, %v2504_v20 }
 0xc51   :  { %v2520_v28 = vmul.f32 1.442695, %v2505_v53 }
 0xc52   :  { %v6147_v22 = vpop.eup %4900  ;;  %4906 = vpow2.f32 %v2518_v34 }
 0xc53   :  { %v6149_v57 = vpop.eup %4902  ;;  %v2537_v24 = vsel %vm359_vm3, %v6147_v22, 0.0  ;;  %4908 = vpow2.f32 %v2520_v28 }
 0xc54   :  { %v2534_v19 = vsel %vm359_vm3, %v6149_v57, 0.0  ;;  %v6165_v61 = vpop.eup %4904 }
 0xc55   :  { %v2531_v5 = vsel %vm359_vm3, %v6165_v61, 0.0 }
 0xc56   :  { %2843 = vrot.lane.b32.xlu0 %v6120_v15, %s5172_s22 }
 0xc58   :  { %v6177_v63 = vpop.eup %4906 }
 0xc59   :  { %v2540_v25 = vsel %vm359_vm3, %v6177_v63, 0.0  ;;  %v6188_v56 = vpop.eup %4908 }
 0xc5a   :  { %v2543_v14 = vsel %vm359_vm3, %v6188_v56, 0.0 }
 0xc5d   :  { %2845 = vrot.lane.b32.xlu1 %v6018_v0, %s5172_s22 }
 0xc5e   :  { %2949 = vrot.lane.b32.xlu0 %v6036_v42, %s5172_s22 }
 0xc62   :  { %2819 = vrot.lane.b32.xlu2 %v6016_v62, %s5172_s22 }
 0xc65   :  { %2817 = vrot.lane.b32.xlu1 %v6131_v27, %s5172_s22 }
 0xc6d   :  { %2669 = vrot.lane.b32.xlu1 %v6136_v29, %s5170_s19 }
 0xc75   :  { %2693 = vrot.lane.b32.xlu1 %v6141_v37, %s5170_s19 }
 0xc7d   :  { %2923 = vrot.lane.b32.xlu1 %v6034_v55, %s5172_s22 }
 0xc88   :  { %2538 = vadd.xlane.f32.xlu0 %v2537_v24 }
 0xc8b   :  { %2535 = vadd.xlane.f32.xlu2 %v2534_v19 }
 0xc9c   :  { %2793 = vrot.lane.b32.xlu0 %v6064_v23, %s5172_s22 }
 0xca3   :  { %2921 = vrot.lane.b32.xlu2 %v6161_v6, %s5172_s22 }
 0xca4   :  { %2765 = vrot.lane.b32.xlu0 %v6163_v54, %s5172_s22 }
 0xca7   :  { %2532 = vadd.xlane.f32.xlu1 %v2531_v5 }
 0xcab   :  { %2895 = vrot.lane.b32.xlu2 %v6175_v16, %s5172_s22 }
 0xcac   :  { %2871 = vrot.lane.b32.xlu0 %v6136_v29, %s5172_s22 }
 0xcaf   :  { %2541 = vadd.xlane.f32.xlu1 %v2540_v25 }
 0xcb3   :  { %3129 = vrot.lane.b32.xlu2 %v6018_v0, %s5171_s20 }
 0xcb4   :  { %2869 = vrot.lane.b32.xlu0 %v6186_v46, %s5172_s22 }
 0xcb5   :  { %v2524_v2 = vpop.xlane.xlu0 %2523 }
 0xcb6   :  { %4910 = vrcp.f32 %v2524_v2 }
 0xcb7   :  { %v2527_v9 = vpop.xlane.xlu1 %2526  ;;  %2544 = vadd.xlane.f32.xlu1 %v2543_v14 }
 0xcb8   :  { %4912 = vrcp.f32 %v2527_v9 }
 0xcbb   :  { %3192 = vrot.lane.b32.xlu2 %v6034_v55, %s5171_s20 }
 0xcbc   :  { %v4911_v12 = vpop.eup %4910  ;;  %3108 = vrot.lane.b32.xlu0 %v6016_v62, %s5171_s20 }
 0xcbd   :  { %v2554_v45 = vmul.f32 %v4911_v12, %v6107_v52  ;;  %v2530_v33 = vpop.xlane.xlu2 %2529 }
 0xcbe   :  { %v4913_v1 = vpop.eup %4912  ;;  %4914 = vrcp.f32 %v2530_v33 }
 0xcbf   :  { %v2562_v36 = vpack.c.bf16 %v2554_v45, %v2554_v45  ;;  %v2555_v31 = vmul.f32 %v4913_v1, %v6111_v10 }
 0xcc1   :  { %v2563_v41 = vpack.c.bf16 %v2555_v31, %v2555_v31  ;;  %4631 = vmatmul.msk.bf16.vlgmr.msrb.gmra.mxu0 %vm458_vm4, %v2562_v36 }
 0xcc3   :  { %3066 = vrot.lane.b32.xlu2 %v6053_v21, %s5171_s20  ;;  %4632 = vmatmul.msk.bf16.vlgmr.msrb.gmra.mxu1 %vm458_vm4, %v2563_v41 }
 0xcc4   :  { %v4915_v18 = vpop.eup %4914  ;;  %3282 = vrot.lane.b32.xlu0 %v6016_v62, %s5175_s24 }
 0xcc5   :  { %v2556_v52 = vmul.f32 %v4915_v18, %v6115_v49  ;;  %v2820_v3 = vpop.permute.xlu2 %2819  ;;  %v6222_v49 = vpack.c.b16 %v2945_v32, %v2945_v32 }
 0xcc6   :  { %v2825_v35 = vsel %vm171_vm1, %v2820_v3, 0 }
 0xcc7   :  { %v2564_v47 = vpack.c.bf16 %v2556_v52, %v2556_v52 }
 0xcc8   :  { %v6237_v24 = vpop.permute.xlu0 %2843 }
 0xcc9   :  { %4633 = vmatmul.msk.bf16.vlgmr.msrb.gmra.mxu2 %vm458_vm4, %v2564_v47 }
 0xcca   :  { %2834 = vmatpush.bf16.xpose.msrb.mxu2 %v2825_v35 }
 0xccb   :  { %3087 = vrot.lane.b32.xlu2 %v6064_v23, %s5171_s20 }
 0xccc   :  { %3305 = vrot.lane.b32.xlu0 %v6018_v0, %s5175_s24 }
 0xccf   :  { %v2846_v10 = vpop.permute.xlu1 %2845 }
 0xcd0   :  { %2767 = vrot.lane.b32.xlu1 %v6053_v21, %s5172_s22  ;;  %v2950_v4 = vpop.permute.xlu0 %2949  ;;  %v2851_v14 = vsel %vm171_vm1, %v2846_v10, 0 }
 0xcd1   :  { %v2955_v47 = vsel %vm171_vm1, %v2950_v4, 0 }
 0xcd3   :  { %3150 = vrot.lane.b32.xlu2 %v6136_v29, %s5171_s20 }
 0xcd4   :  { %3171 = vrot.lane.b32.xlu0 %v6141_v37, %s5171_s20 }
 0xcd7   :  { %v6224_v43 = vpop.permute.xlu1 %2817 }
 0xcd8   :  { %2947 = vrot.lane.b32.xlu1 %v6222_v49, %s5172_s22 }
 0xcdf   :  { %v2670_v50 = vpop.permute.xlu1 %2669 }
 0xce0   :  { %v2675_v13 = vsel %vm462_vm2, %v2670_v50, 0  ;;  %2791 = vrot.lane.b32.xlu1 %v6229_v40, %s5172_s22 }
 0xce1   :  { %2684 = vmatpush.bf16.msra.mxu0 %v2675_v13 }
 0xce7   :  { %v2694_v51 = vpop.permute.xlu1 %2693 }
 0xce8   :  { %v2699_v58 = vsel %vm462_vm2, %v2694_v51, 0  ;;  %2897 = vrot.lane.b32.xlu1 %v6141_v37, %s5172_s22 }
 0xce9   :  { %2708 = vmatpush.bf16.msra.mxu1 %v2699_v58 }
 0xcef   :  { %v2924_v44 = vpop.permute.xlu1 %2923 }
 0xcf0   :  { %3213 = vrot.lane.b32.xlu1 %v6036_v42, %s5171_s20  ;;  %v2929_v31 = vsel %vm171_vm1, %v2924_v44, 0 }
 0xcfb   :  { %v2539_v19 = vpop.xlane.xlu0 %2538 }
 0xcfc   :  { %4916 = vrcp.f32 %v2539_v19 }
 0xcfe   :  { %v2536_v26 = vpop.xlane.xlu2 %2535 }
 0xcff   :  { %4918 = vrcp.f32 %v2536_v26 }
 0xd02   :  { %v4917_v8 = vpop.eup %4916 }
 0xd03   :  { %v2559_v7 = vmul.f32 %v4917_v8, %v6147_v22 }
 0xd05   :  { %v4919_v20 = vpop.eup %4918  ;;  %v2567_v39 = vpack.c.bf16 %v2559_v7, %v2559_v7 }
 0xd06   :  { %v2558_v11 = vmul.f32 %v4919_v20, %v6149_v57  ;;  %v2922_v28 = vpop.permute.xlu2 %2921 }
 0xd07   :  { %4636 = vmatmul.msk.bf16.vlgmr.msra.gmra.mxu1 %vm458_vm4, %v2567_v39 }
 0xd08   :  { %v2566_v34 = vpack.c.bf16 %v2558_v11, %v2558_v11 }
 0xd0a   :  { %4635 = vmatmul.msk.bf16.vlgmr.msra.gmra.mxu0 %vm458_vm4, %v2566_v34 }
 0xd0e   :  { %v2794_v48 = vpop.permute.xlu0 %2793  ;;  %v6248_v9 = vpop.permute.xlu2 %2895 }
 0xd0f   :  { %v2799_v53 = vsel %vm171_vm1, %v2794_v48, 0 }
 0xd10   :  { %2808 = vmatpush.bf16.xpose.msrb.mxu1 %v2799_v53 }
 0xd16   :  { %v2766_v25 = vpop.permute.xlu0 %2765 }
 0xd1a   :  { %v2533_v5 = vpop.xlane.xlu1 %2532 }
 0xd1b   :  { %4920 = vrcp.f32 %v2533_v5 }
 0xd1e   :  { %v2872_v12 = vpop.permute.xlu0 %2871 }
 0xd1f   :  { %v2877_v13 = vsel %vm171_vm1, %v2872_v12, 0 }
 0xd21   :  { %v4921_v60 = vpop.eup %4920 }
 0xd22   :  { %v2557_v22 = vmul.f32 %v4921_v60, %v6165_v61  ;;  %v2542_v2 = vpop.xlane.xlu1 %2541  ;;  %v3130_v61 = vpop.permute.xlu2 %3129 }
 0xd23   :  { %4922 = vrcp.f32 %v2542_v2  ;;  %v3135_v58 = vsel %vm462_vm2, %v3130_v61, 0 }
 0xd24   :  { %v2565_v57 = vpack.c.bf16 %v2557_v22, %v2557_v22 }
 0xd26   :  { %4634 = vmatmul.msk.bf16.vlgmr.msrb.gmra.mxu3 %vm458_vm4, %v2565_v57  ;;  %v2870_v18 = vpop.permute.xlu0 %2869 }
 0xd27   :  { %2860 = vmatpush.bf16.xpose.msrb.mxu3 %v2851_v14 }
 0xd29   :  { %v4923_v45 = vpop.eup %4922 }
 0xd2a   :  { %v2560_v33 = vmul.f32 %v4923_v45, %v6177_v63  ;;  %v2545_v1 = vpop.xlane.xlu1 %2544  ;;  %v3193_v63 = vpop.permute.xlu2 %3192 }
 0xd2b   :  { %4924 = vrcp.f32 %v2545_v1  ;;  %v3198_v20 = vsel %vm462_vm2, %v3193_v63, 0 }
 0xd2c   :  { %v2568_v36 = vpack.c.bf16 %v2560_v33, %v2560_v33 }
 0xd2e   :  { %4637 = vmatmul.msk.bf16.vlgmr.msra.gmra.mxu2 %vm458_vm4, %v2568_v36  ;;  %v3109_v35 = vpop.permute.xlu0 %3108 }
 0xd2f   :  { %2938 = vmatpush.bf16.xpose.msra.mxu2 %v2929_v31  ;;  %v3114_v10 = vsel %vm462_vm2, %v3109_v35, 0 }
 0xd31   :  { %v4925_v41 = vpop.eup %4924 }
 0xd32   :  { %v2561_v52 = vmul.f32 %v4925_v41, %v6188_v56  ;;  %v3067_v51 = vpop.permute.xlu2 %3066 }
 0xd33   :  { %v3072_v26 = vsel %vm462_vm2, %v3067_v51, 0 }
 0xd34   :  { %v2569_v3 = vpack.c.bf16 %v2561_v52, %v2561_v52 }
 0xd36   :  { %4638 = vmatmul.msk.bf16.vlgmr.msra.gmra.mxu3 %vm458_vm4, %v2569_v3  ;;  %v6271_v8 = vpop.permute.xlu0 %3282 }
 0xd37   :  { %2964 = vmatpush.bf16.xpose.msra.mxu3 %v2955_v47 }
 0xd3a   :  { %v3088_v39 = vpop.permute.xlu2 %3087 }
 0xd3e   :  { %v6258_v32 = vpop.f32.mrf.mxu0  ;;  %4641 = vmatmul.msk.bf16.vlgmr.msrb.gmra.mxu2 %vm171_vm1, %v6224_v43  ;;  %v6278_v34 = vpop.permute.xlu0 %3305 }
 0xd3f   :  { %3123 = vmatpush.bf16.msrb.mxu2 %v3114_v10 }
 0xd40   :  { %v6262_v38 = vpop.f32.mrf.mxu1 }
 0xd42   :  { %v2768_v50 = vpop.permute.xlu1 %2767  ;;  %v3151_v48 = vpop.permute.xlu2 %3150 }
 0xd43   :  { %v2773_v56 = vsel %vm171_vm1, %v2768_v50, 0  ;;  %v3156_v44 = vsel %vm462_vm2, %v3151_v48, 0 }
 0xd44   :  { %2782 = vmatpush.bf16.xpose.msrb.mxu0 %v2773_v56 }
 0xd46   :  { %v2592_v4 = vpop.f32.mrf.mxu0  ;;  %4642 = vmatmul.msk.bf16.vlgmr.msrb.gmra.mxu3 %vm171_vm1, %v6237_v24 }
 0xd47   :  { %3144 = vmatpush.bf16.msrb.mxu3 %v3135_v58 }
 0xd48   :  { %v2616_v19 = vpop.f32.mrf.mxu1 }
 0xd4a   :  { %v2948_v43 = vpop.permute.xlu1 %2947 }
 0xd4b   :  { %4639 = vmatmul.msk.bf16.vlgmr.msrb.gmra.mxu0 %vm171_vm1, %v2766_v25  ;;  %v3093_v25 = vsel %vm462_vm2, %v3088_v39, 0 }
 0xd4c   :  { %2886 = vmatpush.bf16.xpose.msra.mxu0 %v2877_v13  ;;  %v6273_v7 = vpop.f32.mrf.mxu2 }
 0xd4e   :  { %4645 = vmatmul.msk.bf16.vlgmr.msra.gmra.mxu2 %vm171_vm1, %v2922_v28  ;;  %v3172_v28 = vpop.permute.xlu0 %3171 }
 0xd4f   :  { %3207 = vmatpush.bf16.msra.mxu2 %v3198_v20  ;;  %v3177_v22 = vsel %vm462_vm2, %v3172_v28, 0 }
 0xd52   :  { %v2792_v11 = vpop.permute.xlu1 %2791 }
 0xd53   :  { %4640 = vmatmul.msk.bf16.vlgmr.msrb.gmra.mxu1 %vm171_vm1, %v2792_v11 }
 0xd54   :  { %3081 = vmatpush.bf16.msrb.mxu0 %v3072_v26  ;;  %v2640_v24 = vpop.f32.mrf.mxu2 }
 0xd56   :  { %4646 = vmatmul.msk.bf16.vlgmr.msra.gmra.mxu3 %vm171_vm1, %v2948_v43 }
 0xd5a   :  { %v2898_v53 = vpop.permute.xlu1 %2897 }
 0xd5b   :  { %v2903_v5 = vsel %vm171_vm1, %v2898_v53, 0  ;;  %4643 = vmatmul.msk.bf16.vlgmr.msra.gmra.mxu0 %vm171_vm1, %v2870_v18 }
 0xd5c   :  { %3165 = vmatpush.bf16.msra.mxu0 %v3156_v44  ;;  %2912 = vmatpush.bf16.xpose.msra.mxu1 %v2903_v5 }
 0xd62   :  { %v3214_v60 = vpop.permute.xlu1 %3213 }
 0xd63   :  { %v3219_v2 = vsel %vm462_vm2, %v3214_v60, 0  ;;  %4644 = vmatmul.msk.bf16.vlgmr.msra.gmra.mxu1 %vm171_vm1, %v6248_v9 }
 0xd64   :  { %3102 = vmatpush.bf16.msrb.mxu1 %v3093_v25  ;;  %3228 = vmatpush.bf16.msra.mxu3 %v3219_v2 }
 0xd68   :  { %3186 = vmatpush.bf16.msra.mxu1 %v3177_v22 }
 0xd84   :  { %v6289_v57 = vpop.f32.mrf.mxu1 }
 0xd87   :  { %v6291_v14 = vpop.f32.mrf.mxu0 }
 0xd8c   :  { %v2712_v12 = vpop.f32.mrf.mxu1 }
 0xd8f   :  { %v2688_v45 = vpop.f32.mrf.mxu0 }
 0xda9   :  { %v6293_v33 = vpop.f32.mrf.mxu3 }
 0xdb1   :  { %v2664_v1 = vpop.f32.mrf.mxu3  ;;  %v6295_v36 = vpop.f32.mrf.mxu2 }
 0xdb9   :  { %v2736_v31 = vpop.f32.mrf.mxu2  ;;  %v6297_v61 = vpop.f32.mrf.mxu3 }
 0xdc1   :  { %v2760_v41 = vpop.f32.mrf.mxu3  ;;  %v2836_v18 = vpop.f32.mrf.mxu2 }
 0xdc2   :  { %v2976_v9 = vsel %vm359_vm3, %v2836_v18, -inf }
 0xdc3   :  { %2977 = vmax.xlane.f32.xlu1 %v2976_v9 }
 0xdc8   :  { %v2784_v52 = vpop.f32.mrf.mxu0 }
 0xdc9   :  { %v2838_v3 = vpop.f32.mrf.mxu2  ;;  %v2862_v47 = vpop.f32.mrf.mxu3  ;;  %v2970_v63 = vsel %vm359_vm3, %v2784_v52, -inf }
 0xdca   :  { %2971 = vmax.xlane.f32.xlu0 %v2970_v63  ;;  %v2979_v13 = vsel %vm359_vm3, %v2862_v47, -inf }
 0xdd0   :  { %v2786_v35 = vpop.f32.mrf.mxu0  ;;  %v2810_v10 = vpop.f32.mrf.mxu1 }
 0xdd1   :  { %v2864_v50 = vpop.f32.mrf.mxu3  ;;  %v2940_v56 = vpop.f32.mrf.mxu2  ;;  %v2973_v51 = vsel %vm359_vm3, %v2810_v10, -inf }
 0xdd2   :  { %2980 = vmax.xlane.f32.xlu0 %v2979_v13  ;;  %2974 = vmax.xlane.f32.xlu2 %v2973_v51  ;;  %v2988_v20 = vsel %vm359_vm3, %v2940_v56, -inf }
 0xdd8   :  { %v2812_v58 = vpop.f32.mrf.mxu1  ;;  %v6303_v4 = vpop.f32.mrf.mxu0 }
 0xdd9   :  { %v2942_v19 = vpop.f32.mrf.mxu2  ;;  %v2966_v43 = vpop.f32.mrf.mxu3  ;;  %v2982_v26 = vsel %vm359_vm3, %v6303_v4, -inf }
 0xdda   :  { %2983 = vmax.xlane.f32.xlu1 %v2982_v26  ;;  %2989 = vmax.xlane.f32.xlu2 %v2988_v20  ;;  %v2991_v48 = vsel %vm359_vm3, %v2966_v43, -inf }
 0xde0   :  { %v2890_v39 = vpop.f32.mrf.mxu0  ;;  %v2914_v11 = vpop.f32.mrf.mxu1 }
 0xde1   :  { %v2968_v24 = vpop.f32.mrf.mxu3  ;;  %v2985_v53 = vsel %vm359_vm3, %v2914_v11, -inf }
 0xde2   :  { %2992 = vmax.xlane.f32.xlu1 %v2991_v48  ;;  %2986 = vmax.xlane.f32.xlu0 %v2985_v53 }
 0xde8   :  { %v2916_v44 = vpop.f32.mrf.mxu1 }
 0xdf6   :  { %3303 = vrot.lane.b32.xlu0 %v6120_v15, %s5175_s24 }
 0xdfb   :  { %3280 = vrot.lane.b32.xlu1 %v6131_v27, %s5175_s24 }
 0xdfe   :  { %3374 = vrot.lane.b32.xlu0 %v6034_v55, %s5175_s24 }
 0xe36   :  { %v2978_v5 = vpop.xlane.xlu1 %2977 }
 0xe37   :  { %v2996_v25 = vsub.f32 %v2836_v18, %v2978_v5 }
 0xe39   :  { %v3006_v28 = vmul.f32 1.442695, %v2996_v25 }
 0xe3b   :  { %4926 = vpow2.f32 %v3006_v28 }
 0xe3d   :  { %v2972_v60 = vpop.xlane.xlu0 %2971 }
 0xe3e   :  { %v2994_v22 = vsub.f32 %v2784_v52, %v2972_v60 }
 0xe40   :  { %v3002_v2 = vmul.f32 1.442695, %v2994_v22 }
 0xe41   :  { %v6316_v12 = vpop.eup %4926 }
 0xe42   :  { %4928 = vpow2.f32 %v3002_v2  ;;  %v3024_v45 = vsel %vm359_vm3, %v6316_v12, 0.0 }
 0xe43   :  { %3025 = vadd.xlane.f32.xlu2 %v3024_v45 }
 0xe45   :  { %v2975_v1 = vpop.xlane.xlu2 %2974  ;;  %v2981_v31 = vpop.xlane.xlu0 %2980 }
 0xe46   :  { %v2995_v41 = vsub.f32 %v2810_v10, %v2975_v1  ;;  %v2997_v63 = vsub.f32 %v2862_v47, %v2981_v31 }
 0xe48   :  { %v6320_v9 = vpop.eup %4928  ;;  %v3004_v3 = vmul.f32 1.442695, %v2995_v41  ;;  %v3008_v52 = vmul.f32 1.442695, %v2997_v63 }
 0xe49   :  { %v3018_v18 = vsel %vm359_vm3, %v6320_v9, 0.0 }
 0xe4a   :  { %3019 = vadd.xlane.f32.xlu0 %v3018_v18  ;;  %4930 = vpow2.f32 %v3004_v3 }
 0xe4b   :  { %4932 = vpow2.f32 %v3008_v52  ;;  %v3288_v52 = vsel %vm171_vm1, %v6271_v8, 0 }
 0xe4d   :  { %v2984_v13 = vpop.xlane.xlu1 %2983  ;;  %v2990_v10 = vpop.xlane.xlu2 %2989 }
 0xe4e   :  { %v3000_v26 = vsub.f32 %v2940_v56, %v2990_v10 }
 0xe50   :  { %v6324_v35 = vpop.eup %4930  ;;  %v3014_v39 = vmul.f32 1.442695, %v3000_v26 }
 0xe51   :  { %v3021_v50 = vsel %vm359_vm3, %v6324_v35, 0.0  ;;  %v6328_v19 = vpop.eup %4932 }
 0xe52   :  { %3022 = vadd.xlane.f32.xlu1 %v3021_v50  ;;  %v3027_v20 = vsel %vm359_vm3, %v6328_v19, 0.0 }
 0xe55   :  { %v2987_v51 = vpop.xlane.xlu0 %2986  ;;  %v2993_v24 = vpop.xlane.xlu1 %2992 }
 0xe56   :  { %v2999_v58 = vsub.f32 %v2914_v11, %v2987_v51  ;;  %v3001_v11 = vsub.f32 %v2966_v43, %v2993_v24  ;;  %v2998_v43 = vsub.f32 %v6303_v4, %v2984_v13 }
 0xe58   :  { %v3012_v47 = vmul.f32 1.442695, %v2999_v58  ;;  %v3016_v53 = vmul.f32 1.442695, %v3001_v11  ;;  %v3010_v60 = vmul.f32 1.442695, %v2998_v43 }
 0xe5a   :  { %4934 = vpow2.f32 %v3012_v47  ;;  %3028 = vadd.xlane.f32.xlu1 %v3027_v20 }
 0xe5b   :  { %3397 = vrot.lane.b32.xlu2 %v6036_v42, %s5175_s24  ;;  %4936 = vpow2.f32 %v3014_v39 }
 0xe5c   :  { %4938 = vpow2.f32 %v3016_v53 }
 0xe5d   :  { %4940 = vpow2.f32 %v3010_v60 }
 0xe5e   :  { %3236 = vrot.lane.b32.xlu0 %v6053_v21, %s5175_s24 }
 0xe60   :  { %v6336_v48 = vpop.eup %4934 }
 0xe61   :  { %v3033_v56 = vsel %vm359_vm3, %v6336_v48, 0.0  ;;  %v6342_v44 = vpop.eup %4936 }
 0xe62   :  { %3034 = vadd.xlane.f32.xlu1 %v3033_v56  ;;  %v3036_v5 = vsel %vm359_vm3, %v6342_v44, 0.0  ;;  %v6348_v25 = vpop.eup %4938  ;;  %v3311_v56 = vsel %vm171_vm1, %v6278_v34, 0 }
 0xe63   :  { %v3039_v28 = vsel %vm359_vm3, %v6348_v25, 0.0  ;;  %v6357_v22 = vpop.eup %4940 }
 0xe64   :  { %v3030_v2 = vsel %vm359_vm3, %v6357_v22, 0.0 }
 0xe66   :  { %3395 = vrot.lane.b32.xlu0 %v6222_v49, %s5175_s24 }
 0xe68   :  { %v6377_v4 = vpop.permute.xlu0 %3303 }
 0xe6a   :  { %3037 = vadd.xlane.f32.xlu1 %v3036_v5 }
 0xe6d   :  { %v3281_v3 = vpop.permute.xlu1 %3280 }
 0xe6e   :  { %3328 = vrot.lane.b32.xlu0 %v6136_v29, %s5175_s24 }
 0xe70   :  { %v3375_v45 = vpop.permute.xlu0 %3374 }
 0xe71   :  { %v3380_v34 = vsel %vm171_vm1, %v3375_v45, 0 }
 0xe72   :  { %3040 = vadd.xlane.f32.xlu1 %v3039_v28 }
 0xe76   :  { %3349 = vrot.lane.b32.xlu0 %v6175_v16, %s5175_s24 }
 0xe7e   :  { %3577 = vrot.lane.b32.xlu0 %v6018_v0, %s5174_s23 }
 0xe84   :  { %3031 = vadd.xlane.f32.xlu2 %v3030_v2 }
 0xe86   :  { %3598 = vrot.lane.b32.xlu0 %v6136_v29, %s5174_s23 }
 0xe8b   :  { %3259 = vrot.lane.b32.xlu1 %v6064_v23, %s5175_s24 }
 0xe8e   :  { %3619 = vrot.lane.b32.xlu0 %v6141_v37, %s5174_s23 }
 0xe93   :  { %3234 = vrot.lane.b32.xlu1 %v6163_v54, %s5175_s24 }
 0xe9b   :  { %3351 = vrot.lane.b32.xlu1 %v6141_v37, %s5175_s24 }
 0xe9c   :  { %3372 = vrot.lane.b32.xlu2 %v6161_v6, %s5175_s24 }
 0xea3   :  { %3535 = vrot.lane.b32.xlu1 %v6064_v23, %s5174_s23 }
 0xea4   :  { %3257 = vrot.lane.b32.xlu2 %v6229_v40, %s5175_s24 }
 0xeac   :  { %3326 = vrot.lane.b32.xlu2 %v6186_v46, %s5175_s24 }
 0xeb4   :  { %3556 = vrot.lane.b32.xlu2 %v6016_v62, %s5174_s23 }
 0xeb6   :  { %v3026_v1 = vpop.xlane.xlu2 %3025 }
 0xeb7   :  { %4942 = vrcp.f32 %v3026_v1 }
 0xebc   :  { %3514 = vrot.lane.b32.xlu2 %v6053_v21, %s5174_s23 }
 0xebd   :  { %v4943_v31 = vpop.eup %4942  ;;  %v3020_v41 = vpop.xlane.xlu0 %3019 }
 0xebe   :  { %v3052_v63 = vmul.f32 %v4943_v31, %v6316_v12  ;;  %4944 = vrcp.f32 %v3020_v41 }
 0xec0   :  { %v3060_v18 = vpack.c.bf16 %v3052_v63, %v3052_v63  ;;  %v3398_v63 = vpop.permute.xlu2 %3397 }
 0xec2   :  { %4649 = vmatmul.msk.bf16.vlgmr.msrb.gmra.mxu2 %vm458_vm4, %v3060_v18 }
 0xec3   :  { %3297 = vmatpush.bf16.xpose.msrb.mxu2 %v3288_v52  ;;  %v3403_v52 = vsel %vm171_vm1, %v3398_v63, 0 }
 0xec4   :  { %v4945_v50 = vpop.eup %4944  ;;  %3640 = vrot.lane.b32.xlu2 %v6034_v55, %s5174_s23 }
 0xec5   :  { %v3050_v13 = vmul.f32 %v4945_v50, %v6320_v9  ;;  %v3023_v51 = vpop.xlane.xlu1 %3022 }
 0xec6   :  { %4946 = vrcp.f32 %v3023_v51 }
 0xec7   :  { %v3058_v10 = vpack.c.bf16 %v3050_v13, %v3050_v13 }
 0xec9   :  { %4647 = vmatmul.msk.bf16.vlgmr.msrb.gmra.mxu0 %vm458_vm4, %v3058_v10 }
 0xecc   :  { %3661 = vrot.lane.b32.xlu2 %v6036_v42, %s5174_s23  ;;  %v4947_v12 = vpop.eup %4946 }
 0xecd   :  { %v3051_v8 = vmul.f32 %v4947_v12, %v6324_v35  ;;  %v3029_v58 = vpop.xlane.xlu1 %3028 }
 0xece   :  { %4948 = vrcp.f32 %v3029_v58 }
 0xecf   :  { %v3059_v47 = vpack.c.bf16 %v3051_v8, %v3051_v8 }
 0xed0   :  { %v3237_v26 = vpop.permute.xlu0 %3236 }
 0xed1   :  { %v3242_v20 = vsel %vm171_vm1, %v3237_v26, 0  ;;  %4648 = vmatmul.msk.bf16.vlgmr.msrb.gmra.mxu1 %vm458_vm4, %v3059_v47 }
 0xed2   :  { %3251 = vmatpush.bf16.xpose.msrb.mxu0 %v3242_v20 }
 0xed4   :  { %v4949_v9 = vpop.eup %4948 }
 0xed5   :  { %v3053_v39 = vmul.f32 %v4949_v9, %v6328_v19  ;;  %v3035_v24 = vpop.xlane.xlu1 %3034 }
 0xed6   :  { %4950 = vrcp.f32 %v3035_v24 }
 0xed7   :  { %v3061_v11 = vpack.c.bf16 %v3053_v39, %v3053_v39 }
 0xed8   :  { %v3396_v28 = vpop.permute.xlu0 %3395 }
 0xed9   :  { %4650 = vmatmul.msk.bf16.vlgmr.msrb.gmra.mxu3 %vm458_vm4, %v3061_v11 }
 0xeda   :  { %3320 = vmatpush.bf16.xpose.msrb.mxu3 %v3311_v56 }
 0xedc   :  { %v4951_v35 = vpop.eup %4950 }
 0xedd   :  { %v3055_v53 = vmul.f32 %v4951_v35, %v6336_v48  ;;  %v3038_v5 = vpop.xlane.xlu1 %3037 }
 0xede   :  { %4952 = vrcp.f32 %v3038_v5 }
 0xedf   :  { %v3063_v43 = vpack.c.bf16 %v3055_v53, %v3055_v53 }
 0xee0   :  { %v3329_v31 = vpop.permute.xlu0 %3328 }
 0xee1   :  { %4652 = vmatmul.msk.bf16.vlgmr.msra.gmra.mxu1 %vm458_vm4, %v3063_v43  ;;  %v3334_v47 = vsel %vm171_vm1, %v3329_v31, 0 }
 0xee4   :  { %v4953_v60 = vpop.eup %4952 }
 0xee5   :  { %v3056_v19 = vmul.f32 %v4953_v60, %v6342_v44  ;;  %v3041_v2 = vpop.xlane.xlu1 %3040 }
 0xee6   :  { %4954 = vrcp.f32 %v3041_v2 }
 0xee7   :  { %v3064_v1 = vpack.c.bf16 %v3056_v19, %v3056_v19 }
 0xee8   :  { %v3350_v44 = vpop.permute.xlu0 %3349 }
 0xee9   :  { %4653 = vmatmul.msk.bf16.vlgmr.msra.gmra.mxu2 %vm458_vm4, %v3064_v1 }
 0xeea   :  { %3389 = vmatpush.bf16.xpose.msra.mxu2 %v3380_v34 }
 0xeec   :  { %v4955_v41 = vpop.eup %4954 }
 0xeed   :  { %v3057_v48 = vmul.f32 %v4955_v41, %v6348_v25 }
 0xeef   :  { %v3065_v18 = vpack.c.bf16 %v3057_v48, %v3057_v48 }
 0xef0   :  { %v3578_v51 = vpop.permute.xlu0 %3577 }
 0xef1   :  { %4654 = vmatmul.msk.bf16.vlgmr.msra.gmra.mxu3 %vm458_vm4, %v3065_v18  ;;  %v3583_v58 = vsel %vm462_vm2, %v3578_v51, 0 }
 0xef2   :  { %3412 = vmatpush.bf16.xpose.msra.mxu3 %v3403_v52 }
 0xef7   :  { %v3032_v50 = vpop.xlane.xlu2 %3031 }
 0xef8   :  { %4956 = vrcp.f32 %v3032_v50 }
 0xef9   :  { %4657 = vmatmul.msk.bf16.vlgmr.msrb.gmra.mxu2 %vm171_vm1, %v3281_v3 }
 0xefd   :  { %v3260_v13 = vpop.permute.xlu1 %3259 }
 0xefe   :  { %v4957_v45 = vpop.eup %4956  ;;  %v3265_v12 = vsel %vm171_vm1, %v3260_v13, 0 }
 0xeff   :  { %v3054_v10 = vmul.f32 %v4957_v45, %v6357_v22  ;;  %v3373_v25 = vpop.permute.xlu2 %3372  ;;  %3274 = vmatpush.bf16.xpose.msrb.mxu1 %v3265_v12  ;;  %v3599_v22 = vpop.permute.xlu0 %3598 }
 0xf01   :  { %v3062_v8 = vpack.c.bf16 %v3054_v10, %v3054_v10  ;;  %4658 = vmatmul.msk.bf16.vlgmr.msrb.gmra.mxu3 %vm171_vm1, %v6377_v4 }
 0xf02   :  { %3592 = vmatpush.bf16.msrb.mxu3 %v3583_v58 }
 0xf03   :  { %4651 = vmatmul.msk.bf16.vlgmr.msra.gmra.mxu0 %vm458_vm4, %v3062_v8 }
 0xf04   :  { %3343 = vmatpush.bf16.xpose.msra.mxu0 %v3334_v47 }
 0xf05   :  { %v3235_v3 = vpop.permute.xlu1 %3234 }
 0xf07   :  { %v3258_v26 = vpop.permute.xlu2 %3257  ;;  %v3620_v4 = vpop.permute.xlu0 %3619 }
 0xf08   :  { %4656 = vmatmul.msk.bf16.vlgmr.msrb.gmra.mxu1 %vm171_vm1, %v3258_v26  ;;  %v3625_v53 = vsel %vm462_vm2, %v3620_v4, 0 }
 0xf09   :  { %4661 = vmatmul.msk.bf16.vlgmr.msra.gmra.mxu2 %vm171_vm1, %v3373_v25 }
 0xf0d   :  { %v3352_v20 = vpop.permute.xlu1 %3351 }
 0xf0e   :  { %v3357_v9 = vsel %vm171_vm1, %v3352_v20, 0 }
 0xf0f   :  { %v3327_v39 = vpop.permute.xlu2 %3326  ;;  %3366 = vmatpush.bf16.xpose.msra.mxu1 %v3357_v9 }
 0xf11   :  { %4662 = vmatmul.msk.bf16.vlgmr.msra.gmra.mxu3 %vm171_vm1, %v3396_v28  ;;  %v3604_v28 = vsel %vm462_vm2, %v3599_v22, 0 }
 0xf13   :  { %4655 = vmatmul.msk.bf16.vlgmr.msrb.gmra.mxu0 %vm171_vm1, %v3235_v3 }
 0xf15   :  { %v3536_v24 = vpop.permute.xlu1 %3535 }
 0xf16   :  { %v3541_v11 = vsel %vm462_vm2, %v3536_v24, 0 }
 0xf17   :  { %v3557_v56 = vpop.permute.xlu2 %3556  ;;  %3550 = vmatpush.bf16.msrb.mxu1 %v3541_v11 }
 0xf18   :  { %v3562_v35 = vsel %vm462_vm2, %v3557_v56, 0  ;;  %4660 = vmatmul.msk.bf16.vlgmr.msra.gmra.mxu1 %vm171_vm1, %v3350_v44 }
 0xf19   :  { %3571 = vmatpush.bf16.msrb.mxu2 %v3562_v35 }
 0xf1b   :  { %3634 = vmatpush.bf16.msra.mxu1 %v3625_v53 }
 0xf1f   :  { %v3515_v5 = vpop.permute.xlu2 %3514 }
 0xf20   :  { %v3520_v43 = vsel %vm462_vm2, %v3515_v5, 0 }
 0xf21   :  { %3529 = vmatpush.bf16.msrb.mxu0 %v3520_v43 }
 0xf23   :  { %4659 = vmatmul.msk.bf16.vlgmr.msra.gmra.mxu0 %vm171_vm1, %v3327_v39 }
 0xf25   :  { %3613 = vmatpush.bf16.msra.mxu0 %v3604_v28 }
 0xf27   :  { %v3641_v60 = vpop.permute.xlu2 %3640 }
 0xf28   :  { %v3646_v19 = vsel %vm462_vm2, %v3641_v60, 0 }
 0xf29   :  { %3655 = vmatpush.bf16.msra.mxu2 %v3646_v19 }
 0xf2f   :  { %v3662_v2 = vpop.permute.xlu2 %3661 }
 0xf30   :  { %v3667_v1 = vsel %vm462_vm2, %v3662_v2, 0 }
 0xf31   :  { %3676 = vmatpush.bf16.msra.mxu3 %v3667_v1 }
 0xf45   :  { %v6432_v34 = vpop.f32.mrf.mxu2 }
 0xf46   :  { %v6434_v31 = vpop.f32.mrf.mxu0 }
 0xf4d   :  { %v3127_v41 = vpop.f32.mrf.mxu2 }
 0xf4e   :  { %v3085_v48 = vpop.f32.mrf.mxu0  ;;  %v6436_v63 = vpop.f32.mrf.mxu1 }
 0xf56   :  { %v3106_v18 = vpop.f32.mrf.mxu1 }
 0xf5c   :  { %v6438_v52 = vpop.f32.mrf.mxu3 }
 0xf5e   :  { %v6440_v44 = vpop.f32.mrf.mxu1 }
 0xf64   :  { %v3148_v50 = vpop.f32.mrf.mxu3 }
 0xf66   :  { %v3190_v45 = vpop.f32.mrf.mxu1 }
 0xf6c   :  { %v6442_v13 = vpop.f32.mrf.mxu2 }
 0xf74   :  { %v3211_v51 = vpop.f32.mrf.mxu2  ;;  %v6444_v10 = vpop.f32.mrf.mxu3 }
 0xf7c   :  { %v3232_v12 = vpop.f32.mrf.mxu3  ;;  %v6446_v25 = vpop.f32.mrf.mxu2 }
 0xf7d   :  { %v3424_v48 = vsel %vm359_vm3, %v6446_v25, -inf }
 0xf80   :  { %v6448_v8 = vpop.f32.mrf.mxu0 }
 0xf84   :  { %v3301_v58 = vpop.f32.mrf.mxu2  ;;  %v3322_v47 = vpop.f32.mrf.mxu3 }
 0xf85   :  { %v3276_v3 = vpop.f32.mrf.mxu1  ;;  %v3427_v60 = vsel %vm359_vm3, %v3322_v47, -inf }
 0xf86   :  { %v3421_v26 = vsel %vm359_vm3, %v3276_v3, -inf }
 0xf87   :  { %3422 = vmax.xlane.f32.xlu1 %v3421_v26 }
 0xf88   :  { %v3169_v22 = vpop.f32.mrf.mxu0 }
 0xf8c   :  { %v3324_v20 = vpop.f32.mrf.mxu3  ;;  %v6451_v9 = vpop.f32.mrf.mxu2 }
 0xf8d   :  { %v3278_v39 = vpop.f32.mrf.mxu1  ;;  %v3436_v1 = vsel %vm359_vm3, %v6451_v9, -inf }
 0xf90   :  { %v3253_v4 = vpop.f32.mrf.mxu0 }
 0xf91   :  { %v3418_v24 = vsel %vm359_vm3, %v3253_v4, -inf }
 0xf92   :  { %3419 = vmax.xlane.f32.xlu0 %v3418_v24 }
 0xf94   :  { %v3393_v11 = vpop.f32.mrf.mxu2  ;;  %v6454_v56 = vpop.f32.mrf.mxu3 }
 0xf95   :  { %v3368_v35 = vpop.f32.mrf.mxu1  ;;  %v3439_v18 = vsel %vm359_vm3, %v6454_v56, -inf }
 0xf96   :  { %v3433_v53 = vsel %vm359_vm3, %v3368_v35, -inf }
 0xf97   :  { %3434 = vmax.xlane.f32.xlu2 %v3433_v53 }
 0xf98   :  { %v3255_v5 = vpop.f32.mrf.mxu0 }
 0xf9c   :  { %v3416_v43 = vpop.f32.mrf.mxu3 }
 0xf9d   :  { %v3370_v28 = vpop.f32.mrf.mxu1 }
 0xf9f   :  { %3428 = vmax.xlane.f32.xlu2 %v3427_v60 }
 0xfa0   :  { %v3345_v19 = vpop.f32.mrf.mxu0 }
 0xfa1   :  { %v3430_v2 = vsel %vm359_vm3, %v3345_v19, -inf }
 0xfa2   :  { %3431 = vmax.xlane.f32.xlu1 %v3430_v2 }
 0xfa6   :  { %3753 = vrot.lane.b32.xlu0 %v6018_v0, %s5177_s25 }
 0xfa7   :  { %3437 = vmax.xlane.f32.xlu2 %v3436_v1 }
 0xfa8   :  { %v3347_v41 = vpop.f32.mrf.mxu0 }
 0xfaa   :  { %3425 = vmax.xlane.f32.xlu1 %v3424_v48 }
 0xfbf   :  { %3730 = vrot.lane.b32.xlu2 %v6016_v62, %s5177_s25 }
 0xfd0   :  { %3440 = vmax.xlane.f32.xlu0 %v3439_v18 }
 0xffa   :  { %v3423_v50 = vpop.xlane.xlu1 %3422 }
 0xffb   :  { %v3443_v12 = vsub.f32 %v3276_v3, %v3423_v50 }
 0xffd   :  { %v3452_v22 = vmul.f32 1.442695, %v3443_v12 }
0x1005   :  { %v3420_v45 = vpop.xlane.xlu0 %3419 }
0x1006   :  { %v3442_v51 = vsub.f32 %v3253_v4, %v3420_v45 }
0x1008   :  { %v3450_v58 = vmul.f32 1.442695, %v3442_v51 }
0x100a   :  { %4958 = vpow2.f32 %v3450_v58  ;;  %v3435_v26 = vpop.xlane.xlu2 %3434 }
0x100b   :  { %4960 = vpow2.f32 %v3452_v22  ;;  %v3447_v39 = vsub.f32 %v3368_v35, %v3435_v26 }
0x100d   :  { %v3460_v11 = vmul.f32 1.442695, %v3447_v39 }
0x100f   :  { %4962 = vpow2.f32 %v3460_v11 }
0x1010   :  { %v6469_v20 = vpop.eup %4958 }
0x1011   :  { %v3466_v24 = vsel %vm359_vm3, %v6469_v20, 0.0  ;;  %v6473_v43 = vpop.eup %4960 }
0x1012   :  { %3467 = vadd.xlane.f32.xlu1 %v3466_v24  ;;  %v3429_v53 = vpop.xlane.xlu2 %3428  ;;  %v3469_v60 = vsel %vm359_vm3, %v6473_v43, 0.0 }
0x1013   :  { %v3445_v3 = vsub.f32 %v3322_v47, %v3429_v53 }
0x1015   :  { %v3432_v5 = vpop.xlane.xlu1 %3431  ;;  %v3456_v2 = vmul.f32 1.442695, %v3445_v3  ;;  %v6477_v1 = vpop.eup %4962 }
0x1016   :  { %v3446_v28 = vsub.f32 %v3345_v19, %v3432_v5  ;;  %v3481_v47 = vsel %vm359_vm3, %v6477_v1, 0.0 }
0x1018   :  { %v3458_v4 = vmul.f32 1.442695, %v3446_v28  ;;  %v6508_v12 = vpop.permute.xlu0 %3753 }
0x101a   :  { %4964 = vpow2.f32 %v3458_v4  ;;  %3470 = vadd.xlane.f32.xlu1 %v3469_v60  ;;  %v3438_v22 = vpop.xlane.xlu2 %3437 }
0x101b   :  { %4966 = vpow2.f32 %v3456_v2 }
0x101d   :  { %v3426_v35 = vpop.xlane.xlu1 %3425 }
0x101e   :  { %v3444_v41 = vsub.f32 %v6446_v25, %v3426_v35 }
0x1020   :  { %v6480_v48 = vpop.eup %4964  ;;  %v3454_v18 = vmul.f32 1.442695, %v3444_v41 }
0x1021   :  { %v3478_v19 = vsel %vm359_vm3, %v6480_v48, 0.0  ;;  %v6486_v50 = vpop.eup %4966 }
0x1022   :  { %4968 = vpow2.f32 %v3454_v18  ;;  %3479 = vadd.xlane.f32.xlu2 %v3478_v19  ;;  %3482 = vadd.xlane.f32.xlu1 %v3481_v47  ;;  %v3475_v51 = vsel %vm359_vm3, %v6486_v50, 0.0  ;;  %v3731_v5 = vpop.permute.xlu2 %3730 }
0x1028   :  { %v6488_v45 = vpop.eup %4968 }
0x1029   :  { %v3472_v25 = vsel %vm359_vm3, %v6488_v45, 0.0 }
0x102a   :  { %3473 = vadd.xlane.f32.xlu0 %v3472_v25  ;;  %3476 = vadd.xlane.f32.xlu1 %v3475_v51 }
0x103a   :  { %3707 = vrot.lane.b32.xlu2 %v6064_v23, %s5177_s25 }
0x103e   :  { %3751 = vrot.lane.b32.xlu0 %v6120_v15, %s5177_s25 }
0x1042   :  { %3845 = vrot.lane.b32.xlu2 %v6036_v42, %s5177_s25 }
0x1043   :  { %3728 = vrot.lane.b32.xlu1 %v6131_v27, %s5177_s25  ;;  %v3441_v15 = vpop.xlane.xlu0 %3440  ;;  %v3448_v27 = vsub.f32 %v6451_v9, %v3438_v22 }
0x1044   :  { %v3449_v58 = vsub.f32 %v6454_v56, %v3441_v15 }
0x1045   :  { %v3462_v24 = vmul.f32 1.442695, %v3448_v27 }
0x1046   :  { %3684 = vrot.lane.b32.xlu0 %v6053_v21, %s5177_s25  ;;  %v3464_v26 = vmul.f32 1.442695, %v3449_v58 }
0x1048   :  { %4970 = vpow2.f32 %v3464_v26 }
0x1049   :  { %4972 = vpow2.f32 %v3462_v24  ;;  %v3736_v24 = vsel %vm171_vm1, %v3731_v5, 0 }
0x104a   :  { %3820 = vrot.lane.b32.xlu2 %v6161_v6, %s5177_s25 }
0x104e   :  { %3822 = vrot.lane.b32.xlu0 %v6034_v55, %s5177_s25  ;;  %v6514_v39 = vpop.eup %4970 }
0x104f   :  { %v3487_v6 = vsel %vm359_vm3, %v6514_v39, 0.0  ;;  %v6518_v11 = vpop.eup %4972 }
0x1050   :  { %v3484_v53 = vsel %vm359_vm3, %v6518_v11, 0.0 }
0x1052   :  { %3799 = vrot.lane.b32.xlu2 %v6141_v37, %s5177_s25 }
0x106d   :  { %3488 = vadd.xlane.f32.xlu1 %v3487_v6  ;;  %v3759_v6 = vsel %vm171_vm1, %v6508_v12, 0 }
0x1078   :  { %3485 = vadd.xlane.f32.xlu0 %v3484_v53 }
0x1085   :  { %v3468_v56 = vpop.xlane.xlu1 %3467 }
0x1086   :  { %4974 = vrcp.f32 %v3468_v56  ;;  %3705 = vrot.lane.b32.xlu1 %v6229_v40, %s5177_s25 }
0x108c   :  { %v4975_v9 = vpop.eup %4974  ;;  %3682 = vrot.lane.b32.xlu0 %v6163_v54, %s5177_s25 }
0x108d   :  { %v3498_v28 = vmul.f32 %v4975_v9, %v6469_v20  ;;  %v3471_v3 = vpop.xlane.xlu1 %3470 }
0x108e   :  { %4976 = vrcp.f32 %v3471_v3  ;;  %3776 = vrot.lane.b32.xlu1 %v6136_v29, %s5177_s25 }
0x108f   :  { %v3506_v4 = vpack.c.bf16 %v3498_v28, %v3498_v28 }
0x1091   :  { %4663 = vmatmul.msk.bf16.vlgmr.msrb.gmra.mxu0 %vm458_vm4, %v3506_v4 }
0x1094   :  { %v4977_v60 = vpop.eup %4976  ;;  %3843 = vrot.lane.b32.xlu0 %v6222_v49, %s5177_s25 }
0x1095   :  { %v3499_v40 = vmul.f32 %v4977_v60, %v6473_v43  ;;  %v3483_v2 = vpop.xlane.xlu1 %3482  ;;  %v3480_v35 = vpop.xlane.xlu2 %3479 }
0x1096   :  { %3797 = vrot.lane.b32.xlu1 %v6175_v16, %s5177_s25  ;;  %4978 = vrcp.f32 %v3480_v35 }
0x1097   :  { %v3507_v54 = vpack.c.bf16 %v3499_v40, %v3499_v40  ;;  %4980 = vrcp.f32 %v3483_v2 }
0x1099   :  { %4664 = vmatmul.msk.bf16.vlgmr.msrb.gmra.mxu1 %vm458_vm4, %v3507_v54 }
0x109c   :  { %3774 = vrot.lane.b32.xlu0 %v6186_v46, %s5177_s25  ;;  %v4979_v20 = vpop.eup %4978 }
0x109d   :  { %v3474_v41 = vpop.xlane.xlu0 %3473  ;;  %v3477_v18 = vpop.xlane.xlu1 %3476  ;;  %v3502_v49 = vmul.f32 %v4979_v20, %v6480_v48 }
0x109e   :  { %4982 = vrcp.f32 %v3474_v41  ;;  %v3708_v43 = vpop.permute.xlu2 %3707  ;;  %v4981_v47 = vpop.eup %4980 }
0x109f   :  { %4984 = vrcp.f32 %v3477_v18  ;;  %v3713_v19 = vsel %vm171_vm1, %v3708_v43, 0  ;;  %v3510_v16 = vpack.c.bf16 %v3502_v49, %v3502_v49  ;;  %v3503_v25 = vmul.f32 %v4981_v47, %v6477_v1 }
0x10a0   :  { %3722 = vmatpush.bf16.xpose.msrb.mxu1 %v3713_v19 }
0x10a1   :  { %4667 = vmatmul.msk.bf16.vlgmr.msra.gmra.mxu0 %vm458_vm4, %v3510_v16  ;;  %v3511_v48 = vpack.c.bf16 %v3503_v25, %v3503_v25 }
0x10a4   :  { %v4983_v51 = vpop.eup %4982 }
0x10a5   :  { %v4985_v15 = vpop.eup %4984  ;;  %v3500_v46 = vmul.f32 %v4983_v51, %v6488_v45 }
0x10a6   :  { %v3501_v58 = vmul.f32 %v4985_v15, %v6486_v50  ;;  %v3846_v26 = vpop.permute.xlu2 %3845 }
0x10a7   :  { %v3508_v22 = vpack.c.bf16 %v3500_v46, %v3500_v46  ;;  %v3851_v2 = vsel %vm171_vm1, %v3846_v26, 0 }
0x10a8   :  { %v3509_v27 = vpack.c.bf16 %v3501_v58, %v3501_v58 }
0x10a9   :  { %4665 = vmatmul.msk.bf16.vlgmr.msrb.gmra.mxu2 %vm458_vm4, %v3508_v22  ;;  %4668 = vmatmul.msk.bf16.vlgmr.msra.gmra.mxu1 %vm458_vm4, %v3511_v48 }
0x10aa   :  { %4666 = vmatmul.msk.bf16.vlgmr.msrb.gmra.mxu3 %vm458_vm4, %v3509_v27  ;;  %3745 = vmatpush.bf16.xpose.msrb.mxu2 %v3736_v24 }
0x10ab   :  { %3768 = vmatpush.bf16.xpose.msrb.mxu3 %v3759_v6 }
0x10ae   :  { %v3821_v1 = vpop.permute.xlu2 %3820 }
0x10b0   :  { %v3752_v45 = vpop.permute.xlu0 %3751 }
0x10b5   :  { %v3729_v5 = vpop.permute.xlu1 %3728 }
0x10b6   :  { %v3800_v50 = vpop.permute.xlu2 %3799 }
0x10b7   :  { %v3805_v53 = vsel %vm171_vm1, %v3800_v50, 0 }
0x10b8   :  { %3814 = vmatpush.bf16.xpose.msra.mxu1 %v3805_v53  ;;  %v3685_v56 = vpop.permute.xlu0 %3684 }
0x10b9   :  { %v3690_v9 = vsel %vm171_vm1, %v3685_v56, 0 }
0x10ba   :  { %3699 = vmatpush.bf16.xpose.msrb.mxu0 %v3690_v9 }
0x10c0   :  { %v3823_v3 = vpop.permute.xlu0 %3822 }
0x10c1   :  { %v3828_v41 = vsel %vm171_vm1, %v3823_v3, 0 }
0x10e0   :  { %v3489_v28 = vpop.xlane.xlu1 %3488 }
0x10e1   :  { %4986 = vrcp.f32 %v3489_v28 }
0x10e7   :  { %v4987_v4 = vpop.eup %4986 }
0x10e8   :  { %v3505_v12 = vmul.f32 %v4987_v4, %v6514_v39 }
0x10ea   :  { %v3513_v60 = vpack.c.bf16 %v3505_v12, %v3505_v12 }
0x10eb   :  { %v3486_v40 = vpop.xlane.xlu0 %3485 }
0x10ec   :  { %4988 = vrcp.f32 %v3486_v40  ;;  %4670 = vmatmul.msk.bf16.vlgmr.msra.gmra.mxu3 %vm458_vm4, %v3513_v60 }
0x10ed   :  { %3860 = vmatpush.bf16.xpose.msra.mxu3 %v3851_v2 }
0x10f2   :  { %v4989_v35 = vpop.eup %4988 }
0x10f3   :  { %v3504_v54 = vmul.f32 %v4989_v35, %v6518_v11 }
0x10f5   :  { %v3512_v20 = vpack.c.bf16 %v3504_v54, %v3504_v54 }
0x10f7   :  { %4669 = vmatmul.msk.bf16.vlgmr.msra.gmra.mxu2 %vm458_vm4, %v3512_v20 }
0x10f8   :  { %3837 = vmatpush.bf16.xpose.msra.mxu2 %v3828_v41  ;;  %v3706_v18 = vpop.permute.xlu1 %3705 }
0x10f9   :  { %4672 = vmatmul.msk.bf16.vlgmr.msrb.gmra.mxu1 %vm171_vm1, %v3706_v18 }
0x10fc   :  { %4674 = vmatmul.msk.bf16.vlgmr.msrb.gmra.mxu3 %vm171_vm1, %v3752_v45 }
0x10fe   :  { %v3683_v39 = vpop.permute.xlu0 %3682 }
0x10ff   :  { %4671 = vmatmul.msk.bf16.vlgmr.msrb.gmra.mxu0 %vm171_vm1, %v3683_v39 }
0x1100   :  { %v3777_v49 = vpop.permute.xlu1 %3776 }
0x1101   :  { %v3782_v43 = vsel %vm171_vm1, %v3777_v49, 0 }
0x1102   :  { %3791 = vmatpush.bf16.xpose.msra.mxu0 %v3782_v43 }
0x1106   :  { %v3844_v19 = vpop.permute.xlu0 %3843 }
0x1107   :  { %4673 = vmatmul.msk.bf16.vlgmr.msrb.gmra.mxu2 %vm171_vm1, %v3729_v5 }
0x1108   :  { %v3798_v11 = vpop.permute.xlu1 %3797 }
0x1109   :  { %4676 = vmatmul.msk.bf16.vlgmr.msra.gmra.mxu1 %vm171_vm1, %v3798_v11 }
0x110c   :  { %4678 = vmatmul.msk.bf16.vlgmr.msra.gmra.mxu3 %vm171_vm1, %v3844_v19 }
0x110e   :  { %v6565_v47 = vpop.f32.mrf.mxu0  ;;  %v3775_v16 = vpop.permute.xlu0 %3774 }
0x110f   :  { %4675 = vmatmul.msk.bf16.vlgmr.msra.gmra.mxu0 %vm171_vm1, %v3775_v16 }
0x1116   :  { %v3533_v25 = vpop.f32.mrf.mxu0  ;;  %v6568_v51 = vpop.f32.mrf.mxu1 }
0x1117   :  { %4677 = vmatmul.msk.bf16.vlgmr.msra.gmra.mxu2 %vm171_vm1, %v3821_v1 }
0x111e   :  { %v3554_v15 = vpop.f32.mrf.mxu1  ;;  %v6571_v46 = vpop.f32.mrf.mxu0 }
0x1126   :  { %v6573_v58 = vpop.f32.mrf.mxu1  ;;  %v3617_v26 = vpop.f32.mrf.mxu0 }
0x112c   :  { %v6575_v48 = vpop.f32.mrf.mxu2 }
0x112d   :  { %v6577_v22 = vpop.f32.mrf.mxu3 }
0x112e   :  { %v3638_v27 = vpop.f32.mrf.mxu1 }
0x1134   :  { %v3575_v24 = vpop.f32.mrf.mxu2 }
0x1135   :  { %v3596_v6 = vpop.f32.mrf.mxu3 }
0x116f   :  { %v6579_v45 = vpop.f32.mrf.mxu3 }
0x1176   :  { %v3724_v50 = vpop.f32.mrf.mxu1 }
0x1177   :  { %v3680_v53 = vpop.f32.mrf.mxu3  ;;  %v3869_v56 = vsel %vm359_vm3, %v3724_v50, -inf }
0x1178   :  { %3870 = vmax.xlane.f32.xlu2 %v3869_v56 }
0x117a   :  { %v6582_v1 = vpop.f32.mrf.mxu2 }
0x117c   :  { %v3701_v9 = vpop.f32.mrf.mxu0 }
0x117d   :  { %v3866_v5 = vsel %vm359_vm3, %v3701_v9, -inf }
0x117e   :  { %3867 = vmax.xlane.f32.xlu1 %v3866_v5  ;;  %v3726_v28 = vpop.f32.mrf.mxu1 }
0x117f   :  { %v6585_v3 = vpop.f32.mrf.mxu3 }
0x1180   :  { %v3875_v15 = vsel %vm359_vm3, %v6585_v3, -inf }
0x1182   :  { %v3659_v4 = vpop.f32.mrf.mxu2 }
0x1184   :  { %v3703_v12 = vpop.f32.mrf.mxu0 }
0x1186   :  { %v3816_v60 = vpop.f32.mrf.mxu1 }
0x1187   :  { %v3772_v40 = vpop.f32.mrf.mxu3  ;;  %v3881_v2 = vsel %vm359_vm3, %v3816_v60, -inf }
0x1188   :  { %3882 = vmax.xlane.f32.xlu0 %v3881_v2 }
0x118a   :  { %v3747_v35 = vpop.f32.mrf.mxu2 }
0x118b   :  { %v3872_v43 = vsel %vm359_vm3, %v3747_v35, -inf }
0x118c   :  { %v3793_v54 = vpop.f32.mrf.mxu0 }
0x118d   :  { %v3878_v20 = vsel %vm359_vm3, %v3793_v54, -inf }
0x118e   :  { %3879 = vmax.xlane.f32.xlu2 %v3878_v20  ;;  %v3818_v41 = vpop.f32.mrf.mxu1 }
0x118f   :  { %v6589_v18 = vpop.f32.mrf.mxu3 }
0x1190   :  { %v3887_v25 = vsel %vm359_vm3, %v6589_v18, -inf }
0x1192   :  { %v3749_v39 = vpop.f32.mrf.mxu2 }
0x1194   :  { %v3795_v49 = vpop.f32.mrf.mxu0 }
0x1196   :  { %3873 = vmax.xlane.f32.xlu2 %v3872_v43 }
0x1197   :  { %3962 = vrot.lane.b32.xlu1 %v6053_v21, %s5178_s26  ;;  %v3864_v19 = vpop.f32.mrf.mxu3 }
0x119a   :  { %v6594_v11 = vpop.f32.mrf.mxu2 }
0x119c   :  { %4025 = vrot.lane.b32.xlu0 %v6018_v0, %s5178_s26 }
0x11a2   :  { %v3841_v16 = vpop.f32.mrf.mxu2 }
0x11ae   :  { %4004 = vrot.lane.b32.xlu2 %v6016_v62, %s5178_s26 }
0x11c1   :  { %3888 = vmax.xlane.f32.xlu1 %v3887_v25 }
0x11c6   :  { %3876 = vmax.xlane.f32.xlu0 %v3875_v15 }
0x11da   :  { %3983 = vrot.lane.b32.xlu0 %v6064_v23, %s5178_s26 }
0x11eb   :  { %v3871_v21 = vpop.xlane.xlu2 %3870 }
0x11ec   :  { %v3891_v26 = vsub.f32 %v3724_v50, %v3871_v21  ;;  %v3884_v50 = vsel %vm359_vm3, %v6594_v11, -inf }
0x11ee   :  { %v3900_v27 = vmul.f32 1.442695, %v3891_v26 }
0x11f0   :  { %4990 = vpow2.f32 %v3900_v27 }
0x11f1   :  { %v3868_v24 = vpop.xlane.xlu1 %3867 }
0x11f2   :  { %v3890_v6 = vsub.f32 %v3701_v9, %v3868_v24 }
0x11f4   :  { %v3898_v5 = vmul.f32 1.442695, %v3890_v6 }
0x11f6   :  { %v6606_v0 = vpop.eup %4990 }
0x11f7   :  { %v3917_v62 = vsel %vm359_vm3, %v6606_v0, 0.0 }
0x11f8   :  { %3918 = vadd.xlane.f32.xlu1 %v3917_v62 }
0x11fb   :  { %v3883_v53 = vpop.xlane.xlu0 %3882 }
0x11fc   :  { %v3895_v56 = vsub.f32 %v3816_v60, %v3883_v53 }
0x11fe   :  { %v3908_v28 = vmul.f32 1.442695, %v3895_v56 }
0x1200   :  { %4992 = vpow2.f32 %v3908_v28 }
0x1201   :  { %v3880_v4 = vpop.xlane.xlu2 %3879  ;;  %4994 = vpow2.f32 %v3898_v5 }
0x1202   :  { %v3894_v23 = vsub.f32 %v3793_v54, %v3880_v4 }
0x1204   :  { %3885 = vmax.xlane.f32.xlu0 %v3884_v50  ;;  %v3906_v40 = vmul.f32 1.442695, %v3894_v23 }
0x1206   :  { %v6612_v12 = vpop.eup %4992  ;;  %4996 = vpow2.f32 %v3906_v40 }
0x1207   :  { %v3929_v2 = vsel %vm359_vm3, %v6612_v12, 0.0  ;;  %v6616_v20 = vpop.eup %4994 }
0x1208   :  { %3930 = vadd.xlane.f32.xlu2 %v3929_v2  ;;  %v3914_v54 = vsel %vm359_vm3, %v6616_v20, 0.0 }
0x1209   :  { %v3963_v9 = vpop.permute.xlu1 %3962  ;;  %v3874_v60 = vpop.xlane.xlu2 %3873 }
0x120a   :  { %v3968_v41 = vsel %vm462_vm2, %v3963_v9, 0  ;;  %v3892_v39 = vsub.f32 %v3747_v35, %v3874_v60 }
0x120b   :  { %3977 = vmatpush.bf16.msrb.mxu0 %v3968_v41 }
0x120c   :  { %v3902_v49 = vmul.f32 1.442695, %v3892_v39  ;;  %3915 = vadd.xlane.f32.xlu0 %v3914_v54  ;;  %v6622_v16 = vpop.eup %4996 }
0x120d   :  { %v3926_v35 = vsel %vm359_vm3, %v6622_v16, 0.0 }
0x120e   :  { %4998 = vpow2.f32 %v3902_v49  ;;  %v4026_v43 = vpop.permute.xlu0 %4025 }
0x120f   :  { %v4031_v19 = vsel %vm462_vm2, %v4026_v43, 0 }
0x1210   :  { %4040 = vmatpush.bf16.msrb.mxu3 %v4031_v19 }
0x1211   :  { %v4005_v25 = vpop.permute.xlu2 %4004 }
0x1212   :  { %v4010_v15 = vsel %vm462_vm2, %v4005_v25, 0 }
0x1213   :  { %4019 = vmatpush.bf16.msrb.mxu2 %v4010_v15 }
0x1214   :  { %v4999_v21 = vpop.eup %4998  ;;  %3927 = vadd.xlane.f32.xlu0 %v3926_v35 }
0x1215   :  { %v3920_v26 = vsel %vm359_vm3, %v4999_v21, 0.0 }
0x1216   :  { %3921 = vadd.xlane.f32.xlu1 %v3920_v26 }
0x1228   :  { %4046 = vrot.lane.b32.xlu0 %v6136_v29, %s5178_s26 }
0x1230   :  { %4067 = vrot.lane.b32.xlu0 %v6141_v37, %s5178_s26 }
0x1234   :  { %v3889_v27 = vpop.xlane.xlu1 %3888 }
0x1235   :  { %v3897_v24 = vsub.f32 %v6589_v18, %v3889_v27 }
0x1237   :  { %v3912_v62 = vmul.f32 1.442695, %v3897_v24 }
0x1238   :  { %4142 = vrot.lane.b32.xlu0 %v6432_v34, %s5167_s4 }
0x1239   :  { %5000 = vpow2.f32 %v3912_v62  ;;  %v3877_v6 = vpop.xlane.xlu0 %3876 }
0x123a   :  { %v3893_v53 = vsub.f32 %v6585_v3, %v3877_v6 }
0x123c   :  { %v3904_v56 = vmul.f32 1.442695, %v3893_v53 }
0x123e   :  { %5002 = vpow2.f32 %v3904_v56 }
0x123f   :  { %v6636_v5 = vpop.eup %5000 }
0x1240   :  { %4148 = vrot.lane.b32.xlu0 %v6440_v44, %s5167_s4  ;;  %v3935_v29 = vsel %vm359_vm3, %v6636_v5, 0.0 }
0x1241   :  { %3936 = vadd.xlane.f32.xlu1 %v3935_v29 }
0x1244   :  { %v6642_v37 = vpop.eup %5002 }
0x1245   :  { %v3923_v34 = vsel %vm359_vm3, %v6642_v37, 0.0 }
0x1246   :  { %3924 = vadd.xlane.f32.xlu2 %v3923_v34 }
0x1248   :  { %4170 = vrot.lane.b32.xlu0 %v6565_v47, %s5180_s28 }
0x124c   :  { %v3984_v3 = vpop.permute.xlu0 %3983 }
0x124d   :  { %v3989_v18 = vsel %vm462_vm2, %v3984_v3, 0 }
0x124e   :  { %3998 = vmatpush.bf16.msrb.mxu1 %v3989_v18 }
0x1250   :  { %4176 = vrot.lane.b32.xlu0 %v6577_v22, %s5180_s28 }
0x1258   :  { %4182 = vrot.lane.b32.xlu0 %v6582_v1, %s5180_s28 }
0x125a   :  { %4088 = vrot.lane.b32.xlu1 %v6034_v55, %s5178_s26 }
0x1262   :  { %4138 = vrot.lane.b32.xlu1 %v6434_v31, %s5167_s4 }
0x126a   :  { %4144 = vrot.lane.b32.xlu1 %v6438_v52, %s5167_s4 }
0x126b   :  { %v3919_v44 = vpop.xlane.xlu1 %3918 }
0x126c   :  { %5004 = vrcp.f32 %v3919_v44 }
0x1272   :  { %v5005_v47 = vpop.eup %5004  ;;  %4150 = vrot.lane.b32.xlu1 %v6442_v13, %s5167_s4 }
0x1273   :  { %v3947_v22 = vmul.f32 %v5005_v47, %v6606_v0 }
0x1275   :  { %v3955_v28 = vpack.c.bf16 %v3947_v22, %v3947_v22 }
0x1277   :  { %4680 = vmatmul.msk.bf16.vlgmr.msrb.gmra.mxu1 %vm458_vm4, %v3955_v28  ;;  %v3886_v1 = vpop.xlane.xlu0 %3885 }
0x1278   :  { %v3896_v55 = vsub.f32 %v6594_v11, %v3886_v1 }
0x127a   :  { %v3910_v4 = vmul.f32 1.442695, %v3896_v55  ;;  %4172 = vrot.lane.b32.xlu1 %v6568_v51, %s5180_s28 }
0x127b   :  { %v3931_v9 = vpop.xlane.xlu2 %3930 }
0x127c   :  { %5006 = vpow2.f32 %v3910_v4 }
0x127f   :  { %v3916_v31 = vpop.xlane.xlu0 %3915 }
0x1280   :  { %5008 = vrcp.f32 %v3916_v31 }
0x1282   :  { %v6666_v52 = vpop.eup %5006  ;;  %4178 = vrot.lane.b32.xlu1 %v6571_v46, %s5180_s28 }
0x1283   :  { %v3932_v13 = vsel %vm359_vm3, %v6666_v52, 0.0 }
0x1284   :  { %3933 = vadd.xlane.f32.xlu2 %v3932_v13 }
0x1286   :  { %v5009_v0 = vpop.eup %5008 }
0x1287   :  { %v3946_v23 = vmul.f32 %v5009_v0, %v6616_v20  ;;  %v3928_v51 = vpop.xlane.xlu0 %3927 }
0x1289   :  { %v3954_v11 = vpack.c.bf16 %v3946_v23, %v3946_v23  ;;  %v3922_v50 = vpop.xlane.xlu1 %3921 }
0x128a   :  { %5010 = vrcp.f32 %v3922_v50  ;;  %4184 = vrot.lane.b32.xlu1 %v6579_v45, %s5180_s28 }
0x128b   :  { %4679 = vmatmul.msk.bf16.vlgmr.msrb.gmra.mxu0 %vm458_vm4, %v3954_v11  ;;  %5012 = vrcp.f32 %v3928_v51 }
0x128c   :  { %5014 = vrcp.f32 %v3931_v9 }
0x1290   :  { %v5011_v40 = vpop.eup %5010 }
0x1291   :  { %v3948_v2 = vmul.f32 %v5011_v40, %v4999_v21  ;;  %v5013_v60 = vpop.eup %5012 }
0x1292   :  { %v3950_v20 = vmul.f32 %v5013_v60, %v6622_v16  ;;  %v5015_v54 = vpop.eup %5014 }
0x1293   :  { %v3956_v46 = vpack.c.bf16 %v3948_v2, %v3948_v2  ;;  %v3951_v49 = vmul.f32 %v5015_v54, %v6612_v12 }
0x1294   :  { %v3958_v45 = vpack.c.bf16 %v3950_v20, %v3950_v20 }
0x1295   :  { %4681 = vmatmul.msk.bf16.vlgmr.msrb.gmra.mxu2 %vm458_vm4, %v3956_v46  ;;  %v3959_v16 = vpack.c.bf16 %v3951_v49, %v3951_v49 }
0x129a   :  { %v4047_v41 = vpop.permute.xlu0 %4046 }
0x129b   :  { %v4052_v39 = vsel %vm462_vm2, %v4047_v41, 0 }
0x129c   :  { %4109 = vrot.lane.b32.xlu2 %v6036_v42, %s5178_s26  ;;  %4061 = vmatpush.bf16.msra.mxu0 %v4052_v39  ;;  %s4512_s26 = sshll.u32 %s6811_s9, 4  ;;  %s4513_s26 = int_to_ptr.hbm [resolvable:$true] %s4512_s26 }
0x129f   :  { %4683 = vmatmul.msk.bf16.vlgmr.msra.gmra.mxu0 %vm458_vm4, %v3958_v45 }
0x12a2   :  { %v4068_v43 = vpop.permute.xlu0 %4067 }
0x12a3   :  { %v4073_v19 = vsel %vm462_vm2, %v4068_v43, 0 }
0x12a4   :  { %4140 = vrot.lane.b32.xlu2 %v6436_v63, %s5167_s4  ;;  %4082 = vmatpush.bf16.msra.mxu1 %v4073_v19 }
0x12a7   :  { %4684 = vmatmul.msk.bf16.vlgmr.msra.gmra.mxu1 %vm458_vm4, %v3959_v16 }
0x12aa   :  { %v6693_v12 = vpop.permute.xlu0 %4142 }
0x12ac   :  { %4146 = vrot.lane.b32.xlu2 %v6448_v8, %s5167_s4 }
0x12b2   :  { %v6699_v8 = vpop.permute.xlu0 %4148 }
0x12b4   :  { %4152 = vrot.lane.b32.xlu2 %v6444_v10, %s5167_s4  ;;  %v3937_v35 = vpop.xlane.xlu1 %3936 }
0x12b9   :  { %v3925_v42 = vpop.xlane.xlu2 %3924 }
0x12ba   :  { %5016 = vrcp.f32 %v3925_v42  ;;  %v4171_v26 = vpop.permute.xlu0 %4170 }
0x12bb   :  { %5018 = vrcp.f32 %v3937_v35 }
0x12bc   :  { %4174 = vrot.lane.b32.xlu2 %v6575_v48, %s5180_s28 }
0x12c0   :  { %v5017_v25 = vpop.eup %5016 }
0x12c1   :  { %v3949_v63 = vmul.f32 %v5017_v25, %v6642_v37  ;;  %v5019_v56 = vpop.eup %5018 }
0x12c2   :  { %v4177_v24 = vpop.permute.xlu0 %4176  ;;  %v3953_v34 = vmul.f32 %v5019_v56, %v6636_v5 }
0x12c3   :  { %v3957_v15 = vpack.c.bf16 %v3949_v63, %v3949_v63 }
0x12c4   :  { %4180 = vrot.lane.b32.xlu2 %v6573_v58, %s5180_s28  ;;  %v3961_v47 = vpack.c.bf16 %v3953_v34, %v3953_v34 }
0x12c5   :  { %4682 = vmatmul.msk.bf16.vlgmr.msrb.gmra.mxu3 %vm458_vm4, %v3957_v15 }
0x12ca   :  { %v4183_v46 = vpop.permute.xlu0 %4182 }
0x12cc   :  { %v4089_v10 = vpop.permute.xlu1 %4088 }
0x12cd   :  { %v4094_v21 = vsel %vm462_vm2, %v4089_v10, 0 }
0x12ce   :  { %4103 = vmatpush.bf16.msra.mxu2 %v4094_v21 }
0x12d4   :  { %v4139_v48 = vpop.permute.xlu1 %4138 }
0x12d5   :  { %v4226_v9 = vsel %vm171_vm1, %v6258_v32, %v4139_v48 }
0x12d6   :  { %v4234_v20 = vsel %vm2074_vm6, %v4226_v9, %v4171_v26  ;;  %v4731_v9 = vld [vmem:[#allocation8 + $0x8] sm:$0xff] }
0x12d7   :  { %4390 = vmatpush.bf16.msrb.mxu1 %v4731_v9 }
0x12dc   :  { %v4145_v27 = vpop.permute.xlu1 %4144 }
0x12dd   :  { %v4229_v62 = vsel %vm171_vm1, %v6293_v33, %v4145_v27 }
0x12de   :  { %v6705_v6 = vsel %vm2074_vm6, %v4229_v62, %v4177_v24 }
0x12e4   :  { %v4151_v2 = vpop.permute.xlu1 %4150 }
0x12e5   :  { %v4232_v56 = vsel %vm171_vm1, %v6295_v36, %v4151_v2 }
0x12ec   :  { %v4173_v45 = vpop.permute.xlu1 %4172 }
0x12f4   :  { %v4000_v53 = vpop.f32.mrf.mxu1  ;;  %v4179_v19 = vpop.permute.xlu1 %4178 }
0x12f5   :  { %4204 = vrot.lane.b32.xlu0 %v4000_v53, %s5181_s29 }
0x12f7   :  { %v3934_v58 = vpop.xlane.xlu2 %3933 }
0x12f8   :  { %5020 = vrcp.f32 %v3934_v58  ;;  %v4729_v58 = vld [vmem:[#allocation5 + $0x18] sm:$0xff] }
0x12f9   :  { %4300 = vmatpush.bf16.msrb.mxu0 %v4729_v58 }
0x12fc   :  { %v4002_v29 = vpop.f32.mrf.mxu1  ;;  %v4185_v16 = vpop.permute.xlu1 %4184 }
0x12fd   :  { %v4728_v29 = vld [vmem:[#allocation5 + $0x10] sm:$0xff] }
0x12fe   :  { %v5021_v37 = vpop.eup %5020  ;;  %4301 = vmatpush.bf16.msrb.mxu0 %v4728_v29  ;;  %v4734_v29 = vld [vmem:[%s6810_s8 + $0x10] sm:$0xff] }
0x12ff   :  { %v3952_v3 = vmul.f32 %v5021_v37, %v6666_v52  ;;  %v4110_v18 = vpop.permute.xlu2 %4109 }
0x1300   :  { %v4115_v44 = vsel %vm462_vm2, %v4110_v18, 0 }
0x1301   :  { %v3960_v33 = vpack.c.bf16 %v3952_v3, %v3952_v3  ;;  %4124 = vmatpush.bf16.msra.mxu3 %v4115_v44 }
0x1303   :  { %4685 = vmatmul.msk.bf16.vlgmr.msra.gmra.mxu2 %vm458_vm4, %v3960_v33 }
0x1304   :  { %4686 = vmatmul.msk.bf16.vlgmr.msra.gmra.mxu3 %vm458_vm4, %v3961_v47  ;;  %v6753_v47 = vld [vmem:[#allocation7] sm:$0xff] }
0x1307   :  { %v4141_v13 = vpop.permute.xlu2 %4140 }
0x1308   :  { %v3979_v22 = vpop.f32.mrf.mxu0  ;;  %v4227_v41 = vsel %vm171_vm1, %v6262_v38, %v4141_v13  ;;  %v4228_v38 = vsel %vm171_vm1, %v6273_v7, %v6693_v12  ;;  %v4231_v7 = vsel %vm171_vm1, %v6289_v57, %v6699_v8  ;;  %v4240_v57 = vsel %vm2074_vm6, %v4232_v56, %v4183_v46  ;;  %v4735_v56 = vld [vmem:[%s6810_s8 + $0x18] sm:$0xff] }
0x1309   :  { %4202 = vrot.lane.b32.xlu2 %v3979_v22, %s5181_s29  ;;  %v4235_v54 = vsel %vm2074_vm6, %v4227_v41, %v4173_v45  ;;  %v4278_v22 = vperm.slane %v6753_v47, 1  ;;  %v4730_v41 = vld [vmem:[#allocation8] sm:$0xff]  ;;  %4442 = vmatpush.bf16.msrb.mxu2 %v4735_v56 }
0x130a   :  { %4391 = vmatpush.bf16.msrb.mxu1 %v4730_v41 }
0x130d   :  { %4443 = vmatpush.bf16.msrb.mxu2 %v4734_v29 }
0x130f   :  { %v4147_v0 = vpop.permute.xlu2 %4146 }
0x1310   :  { %v3981_v28 = vpop.f32.mrf.mxu0  ;;  %v4230_v15 = vsel %vm171_vm1, %v6291_v14, %v4147_v0 }
0x1311   :  { %v4238_v26 = vsel %vm2074_vm6, %v4230_v15, %v4179_v19 }
0x1317   :  { %v4153_v23 = vpop.permute.xlu2 %4152 }
0x1318   :  { %v4021_v1 = vpop.f32.mrf.mxu2  ;;  %v4233_v34 = vsel %vm171_vm1, %v6297_v61, %v4153_v23 }
0x1319   :  { %4206 = vrot.lane.b32.xlu1 %v4021_v1, %s5181_s29  ;;  %v4241_v3 = vsel %vm2074_vm6, %v4233_v34, %v4185_v16  ;;  %v4758_v34 = vld [vmem:[%s6809_s7] ss:$0 sm:$0xff]  ;;  %s5183_s7 = smov [#allocation10]  }
0x131c   :  { %v4063_v5 = vpop.f32.mrf.mxu0 }
0x131d   :  { %4210 = vrot.lane.b32.xlu0 %v4063_v5, %s5181_s29 }
0x131f   :  { %v4175_v51 = vpop.permute.xlu2 %4174 }
0x1320   :  { %v4023_v55 = vpop.f32.mrf.mxu2  ;;  %v4236_v25 = vsel %vm2074_vm6, %v4228_v38, %v4175_v51 }
0x1324   :  { %v4065_v4 = vpop.f32.mrf.mxu0  ;;  %v4084_v31 = vpop.f32.mrf.mxu1 }
0x1325   :  { %4212 = vrot.lane.b32.xlu1 %v4084_v31, %s5181_s29 }
0x1327   :  { %v4181_v40 = vpop.permute.xlu2 %4180 }
0x1328   :  { %v4239_v12 = vsel %vm2074_vm6, %v4231_v7, %v4181_v40  ;;  %v4357_v7 = vperm.slane %v6753_v47, 6 }
0x132c   :  { %v4086_v52 = vpop.f32.mrf.mxu1 }
0x1348   :  { %v4042_v11 = vpop.f32.mrf.mxu3 }
0x1349   :  { %4208 = vrot.lane.b32.xlu2 %v4042_v11, %s5181_s29 }
0x1350   :  { %v4044_v50 = vpop.f32.mrf.mxu3 }
0x1363   :  { %v4203_v60 = vpop.permute.xlu2 %4202 }
0x1364   :  { %v4242_v39 = vsel %vm2083_vm5, %v4234_v20, %v4203_v60 }
0x1365   :  { %4258 = vst [vmem:[#allocation1] ss:$4 sm:$0xff] %v4242_v39 }
0x1367   :  { %v4205_v49 = vpop.permute.xlu0 %4204 }
0x1368   :  { %v4243_v43 = vsel %vm2083_vm5, %v4235_v54, %v4205_v49 }
0x1369   :  { %4260 = vst [vmem:[#allocation1 + $0x1] ss:$4 sm:$0xff] %v4243_v43 }
0x1386   :  { %v4105_v42 = vpop.f32.mrf.mxu2 }
0x1387   :  { %v4126_v32 = vpop.f32.mrf.mxu3  ;;  %4214 = vrot.lane.b32.xlu2 %v4105_v42, %s5181_s29 }
0x1388   :  { %4216 = vrot.lane.b32.xlu0 %v4126_v32, %s5181_s29 }
0x138b   :  { %v4207_v63 = vpop.permute.xlu1 %4206 }
0x138c   :  { %v4244_v35 = vsel %vm2083_vm5, %v4236_v25, %v4207_v63 }
0x138d   :  { %4262 = vst [vmem:[#allocation1 + $0x2] ss:$4 sm:$0xff] %v4244_v35 }
0x138e   :  { %v4107_v10 = vpop.f32.mrf.mxu2 }
0x138f   :  { %v4128_v21 = vpop.f32.mrf.mxu3  ;;  %v4211_v48 = vpop.permute.xlu0 %4210 }
0x1390   :  { %v4246_v27 = vsel %vm2083_vm5, %v4238_v26, %v4211_v48  ;;  %v4354_v21 = vperm.slane %v6753_v47, 5 }
0x1391   :  { %4266 = vst [vmem:[#allocation1 + $0x20] ss:$4 sm:$0xff] %v4246_v27 }
0x1397   :  { %v4213_v24 = vpop.permute.xlu1 %4212 }
0x1398   :  { %v4247_v14 = vsel %vm2083_vm5, %v4239_v12, %v4213_v24 }
0x1399   :  { %4268 = vst [vmem:[#allocation1 + $0x21] ss:$4 sm:$0xff] %v4247_v14 }
0x13a3   :  { %v4209_v62 = vpop.permute.xlu2 %4208 }
0x13a4   :  { %v4245_v53 = vsel %vm2083_vm5, %v6705_v6, %v4209_v62 }
0x13a5   :  { %4264 = vst [vmem:[#allocation1 + $0x3] ss:$4 sm:$0xff] %v4245_v53 }
0x13ac   :  { %v4273_v44 = vld.sshfl [vmem:[#allocation1] sm:$0xff pattern:$0x73625140] }
0x13e1   :  { %v4215_v37 = vpop.permute.xlu2 %4214 }
0x13e2   :  { %v4248_v8 = vsel %vm2083_vm5, %v4240_v57, %v4215_v37  ;;  %v4733_v37 = vld [vmem:[%s6810_s8 + $0x8] sm:$0xff]  ;;  %v4732_v57 = vld [vmem:[%s6810_s8] sm:$0xff]  ;;  %s4510_s8 = sshll.u32 %s5183_s7, 4  ;;  %s4511_s8 = int_to_ptr.vmem [resolvable:$true] %s4510_s8 }
0x13e3   :  { %4270 = vst [vmem:[#allocation1 + $0x22] ss:$4 sm:$0xff] %v4248_v8  ;;  %4444 = vmatpush.bf16.msrb.mxu2 %v4733_v37 }
0x13e7   :  { %4445 = vmatpush.bf16.msrb.mxu2 %v4732_v57 }
0x13fa   :  { %v4217_v6 = vpop.permute.xlu0 %4216 }
0x13fb   :  { %v4249_v18 = vsel %vm2083_vm5, %v4241_v3, %v4217_v6  ;;  %vm4434_vm5 = vcmask 523264  }
0x13fc   :  { %4272 = vst [vmem:[#allocation1 + $0x23] ss:$4 sm:$0xff] %v4249_v18 }
0x1403   :  { %v4274_v36 = vld.sshfl [vmem:[#allocation1 + $0x20] sm:$0xff pattern:$0x73625140] }
0x1404   :  { %v4277_v33 = vpack.c.bf16 %v4274_v36, %v4273_v44 }
0x1406   :  { %4695 = vmatmul.msk.bf16.vlgmr.msrb.gmra.mxu0 %vm126_vm0, %v4277_v33 }
0x1483   :  { %v4303_v28 = vpop.f32.mrf.mxu0 }
0x1484   :  { %v4304_v1 = vadd.f32 %v4303_v28, %v4278_v22 }
0x1486   :  { %v4308_v5 = vadd.f32 %v4304_v1, %v6005_v17 }
0x1488   :  { %v4310_v61 = vsel %vm126_vm0, %v4308_v5, 0.0 }
0x1489   :  { %4311 = vadd.xlane.f32.xlu1 %v4310_v61 }
0x148b   :  { %v4305_v55 = vpop.f32.mrf.mxu0 }
0x148c   :  { %v4306_v4 = vadd.f32 %v4305_v55, %v4278_v22  ;;  %v4409_v22 = vperm.slane %v6753_v47, 2 }
0x148e   :  { %v4309_v31 = vadd.f32 %v4306_v4, %v6007_v30 }
0x1490   :  { %v4313_v52 = vsel %vm126_vm0, %v4309_v31, 0.0 }
0x1491   :  { %4314 = vadd.xlane.f32.xlu2 %v4313_v52 }
0x14fc   :  { %v4312_v13 = vpop.xlane.xlu1 %4311 }
0x14fd   :  { %v4316_v0 = vmul.f32 %v4312_v13, %v5986_v59 }
0x14ff   :  { %v4318_v23 = vsub.f32 %v4308_v5, %v4316_v0 }
0x1501   :  { %v4320_v11 = vmul.f32 %v4318_v23, %v4318_v23 }
0x1503   :  { %v4322_v50 = vsel %vm126_vm0, %v4320_v11, 0.0 }
0x1504   :  { %v4315_v51 = vpop.xlane.xlu2 %4314  ;;  %4323 = vadd.xlane.f32.xlu0 %v4322_v50 }
0x1505   :  { %v4317_v17 = vmul.f32 %v4315_v51, %v5986_v59 }
0x1507   :  { %v4319_v40 = vsub.f32 %v4309_v31, %v4317_v17 }
0x1509   :  { %v4321_v2 = vmul.f32 %v4319_v40, %v4319_v40 }
0x150b   :  { %v4325_v46 = vsel %vm126_vm0, %v4321_v2, 0.0 }
0x150c   :  { %4326 = vadd.xlane.f32.xlu1 %v4325_v46 }
0x1577   :  { %v4324_v30 = vpop.xlane.xlu0 %4323 }
0x1578   :  { %v4328_v60 = vmul.f32 %v4324_v30, %v5986_v59 }
0x157a   :  { %v4330_v20 = vadd.f32 1e-05, %v4328_v60 }
0x157c   :  { %5022 = vrsqrt.f32 %v4330_v20  ;;  %vm4338_vm15 = vweird.f32 %v4330_v20 }
0x157f   :  { %v4327_v39 = vpop.xlane.xlu1 %4326 }
0x1580   :  { %v4329_v45 = vmul.f32 %v4327_v39, %v5986_v59 }
0x1582   :  { %v5023_v54 = vpop.eup %5022  ;;  %v4331_v49 = vadd.f32 1e-05, %v4329_v45 }
0x1583   :  { %v4333_v43 = vmul.f32 %v5023_v54, %v4330_v20  ;;  %vm4339_vm14 = vweird.f32 %v5023_v54 }
0x1584   :  { %5024 = vrsqrt.f32 %v4331_v49  ;;  %vm4340_vm1 = vmor %vm4338_vm15, %vm4339_vm14  ;;  %vm4348_vm3 = vweird.f32 %v4331_v49 }
0x1585   :  { %v4334_v19 = vmul.f32 %v5023_v54, %v4333_v43 }
0x1587   :  { %v4335_v16 = vmul.f32 0.5, %v4334_v19 }
0x1589   :  { %v4336_v42 = vsub.f32 1.5, %v4335_v16 }
0x158a   :  { %v5025_v32 = vpop.eup %5024 }
0x158b   :  { %v4337_v38 = vmul.f32 %v5023_v54, %v4336_v42  ;;  %v4343_v25 = vmul.f32 %v5025_v32, %v4331_v49  ;;  %vm4349_vm2 = vweird.f32 %v5025_v32 }
0x158c   :  { %vm4350_vm4 = vmor %vm4348_vm3, %vm4349_vm2 }
0x158d   :  { %v4344_v63 = vmul.f32 %v5025_v32, %v4343_v25  ;;  %v4341_v15 = vsel %vm4340_vm1, %v5023_v54, %v4337_v38  ;;  %v4498_v38 = vperm.slane %v6753_v47, 7 }
0x158e   :  { %v4352_v26 = vmul.f32 %v4341_v15, %v4318_v23 }
0x158f   :  { %v4345_v35 = vmul.f32 0.5, %v4344_v63 }
0x1590   :  { %v4355_v12 = vmul.f32 %v4354_v21, %v4352_v26 }
0x1591   :  { %v4346_v10 = vsub.f32 1.5, %v4345_v35  ;;  %v4759_v35 = vld [vmem:[#allocation7 + $0x8] ss:$0 sm:$0xff] }
0x1592   :  { %v4358_v62 = vadd.f32 %v4357_v7, %v4355_v12 }
0x1593   :  { %v4347_v48 = vmul.f32 %v5025_v32, %v4346_v10 }
0x1595   :  { %v4351_v27 = vsel %vm4350_vm4, %v5025_v32, %v4347_v48 }
0x1596   :  { %v4353_v24 = vmul.f32 %v4351_v27, %v4319_v40 }
0x1598   :  { %v4356_v14 = vmul.f32 %v4354_v21, %v4353_v24 }
0x159a   :  { %v4359_v53 = vadd.f32 %v4357_v7, %v4356_v14 }
0x159c   :  { %v4364_v58 = vpack.c.bf16 %v4359_v53, %v4358_v62 }
0x159e   :  { %4704 = vmatmul.msk.bf16.vlgmr.msrb.gmra.mxu1 %vm126_vm0, %v4364_v58 }
0x161b   :  { %v4393_v8 = vpop.f32.mrf.mxu1 }
0x161c   :  { %v4394_v3 = vadd.f32 %v4758_v34, %v4393_v8 }
0x161e   :  { %v4398_v44 = vmax.f32 %v4394_v3, 0.0 }
0x1623   :  { %v4395_v6 = vpop.f32.mrf.mxu1 }
0x1624   :  { %v4396_v18 = vadd.f32 %v4758_v34, %v4395_v6 }
0x1626   :  { %v4399_v36 = vmax.f32 %v4396_v18, 0.0 }
0x1628   :  { %v4408_v33 = vpack.c.bf16 %v4399_v36, %v4398_v44 }
0x162a   :  { %4721 = vmatmul.msk.bf16.vlgmr.msrb.gmra.mxu2 %vm4434_vm5, %v4408_v33 }
0x16ad   :  { %v4447_v28 = vpop.f32.mrf.mxu2 }
0x16ae   :  { %v4448_v1 = vadd.f32 %v4447_v28, %v4409_v22 }
0x16b0   :  { %v4452_v5 = vadd.f32 %v4448_v1, %v4358_v62 }
0x16b2   :  { %v4454_v61 = vsel %vm126_vm0, %v4452_v5, 0.0 }
0x16b3   :  { %4455 = vadd.xlane.f32.xlu2 %v4454_v61 }
0x16b5   :  { %v4449_v55 = vpop.f32.mrf.mxu2 }
0x16b6   :  { %v4450_v4 = vadd.f32 %v4449_v55, %v4409_v22 }
0x16b8   :  { %v4453_v31 = vadd.f32 %v4450_v4, %v4359_v53 }
0x16ba   :  { %v4457_v52 = vsel %vm126_vm0, %v4453_v31, 0.0 }
0x16bb   :  { %4458 = vadd.xlane.f32.xlu0 %v4457_v52 }
0x1726   :  { %v4456_v13 = vpop.xlane.xlu2 %4455 }
0x1727   :  { %v4460_v0 = vmul.f32 %v4456_v13, %v5986_v59 }
0x1729   :  { %v4462_v23 = vsub.f32 %v4452_v5, %v4460_v0 }
0x172b   :  { %v4464_v11 = vmul.f32 %v4462_v23, %v4462_v23 }
0x172d   :  { %v4466_v50 = vsel %vm126_vm0, %v4464_v11, 0.0 }
0x172e   :  { %v4459_v51 = vpop.xlane.xlu0 %4458  ;;  %4467 = vadd.xlane.f32.xlu1 %v4466_v50 }
0x172f   :  { %v4461_v17 = vmul.f32 %v4459_v51, %v5986_v59 }
0x1731   :  { %v4463_v40 = vsub.f32 %v4453_v31, %v4461_v17 }
0x1733   :  { %v4465_v2 = vmul.f32 %v4463_v40, %v4463_v40 }
0x1735   :  { %v4469_v46 = vsel %vm126_vm0, %v4465_v2, 0.0 }
0x1736   :  { %4470 = vadd.xlane.f32.xlu2 %v4469_v46 }
0x17a1   :  { %v4468_v30 = vpop.xlane.xlu1 %4467 }
0x17a2   :  { %v4472_v9 = vmul.f32 %v4468_v30, %v5986_v59 }
0x17a4   :  { %v4474_v60 = vadd.f32 1e-05, %v4472_v9 }
0x17a6   :  { %5026 = vrsqrt.f32 %v4474_v60  ;;  %vm4482_vm7 = vweird.f32 %v4474_v60 }
0x17a9   :  { %v4471_v20 = vpop.xlane.xlu2 %4470 }
0x17aa   :  { %v4473_v41 = vmul.f32 %v4471_v20, %v5986_v59 }
0x17ac   :  { %v5027_v39 = vpop.eup %5026  ;;  %v4475_v45 = vadd.f32 1e-05, %v4473_v41 }
0x17ad   :  { %v4477_v54 = vmul.f32 %v5027_v39, %v4474_v60  ;;  %vm4483_vm6 = vweird.f32 %v5027_v39 }
0x17ae   :  { %5028 = vrsqrt.f32 %v4475_v45  ;;  %vm4484_vm8 = vmor %vm4482_vm7, %vm4483_vm6  ;;  %vm4492_vm10 = vweird.f32 %v4475_v45 }
0x17af   :  { %v4478_v49 = vmul.f32 %v5027_v39, %v4477_v54 }
0x17b1   :  { %v4479_v43 = vmul.f32 0.5, %v4478_v49 }
0x17b3   :  { %v4480_v19 = vsub.f32 1.5, %v4479_v43 }
0x17b4   :  { %v5029_v16 = vpop.eup %5028 }
0x17b5   :  { %v4481_v42 = vmul.f32 %v5027_v39, %v4480_v19  ;;  %v4487_v32 = vmul.f32 %v5029_v16, %v4475_v45  ;;  %vm4493_vm9 = vweird.f32 %v5029_v16 }
0x17b6   :  { %vm4494_vm11 = vmor %vm4492_vm10, %vm4493_vm9 }
0x17b7   :  { %v4485_v25 = vsel %vm4484_vm8, %v5027_v39, %v4481_v42  ;;  %v4488_v63 = vmul.f32 %v5029_v16, %v4487_v32 }
0x17b8   :  { %v4496_v15 = vmul.f32 %v4485_v25, %v4462_v23 }
0x17b9   :  { %v4489_v59 = vmul.f32 0.5, %v4488_v63 }
0x17ba   :  { %v4499_v10 = vmul.f32 %v4498_v38, %v4496_v15 }
0x17bb   :  { %v4490_v21 = vsub.f32 1.5, %v4489_v59 }
0x17bc   :  { %v4502_v26 = vadd.f32 %v4759_v35, %v4499_v10 }
0x17bd   :  { %v4491_v48 = vmul.f32 %v5029_v16, %v4490_v21 }
0x17be   :  { %4504 = vst.msk [vmem:[#allocation10] sm:$0xff] %vm126_vm0, %v4502_v26 }
0x17bf   :  { %v4495_v27 = vsel %vm4494_vm11, %v5029_v16, %v4491_v48 }
0x17c0   :  { %v4497_v7 = vmul.f32 %v4495_v27, %v4463_v40 }
0x17c2   :  { %v4500_v47 = vmul.f32 %v4498_v38, %v4497_v7 }
0x17c4   :  { %v4503_v12 = vadd.f32 %v4759_v35, %v4500_v47 }
0x17c6   :  { %4505 = vst.msk [vmem:[#allocation10 + $0x8] sm:$0xff] %vm126_vm0, %v4503_v12 }
0x17c7   :  { %4518 = dma.vmem_to_hbm [thread:$0]  %s4511_s8, 256, %s4513_s26, [#allocation4], %s5166_s21, %s5166_s21, %s5167_s4  }
0x17c8   :  { %5160 = dma.done.wait [#allocation4], 256  }
0x17c9   :  { %5161 = vsyncadd [#allocation4], 4294967040 }
0x17ca   :  { %4523 = vsyncpa [#allocation3], 1 }
0x17cb   :  { %4524 = vsyncpa [#allocation6], 1 }
0x17cc   :  { %4525 = vsyncpa [#allocation9], 1 }
0x17cd   :  { %4526 = vsyncpa [#allocation4], 1 }

</bundles_post_ra>
